<compile_context>
chip_gen: v6e
topology: v6e:2x2x1
jax: 0.10.0
libtpu: 0.0.40
codegen_flags: <defaults>
</compile_context>

<pallas_src>
import jax
import jax.numpy as jnp
from jax import lax
from jax.experimental import pallas as pl
from jax.experimental.pallas import tpu as pltpu


_TAPS = tuple((ky, kx) for ky in range(3) for kx in range(3))


def _round_up(v, m):
    return ((v + m - 1) // m) * m


# ------------------------------ Pallas kernel -------------------------------

def _make_block_kernel(s, Ho, Wo, Wrow, B, Cin, Cout, Cp, Rs2, front, proj):
    """Fused ResidualBlock kernel for one static configuration.

    Layout: activations are flat (rows, channels) buffers with row pitch Wrow
    (Wo valid columns + junk), so each 3x3 tap is a contiguous row range.
    """
    n_ph = s * s
    Mrow = Ho * Wrow                    # rows per image (incl. junk columns)
    M = B * Mrow                        # rows per grid step (batch tile)
    int_start = front + Wrow + 1        # sublane-aligned start of h1 interior
    tail_start = front + (Ho + 1) * Wrow + 1

    def kernel(*refs):
        phase_refs = refs[:n_ph]
        if proj:
            (w1_ref, b1_ref, w2_ref, b2_ref, wsc_ref, bsc_ref,
             o_ref, h1p_ref) = refs[n_ph:]
        else:
            (w1_ref, b1_ref, w2_ref, b2_ref, o_ref, h1p_ref) = refs[n_ph:]

        # Zero only the halo / overread rows of the h1 scratch; the interior
        # is fully overwritten below.  (Tiny: ~2*Wrow rows, aligned stores.)
        h1p_ref[:, :int_start, :] = jnp.zeros((B, int_start, Cout), jnp.bfloat16)
        h1p_ref[:, tail_start:, :] = jnp.zeros(
            (B, Rs2 - tail_start, Cout), jnp.bfloat16)

        def tap_in(ky, kx):
            # contiguous row-range of the (phase-split, padded, bf16) input
            ph = phase_refs[(ky % s) * s + (kx % s)]
            start = (ky // s) * Wrow + (kx // s)
            return ph[:, start:start + Mrow, :].reshape(M, Cin)

        # ---- stage 1: conv3x3(stride s) + BN1 + ReLU (9 contiguous tap dots)
        ky0, kx0 = _TAPS[0]
        acc1 = jnp.dot(tap_in(ky0, kx0), w1_ref[0],
                       preferred_element_type=jnp.float32)
        for t_i, (ky, kx) in enumerate(_TAPS[1:], start=1):
            acc1 = acc1 + jnp.dot(tap_in(ky, kx), w1_ref[t_i],
                                  preferred_element_type=jnp.float32)
        # mask junk columns (col >= Wo) so the single contiguous store below
        # also writes the zero halo of padded h1
        col = lax.broadcasted_iota(jnp.int32, (M, 1), 0) % Wrow
        keep = (col < Wo).astype(jnp.float32)
        h1 = jnp.maximum(acc1 + b1_ref[...], 0.0) * keep
        # TODO(synk): Dropout2d(0.1) channel drop / BN stat updates are
        # train-mode only; eval-mode (identity) semantics are implemented.
        h1p_ref[:, int_start:int_start + Mrow, :] = (
            h1.astype(jnp.bfloat16).reshape(B, Mrow, Cout))

        # ---- stage 2: conv3x3(stride 1) + BN2 + ReLU on the padded scratch
        def tap_h1(ky, kx):
            start = front + ky * Wrow + kx
            return h1p_ref[:, start:start + Mrow, :].reshape(M, Cout)

        acc2 = jnp.dot(tap_h1(0, 0), w2_ref[0],
                       preferred_element_type=jnp.float32)
        for t_i, (ky, kx) in enumerate(_TAPS[1:], start=1):
            acc2 = acc2 + jnp.dot(tap_h1(ky, kx), w2_ref[t_i],
                                  preferred_element_type=jnp.float32)
        out = jnp.maximum(acc2 + b2_ref[...], 0.0)

        # ---- shortcut: center-tap rows ARE the 1x1/stride-s samples of x
        sct = tap_in(1, 1)
        if proj:
            sc = jnp.dot(sct, wsc_ref[...], preferred_element_type=jnp.float32)
            sc = jnp.maximum(sc + bsc_ref[...], 0.0)
        else:
            # identity shortcut: direct add (no eye() matmul, no extra weights)
            sc = sct.astype(jnp.float32)
            if Cp > Cin:
                sc = jnp.concatenate(
                    [sc, jnp.zeros((M, Cp - Cin), jnp.float32)], axis=-1)

        o_ref[...] = (out + sc).reshape(B, Mrow, Cp).astype(o_ref.dtype)

    return kernel


# -------------------------------- JAX glue ----------------------------------

def _bn_fold(bn, eps=1e-5):
    gamma, beta, mean, var = bn
    scale = gamma / jnp.sqrt(var + eps)
    return scale, beta - mean * scale


def residual_block_forward(x_nchw, params, stride):
    """ResidualBlock.forward (eval mode). x: NCHW float32 -> out NCHW float32."""
    s = int(stride)
    x = jnp.transpose(x_nchw, (0, 2, 3, 1)).astype(jnp.float32)   # NCHW -> NHWC
    N, H, W, Cin = x.shape
    Cout = params["w1"].shape[-1]
    Ho = (H + 2 - 3) // s + 1
    Wo = (W + 2 - 3) // s + 1
    Cp = _round_up(Cout, 128)            # lane-dense output channels

    # flattened-row geometry (every tap = contiguous row range of pitch Wrow)
    Wrow = Wo + 2
    while (Ho * Wrow) % 8:               # keep row counts sublane-aligned
        Wrow += 1
    Mrow = Ho * Wrow
    oy_max = 2 // s
    Hs1 = oy_max + Ho + 1                # phase rows incl. overread allowance
    Rs1 = Hs1 * Wrow
    front = (-(Wrow + 1)) % 8            # aligns the h1 interior store
    Rs2 = _round_up(front + (Ho + 2) * Wrow + 2, 8)

    # batch tiling: enough images per grid step to amortize per-step overhead
    b_tile = max(1, min(N, max(1, 2048 // Mrow)))
    n_tiles = -(-N // b_tile)
    N_pad = n_tiles * b_tile

    # host prep: pad, phase-split (strided taps -> unit stride), pad each phase
    # to a common (Hs1, Wrow), flatten rows, cast activations to bf16 once
    xp = jnp.pad(x, ((0, N_pad - N), (1, 1), (1, 1), (0, 0)))
    phases = []
    for py in range(s):
        for px in range(s):
            ph = xp[:, py::s, px::s, :]
            ph = jnp.pad(ph, ((0, 0), (0, Hs1 - ph.shape[1]),
                              (0, Wrow - ph.shape[2]), (0, 0)))
            phases.append(ph.reshape(N_pad, Rs1, Cin).astype(jnp.bfloat16))

    # fold BN scale into the conv weights (bf16 MXU operands); biases stay f32
    s1, b1 = _bn_fold(params["bn1"])
    w1 = (params["w1"] * s1).reshape(9, Cin, Cout).astype(jnp.bfloat16)
    b1 = b1.reshape(1, Cout).astype(jnp.float32)
    s2, b2 = _bn_fold(params["bn2"])
    w2 = jnp.pad(params["w2"] * s2, ((0, 0), (0, 0), (0, 0), (0, Cp - Cout)))
    w2 = w2.reshape(9, Cout, Cp).astype(jnp.bfloat16)
    b2 = jnp.pad(b2.reshape(1, Cout), ((0, 0), (0, Cp - Cout))).astype(jnp.float32)

    proj = "w_sc" in params
    inputs = list(phases) + [w1, b1, w2, b2]
    weight_specs = [
        pl.BlockSpec(w1.shape, lambda n: (0, 0, 0)),
        pl.BlockSpec(b1.shape, lambda n: (0, 0)),
        pl.BlockSpec(w2.shape, lambda n: (0, 0, 0)),
        pl.BlockSpec(b2.shape, lambda n: (0, 0)),
    ]
    if proj:
        ssc, bsc = _bn_fold(params["bn_sc"])
        wsc = jnp.pad(params["w_sc"][0, 0] * ssc, ((0, 0), (0, Cp - Cout)))
        wsc = wsc.astype(jnp.bfloat16)
        bsc = jnp.pad(bsc.reshape(1, Cout),
                      ((0, 0), (0, Cp - Cout))).astype(jnp.float32)
        inputs += [wsc, bsc]
        weight_specs += [pl.BlockSpec(wsc.shape, lambda n: (0, 0)),
                         pl.BlockSpec(bsc.shape, lambda n: (0, 0))]

    phase_specs = [pl.BlockSpec((b_tile, Rs1, Cin), lambda n: (n, 0, 0))
                   for _ in phases]

    kernel = _make_block_kernel(s, Ho, Wo, Wrow, b_tile, Cin, Cout, Cp,
                                Rs2, front, proj)

    flops = 2 * N_pad * Mrow * (9 * Cin * Cout + 9 * Cout * Cp
                                + (Cin * Cp if proj else 0))
    bytes_accessed = (sum(int(a.size) * a.dtype.itemsize for a in inputs)
                      + 4 * N_pad * Mrow * Cp)

    out = pl.pallas_call(
        kernel,
        out_shape=jax.ShapeDtypeStruct((N_pad, Mrow, Cp), jnp.float32),
        grid=(n_tiles,),
        in_specs=phase_specs + weight_specs,
        out_specs=pl.BlockSpec((b_tile, Mrow, Cp), lambda n: (n, 0, 0)),
        scratch_shapes=[pltpu.VMEM((b_tile, Rs2, Cout), jnp.bfloat16)],
        compiler_params=pltpu.CompilerParams(dimension_semantics=("parallel",)),
        cost_estimate=pl.CostEstimate(flops=int(flops), transcendentals=0,
                                      bytes_accessed=int(bytes_accessed)),
    )(*inputs)

    out = out.reshape(N_pad, Ho, Wrow, Cp)[:N, :, :Wo, :Cout]
    return jnp.transpose(out, (0, 3, 1, 2))                  # NHWC -> NCHW


# ------------------------------- parameters ---------------------------------

def init_params(key, in_channels, out_channels, stride):
    """Deterministic synthetic parameters (PyTorch Conv2d/BatchNorm2d shapes)."""
    ks = jax.random.split(key, 6)

    def conv_w(k, kh, kw, cin, cout):
        fan_in = kh * kw * cin
        bound = 1.0 / jnp.sqrt(float(fan_in))
        # stored HWIO (kh, kw, cin, cout) == torch (cout, cin, kh, kw) transposed
        return jax.random.uniform(k, (kh, kw, cin, cout), jnp.float32, -bound, bound)

    def bn_params(k, c):
        k1, k2, k3, k4 = jax.random.split(k, 4)
        gamma = 1.0 + 0.1 * jax.random.normal(k1, (c,), jnp.float32)
        beta = 0.1 * jax.random.normal(k2, (c,), jnp.float32)
        mean = 0.1 * jax.random.normal(k3, (c,), jnp.float32)
        var = 1.0 + 0.1 * jax.random.uniform(k4, (c,), jnp.float32)
        return (gamma, beta, mean, var)

    params = {
        "w1": conv_w(ks[0], 3, 3, in_channels, out_channels),
        "bn1": bn_params(ks[1], out_channels),
        "w2": conv_w(ks[2], 3, 3, out_channels, out_channels),
        "bn2": bn_params(ks[3], out_channels),
    }
    if not (stride == 1 and in_channels == out_channels):
        params["w_sc"] = conv_w(ks[4], 1, 1, in_channels, out_channels)
        params["bn_sc"] = bn_params(ks[5], out_channels)
    return params


# ----------------------------- pure-JAX reference ---------------------------

def _reference_forward(x_nchw, params, stride):
    """XLA reference mirroring the kernel's bf16 rounding points (f32 accum)."""
    f32 = jnp.float32

    def bf16(a):
        return a.astype(jnp.bfloat16).astype(f32)

    def conv(h, w, s, pad):
        return lax.conv_general_dilated(
            h, w, (s, s), pad, dimension_numbers=("NHWC", "HWIO", "NHWC"),
            precision=lax.Precision.HIGHEST)

    x = jnp.transpose(x_nchw, (0, 2, 3, 1)).astype(f32)
    xb = bf16(x)
    p1 = ((1, 1), (1, 1))

    s1, b1 = _bn_fold(params["bn1"])
    h = jnp.maximum(conv(xb, bf16(params["w1"] * s1), stride, p1) + b1, 0.0)
    s2, b2 = _bn_fold(params["bn2"])
    h = jnp.maximum(conv(bf16(h), bf16(params["w2"] * s2), 1, p1) + b2, 0.0)

    if "w_sc" in params:
        ssc, bsc = _bn_fold(params["bn_sc"])
        sc = jnp.maximum(
            conv(xb, bf16(params["w_sc"] * ssc), stride, ((0, 0), (0, 0))) + bsc, 0.0)
    else:
        sc = xb
    out = h + sc
    return jnp.transpose(out, (0, 3, 1, 2))


# ---------------------------------- main ------------------------------------

if __name__ == "__main__":
    key = jax.random.PRNGKey(0)
    k_x, k_p1, k_p2 = jax.random.split(key, 3)

    N, Cin, H, W = 2, 4, 16, 16
    x = jax.random.normal(k_x, (N, Cin, H, W), jnp.float32)

    # block 1: projection shortcut (stride 2, channel change) — like the first
    # block of a CustomResNet layer; block 2: identity shortcut (stride 1).
    params1 = init_params(k_p1, Cin, 8, 2)
    params2 = init_params(k_p2, 8, 8, 1)

    fwd = jax.jit(residual_block_forward, static_argnums=2)
    out1 = fwd(x, params1, 2)
    out2 = fwd(out1, params2, 1)
    out1, out2 = jax.block_until_ready((out1, out2))

    assert out1.shape == (N, 8, H // 2, W // 2), out1.shape
    assert out2.shape == (N, 8, H // 2, W // 2), out2.shape

    ref1 = _reference_forward(x, params1, 2)
    ref2 = _reference_forward(out1, params2, 1)
    err1 = float(jnp.max(jnp.abs(out1 - ref1)))
    err2 = float(jnp.max(jnp.abs(out2 - ref2)))
    if not (err1 < 2e-2 and err2 < 2e-2):   # bf16-MXU path vs bf16-rounded ref
        raise AssertionError(f"Pallas/reference mismatch: {err1} / {err2}")

    print("KERNEL_OK")
</pallas_src>

<mosaic_0001>
module attributes {stable_mosaic.version = 11 : i64} {
  func.func @kernel(%arg0: i32, %arg1: memref<2x100x4xbf16, #tpu.memory_space<vmem>>, %arg2: memref<2x100x4xbf16, #tpu.memory_space<vmem>>, %arg3: memref<2x100x4xbf16, #tpu.memory_space<vmem>>, %arg4: memref<2x100x4xbf16, #tpu.memory_space<vmem>>, %arg5: memref<9x4x8xbf16, #tpu.memory_space<vmem>>, %arg6: memref<1x8xf32, #tpu.memory_space<vmem>>, %arg7: memref<9x8x128xbf16, #tpu.memory_space<vmem>>, %arg8: memref<1x128xf32, #tpu.memory_space<vmem>>, %arg9: memref<4x128xbf16, #tpu.memory_space<vmem>>, %arg10: memref<1x128xf32, #tpu.memory_space<vmem>>, %arg11: memref<2x80x128xf32, #tpu.memory_space<vmem>>, %arg12: memref<2x112x8xbf16, #tpu.memory_space<vmem>>) attributes {dimension_semantics = [#tpu.dimension_semantics<parallel>], iteration_bounds = array<i64: 1>, scalar_prefetch = 0 : i64, scratch_operands = 1 : i64, tpu.core_type = #tpu.core_type<tc>, window_params = [{transform_indices = @transform_0, window_bounds = array<i64: 2, 100, 4>}, {transform_indices = @transform_1, window_bounds = array<i64: 2, 100, 4>}, {transform_indices = @transform_2, window_bounds = array<i64: 2, 100, 4>}, {transform_indices = @transform_3, window_bounds = array<i64: 2, 100, 4>}, {pipeline_mode = #tpu.pipeline_mode<synchronous>, transform_indices = @transform_4, window_bounds = array<i64: 9, 4, 8>}, {pipeline_mode = #tpu.pipeline_mode<synchronous>, transform_indices = @transform_5, window_bounds = array<i64: 1, 8>}, {pipeline_mode = #tpu.pipeline_mode<synchronous>, transform_indices = @transform_6, window_bounds = array<i64: 9, 8, 128>}, {pipeline_mode = #tpu.pipeline_mode<synchronous>, transform_indices = @transform_7, window_bounds = array<i64: 1, 128>}, {pipeline_mode = #tpu.pipeline_mode<synchronous>, transform_indices = @transform_8, window_bounds = array<i64: 4, 128>}, {pipeline_mode = #tpu.pipeline_mode<synchronous>, transform_indices = @transform_9, window_bounds = array<i64: 1, 128>}, {transform_indices = @transform_10, window_bounds = array<i64: 2, 80, 128>}]} {
    %cst = arith.constant 0.000000e+00 : bf16
    %0 = vector.broadcast %cst : bf16 to vector<2x16x8xbf16>
    %c0 = arith.constant 0 : index
    %c0_0 = arith.constant 0 : index
    %c0_1 = arith.constant 0 : index
    %1 = vector.load %arg12[%c0, %c0_0, %c0_1] : memref<2x112x8xbf16, #tpu.memory_space<vmem>>, vector<2x16x8xbf16>
    tpu.vector_store %arg12[%c0, %c0_0, %c0_1], %0 {strides = array<i32>} : memref<2x112x8xbf16, #tpu.memory_space<vmem>>, vector<2x16x8xbf16>,
    %cst_2 = arith.constant 0.000000e+00 : bf16
    %2 = vector.broadcast %cst_2 : bf16 to vector<2x16x8xbf16>
    %c0_3 = arith.constant 0 : index
    %c96 = arith.constant 96 : index
    %c0_4 = arith.constant 0 : index
    %3 = vector.load %arg12[%c0_3, %c96, %c0_4] : memref<2x112x8xbf16, #tpu.memory_space<vmem>>, vector<2x16x8xbf16>
    tpu.vector_store %arg12[%c0_3, %c96, %c0_4], %2 {strides = array<i32>} : memref<2x112x8xbf16, #tpu.memory_space<vmem>>, vector<2x16x8xbf16>,
    %c0_5 = arith.constant 0 : index
    %c0_6 = arith.constant 0 : index
    %c0_7 = arith.constant 0 : index
    %4 = vector.load %arg1[%c0_5, %c0_6, %c0_7] : memref<2x100x4xbf16, #tpu.memory_space<vmem>>, vector<2x80x4xbf16>
    %5 = vector.shape_cast %4 : vector<2x80x4xbf16> to vector<160x4xbf16>
    %c0_8 = arith.constant 0 : index
    %c0_9 = arith.constant 0 : index
    %c0_10 = arith.constant 0 : index
    %6 = vector.load %arg5[%c0_8, %c0_9, %c0_10] : memref<9x4x8xbf16, #tpu.memory_space<vmem>>, vector<1x4x8xbf16>
    %7 = vector.shape_cast %6 : vector<1x4x8xbf16> to vector<4x8xbf16>
    %cst_11 = arith.constant dense<0.000000e+00> : vector<160x8xf32>
    %8 = tpu.matmul %5, %7, %cst_11 {dimension_numbers = #tpu.dot_dimension_numbers<[1], [0], [0], [1], [0, 0, 1, 1], [], []>} : vector<160x4xbf16>, vector<4x8xbf16>, vector<160x8xf32> -> vector<160x8xf32>
    %c0_12 = arith.constant 0 : index
    %c0_13 = arith.constant 0 : index
    %c0_14 = arith.constant 0 : index
    %9 = vector.load %arg2[%c0_12, %c0_13, %c0_14] : memref<2x100x4xbf16, #tpu.memory_space<vmem>>, vector<2x80x4xbf16>
    %10 = vector.shape_cast %9 : vector<2x80x4xbf16> to vector<160x4xbf16>
    %c1 = arith.constant 1 : index
    %c0_15 = arith.constant 0 : index
    %c0_16 = arith.constant 0 : index
    %11 = vector.load %arg5[%c1, %c0_15, %c0_16] : memref<9x4x8xbf16, #tpu.memory_space<vmem>>, vector<1x4x8xbf16>
    %12 = vector.shape_cast %11 : vector<1x4x8xbf16> to vector<4x8xbf16>
    %cst_17 = arith.constant dense<0.000000e+00> : vector<160x8xf32>
    %13 = tpu.matmul %10, %12, %cst_17 {dimension_numbers = #tpu.dot_dimension_numbers<[1], [0], [0], [1], [0, 0, 1, 1], [], []>} : vector<160x4xbf16>, vector<4x8xbf16>, vector<160x8xf32> -> vector<160x8xf32>
    %14 = arith.addf %8, %13 : vector<160x8xf32>
    %c0_18 = arith.constant 0 : index
    %c1_19 = arith.constant 1 : index
    %c0_20 = arith.constant 0 : index
    %15 = vector.load %arg1[%c0_18, %c1_19, %c0_20] : memref<2x100x4xbf16, #tpu.memory_space<vmem>>, vector<2x80x4xbf16>
    %16 = vector.shape_cast %15 : vector<2x80x4xbf16> to vector<160x4xbf16>
    %c2 = arith.constant 2 : index
    %c0_21 = arith.constant 0 : index
    %c0_22 = arith.constant 0 : index
    %17 = vector.load %arg5[%c2, %c0_21, %c0_22] : memref<9x4x8xbf16, #tpu.memory_space<vmem>>, vector<1x4x8xbf16>
    %18 = vector.shape_cast %17 : vector<1x4x8xbf16> to vector<4x8xbf16>
    %cst_23 = arith.constant dense<0.000000e+00> : vector<160x8xf32>
    %19 = tpu.matmul %16, %18, %cst_23 {dimension_numbers = #tpu.dot_dimension_numbers<[1], [0], [0], [1], [0, 0, 1, 1], [], []>} : vector<160x4xbf16>, vector<4x8xbf16>, vector<160x8xf32> -> vector<160x8xf32>
    %20 = arith.addf %14, %19 : vector<160x8xf32>
    %c0_24 = arith.constant 0 : index
    %c0_25 = arith.constant 0 : index
    %c0_26 = arith.constant 0 : index
    %21 = vector.load %arg3[%c0_24, %c0_25, %c0_26] : memref<2x100x4xbf16, #tpu.memory_space<vmem>>, vector<2x80x4xbf16>
    %22 = vector.shape_cast %21 : vector<2x80x4xbf16> to vector<160x4xbf16>
    %c3 = arith.constant 3 : index
    %c0_27 = arith.constant 0 : index
    %c0_28 = arith.constant 0 : index
    %23 = vector.load %arg5[%c3, %c0_27, %c0_28] : memref<9x4x8xbf16, #tpu.memory_space<vmem>>, vector<1x4x8xbf16>
    %24 = vector.shape_cast %23 : vector<1x4x8xbf16> to vector<4x8xbf16>
    %cst_29 = arith.constant dense<0.000000e+00> : vector<160x8xf32>
    %25 = tpu.matmul %22, %24, %cst_29 {dimension_numbers = #tpu.dot_dimension_numbers<[1], [0], [0], [1], [0, 0, 1, 1], [], []>} : vector<160x4xbf16>, vector<4x8xbf16>, vector<160x8xf32> -> vector<160x8xf32>
    %26 = arith.addf %20, %25 : vector<160x8xf32>
    %c0_30 = arith.constant 0 : index
    %c0_31 = arith.constant 0 : index
    %c0_32 = arith.constant 0 : index
    %27 = vector.load %arg4[%c0_30, %c0_31, %c0_32] : memref<2x100x4xbf16, #tpu.memory_space<vmem>>, vector<2x80x4xbf16>
    %28 = vector.shape_cast %27 : vector<2x80x4xbf16> to vector<160x4xbf16>
    %c4 = arith.constant 4 : index
    %c0_33 = arith.constant 0 : index
    %c0_34 = arith.constant 0 : index
    %29 = vector.load %arg5[%c4, %c0_33, %c0_34] : memref<9x4x8xbf16, #tpu.memory_space<vmem>>, vector<1x4x8xbf16>
    %30 = vector.shape_cast %29 : vector<1x4x8xbf16> to vector<4x8xbf16>
    %cst_35 = arith.constant dense<0.000000e+00> : vector<160x8xf32>
    %31 = tpu.matmul %28, %30, %cst_35 {dimension_numbers = #tpu.dot_dimension_numbers<[1], [0], [0], [1], [0, 0, 1, 1], [], []>} : vector<160x4xbf16>, vector<4x8xbf16>, vector<160x8xf32> -> vector<160x8xf32>
    %32 = arith.addf %26, %31 : vector<160x8xf32>
    %c0_36 = arith.constant 0 : index
    %c1_37 = arith.constant 1 : index
    %c0_38 = arith.constant 0 : index
    %33 = vector.load %arg3[%c0_36, %c1_37, %c0_38] : memref<2x100x4xbf16, #tpu.memory_space<vmem>>, vector<2x80x4xbf16>
    %34 = vector.shape_cast %33 : vector<2x80x4xbf16> to vector<160x4xbf16>
    %c5 = arith.constant 5 : index
    %c0_39 = arith.constant 0 : index
    %c0_40 = arith.constant 0 : index
    %35 = vector.load %arg5[%c5, %c0_39, %c0_40] : memref<9x4x8xbf16, #tpu.memory_space<vmem>>, vector<1x4x8xbf16>
    %36 = vector.shape_cast %35 : vector<1x4x8xbf16> to vector<4x8xbf16>
    %cst_41 = arith.constant dense<0.000000e+00> : vector<160x8xf32>
    %37 = tpu.matmul %34, %36, %cst_41 {dimension_numbers = #tpu.dot_dimension_numbers<[1], [0], [0], [1], [0, 0, 1, 1], [], []>} : vector<160x4xbf16>, vector<4x8xbf16>, vector<160x8xf32> -> vector<160x8xf32>
    %38 = arith.addf %32, %37 : vector<160x8xf32>
    %c0_42 = arith.constant 0 : index
    %c10 = arith.constant 10 : index
    %c0_43 = arith.constant 0 : index
    %39 = vector.load %arg1[%c0_42, %c10, %c0_43] : memref<2x100x4xbf16, #tpu.memory_space<vmem>>, vector<2x80x4xbf16>
    %40 = vector.shape_cast %39 : vector<2x80x4xbf16> to vector<160x4xbf16>
    %c6 = arith.constant 6 : index
    %c0_44 = arith.constant 0 : index
    %c0_45 = arith.constant 0 : index
    %41 = vector.load %arg5[%c6, %c0_44, %c0_45] : memref<9x4x8xbf16, #tpu.memory_space<vmem>>, vector<1x4x8xbf16>
    %42 = vector.shape_cast %41 : vector<1x4x8xbf16> to vector<4x8xbf16>
    %cst_46 = arith.constant dense<0.000000e+00> : vector<160x8xf32>
    %43 = tpu.matmul %40, %42, %cst_46 {dimension_numbers = #tpu.dot_dimension_numbers<[1], [0], [0], [1], [0, 0, 1, 1], [], []>} : vector<160x4xbf16>, vector<4x8xbf16>, vector<160x8xf32> -> vector<160x8xf32>
    %44 = arith.addf %38, %43 : vector<160x8xf32>
    %c0_47 = arith.constant 0 : index
    %c10_48 = arith.constant 10 : index
    %c0_49 = arith.constant 0 : index
    %45 = vector.load %arg2[%c0_47, %c10_48, %c0_49] : memref<2x100x4xbf16, #tpu.memory_space<vmem>>, vector<2x80x4xbf16>
    %46 = vector.shape_cast %45 : vector<2x80x4xbf16> to vector<160x4xbf16>
    %c7 = arith.constant 7 : index
    %c0_50 = arith.constant 0 : index
    %c0_51 = arith.constant 0 : index
    %47 = vector.load %arg5[%c7, %c0_50, %c0_51] : memref<9x4x8xbf16, #tpu.memory_space<vmem>>, vector<1x4x8xbf16>
    %48 = vector.shape_cast %47 : vector<1x4x8xbf16> to vector<4x8xbf16>
    %cst_52 = arith.constant dense<0.000000e+00> : vector<160x8xf32>
    %49 = tpu.matmul %46, %48, %cst_52 {dimension_numbers = #tpu.dot_dimension_numbers<[1], [0], [0], [1], [0, 0, 1, 1], [], []>} : vector<160x4xbf16>, vector<4x8xbf16>, vector<160x8xf32> -> vector<160x8xf32>
    %50 = arith.addf %44, %49 : vector<160x8xf32>
    %c0_53 = arith.constant 0 : index
    %c11 = arith.constant 11 : index
    %c0_54 = arith.constant 0 : index
    %51 = vector.load %arg1[%c0_53, %c11, %c0_54] : memref<2x100x4xbf16, #tpu.memory_space<vmem>>, vector<2x80x4xbf16>
    %52 = vector.shape_cast %51 : vector<2x80x4xbf16> to vector<160x4xbf16>
    %c8 = arith.constant 8 : index
    %c0_55 = arith.constant 0 : index
    %c0_56 = arith.constant 0 : index
    %53 = vector.load %arg5[%c8, %c0_55, %c0_56] : memref<9x4x8xbf16, #tpu.memory_space<vmem>>, vector<1x4x8xbf16>
    %54 = vector.shape_cast %53 : vector<1x4x8xbf16> to vector<4x8xbf16>
    %cst_57 = arith.constant dense<0.000000e+00> : vector<160x8xf32>
    %55 = tpu.matmul %52, %54, %cst_57 {dimension_numbers = #tpu.dot_dimension_numbers<[1], [0], [0], [1], [0, 0, 1, 1], [], []>} : vector<160x4xbf16>, vector<4x8xbf16>, vector<160x8xf32> -> vector<160x8xf32>
    %56 = arith.addf %50, %55 : vector<160x8xf32>
    %57 = tpu.iota {dimensions = array<i32: 0>} : vector<160x1xi32>
    %c10_i32 = arith.constant 10 : i32
    %c0_i32 = arith.constant 0 : i32
    %58 = arith.cmpi eq, %c10_i32, %c0_i32 : i32
    %c1_i32 = arith.constant 1 : i32
    %59 = arith.select %58, %c1_i32, %c10_i32 : i32
    %60 = vector.broadcast %59 : i32 to vector<160x1xi32>
    %61 = arith.remsi %57, %60 : vector<160x1xi32>
    %c0_i32_58 = arith.constant 0 : i32
    %62 = vector.broadcast %c0_i32_58 : i32 to vector<160x1xi32>
    %63 = arith.cmpi ne, %61, %62 : vector<160x1xi32>
    %c0_i32_59 = arith.constant 0 : i32
    %64 = vector.broadcast %c0_i32_59 : i32 to vector<160x1xi32>
    %65 = arith.cmpi slt, %61, %64 : vector<160x1xi32>
    %c0_i32_60 = arith.constant 0 : i32
    %66 = arith.cmpi slt, %59, %c0_i32_60 : i32
    %67 = vector.broadcast %66 : i1 to vector<160x1xi1>
    %68 = vector.broadcast %67 : vector<160x1xi1> to vector<160x1xi1>
    %69 = arith.xori %65, %68 : vector<160x1xi1>
    %70 = arith.andi %69, %63 : vector<160x1xi1>
    %71 = vector.broadcast %59 : i32 to vector<160x1xi32>
    %72 = arith.addi %61, %71 : vector<160x1xi32>
    %73 = arith.select %70, %72, %61 : vector<160x1xi1>, vector<160x1xi32>
    %c8_i32 = arith.constant 8 : i32
    %74 = vector.broadcast %c8_i32 : i32 to vector<160x1xi32>
    %75 = arith.cmpi slt, %73, %74 : vector<160x1xi32>
    %76 = arith.extui %75 : vector<160x1xi1> to vector<160x1xi32>
    %77 = arith.sitofp %76 : vector<160x1xi32> to vector<160x1xf32>
    %c0_61 = arith.constant 0 : index
    %c0_62 = arith.constant 0 : index
    %78 = vector.load %arg6[%c0_61, %c0_62] : memref<1x8xf32, #tpu.memory_space<vmem>>, vector<1x8xf32>
    %79 = vector.broadcast %78 : vector<1x8xf32> to vector<160x8xf32>
    %80 = arith.addf %56, %79 : vector<160x8xf32>
    %cst_63 = arith.constant 0.000000e+00 : f32
    %81 = vector.broadcast %cst_63 : f32 to vector<160x8xf32>
    %82 = arith.maximumf %80, %81 : vector<160x8xf32>
    %83 = vector.broadcast %77 : vector<160x1xf32> to vector<160x8xf32>
    %84 = arith.mulf %82, %83 : vector<160x8xf32>
    %85 = arith.truncf %84 : vector<160x8xf32> to vector<160x8xbf16>
    %86 = vector.shape_cast %85 : vector<160x8xbf16> to vector<2x80x8xbf16>
    %c0_64 = arith.constant 0 : index
    %c16 = arith.constant 16 : index
    %c0_65 = arith.constant 0 : index
    %87 = vector.load %arg12[%c0_64, %c16, %c0_65] : memref<2x112x8xbf16, #tpu.memory_space<vmem>>, vector<2x80x8xbf16>
    tpu.vector_store %arg12[%c0_64, %c16, %c0_65], %86 {strides = array<i32>} : memref<2x112x8xbf16, #tpu.memory_space<vmem>>, vector<2x80x8xbf16>,
    %c0_66 = arith.constant 0 : index
    %c5_67 = arith.constant 5 : index
    %c0_68 = arith.constant 0 : index
    %88 = vector.load %arg12[%c0_66, %c5_67, %c0_68] : memref<2x112x8xbf16, #tpu.memory_space<vmem>>, vector<2x80x8xbf16>
    %89 = vector.shape_cast %88 : vector<2x80x8xbf16> to vector<160x8xbf16>
    %c0_69 = arith.constant 0 : index
    %c0_70 = arith.constant 0 : index
    %c0_71 = arith.constant 0 : index
    %90 = vector.load %arg7[%c0_69, %c0_70, %c0_71] : memref<9x8x128xbf16, #tpu.memory_space<vmem>>, vector<1x8x128xbf16>
    %91 = vector.shape_cast %90 : vector<1x8x128xbf16> to vector<8x128xbf16>
    %cst_72 = arith.constant dense<0.000000e+00> : vector<160x128xf32>
    %92 = tpu.matmul %89, %91, %cst_72 {dimension_numbers = #tpu.dot_dimension_numbers<[1], [0], [0], [1], [0, 0, 1, 1], [], []>} : vector<160x8xbf16>, vector<8x128xbf16>, vector<160x128xf32> -> vector<160x128xf32>
    %c0_73 = arith.constant 0 : index
    %c6_74 = arith.constant 6 : index
    %c0_75 = arith.constant 0 : index
    %93 = vector.load %arg12[%c0_73, %c6_74, %c0_75] : memref<2x112x8xbf16, #tpu.memory_space<vmem>>, vector<2x80x8xbf16>
    %94 = vector.shape_cast %93 : vector<2x80x8xbf16> to vector<160x8xbf16>
    %c1_76 = arith.constant 1 : index
    %c0_77 = arith.constant 0 : index
    %c0_78 = arith.constant 0 : index
    %95 = vector.load %arg7[%c1_76, %c0_77, %c0_78] : memref<9x8x128xbf16, #tpu.memory_space<vmem>>, vector<1x8x128xbf16>
    %96 = vector.shape_cast %95 : vector<1x8x128xbf16> to vector<8x128xbf16>
    %cst_79 = arith.constant dense<0.000000e+00> : vector<160x128xf32>
    %97 = tpu.matmul %94, %96, %cst_79 {dimension_numbers = #tpu.dot_dimension_numbers<[1], [0], [0], [1], [0, 0, 1, 1], [], []>} : vector<160x8xbf16>, vector<8x128xbf16>, vector<160x128xf32> -> vector<160x128xf32>
    %98 = arith.addf %92, %97 : vector<160x128xf32>
    %c0_80 = arith.constant 0 : index
    %c7_81 = arith.constant 7 : index
    %c0_82 = arith.constant 0 : index
    %99 = vector.load %arg12[%c0_80, %c7_81, %c0_82] : memref<2x112x8xbf16, #tpu.memory_space<vmem>>, vector<2x80x8xbf16>
    %100 = vector.shape_cast %99 : vector<2x80x8xbf16> to vector<160x8xbf16>
    %c2_83 = arith.constant 2 : index
    %c0_84 = arith.constant 0 : index
    %c0_85 = arith.constant 0 : index
    %101 = vector.load %arg7[%c2_83, %c0_84, %c0_85] : memref<9x8x128xbf16, #tpu.memory_space<vmem>>, vector<1x8x128xbf16>
    %102 = vector.shape_cast %101 : vector<1x8x128xbf16> to vector<8x128xbf16>
    %cst_86 = arith.constant dense<0.000000e+00> : vector<160x128xf32>
    %103 = tpu.matmul %100, %102, %cst_86 {dimension_numbers = #tpu.dot_dimension_numbers<[1], [0], [0], [1], [0, 0, 1, 1], [], []>} : vector<160x8xbf16>, vector<8x128xbf16>, vector<160x128xf32> -> vector<160x128xf32>
    %104 = arith.addf %98, %103 : vector<160x128xf32>
    %c0_87 = arith.constant 0 : index
    %c15 = arith.constant 15 : index
    %c0_88 = arith.constant 0 : index
    %105 = vector.load %arg12[%c0_87, %c15, %c0_88] : memref<2x112x8xbf16, #tpu.memory_space<vmem>>, vector<2x80x8xbf16>
    %106 = vector.shape_cast %105 : vector<2x80x8xbf16> to vector<160x8xbf16>
    %c3_89 = arith.constant 3 : index
    %c0_90 = arith.constant 0 : index
    %c0_91 = arith.constant 0 : index
    %107 = vector.load %arg7[%c3_89, %c0_90, %c0_91] : memref<9x8x128xbf16, #tpu.memory_space<vmem>>, vector<1x8x128xbf16>
    %108 = vector.shape_cast %107 : vector<1x8x128xbf16> to vector<8x128xbf16>
    %cst_92 = arith.constant dense<0.000000e+00> : vector<160x128xf32>
    %109 = tpu.matmul %106, %108, %cst_92 {dimension_numbers = #tpu.dot_dimension_numbers<[1], [0], [0], [1], [0, 0, 1, 1], [], []>} : vector<160x8xbf16>, vector<8x128xbf16>, vector<160x128xf32> -> vector<160x128xf32>
    %110 = arith.addf %104, %109 : vector<160x128xf32>
    %c0_93 = arith.constant 0 : index
    %c16_94 = arith.constant 16 : index
    %c0_95 = arith.constant 0 : index
    %111 = vector.load %arg12[%c0_93, %c16_94, %c0_95] : memref<2x112x8xbf16, #tpu.memory_space<vmem>>, vector<2x80x8xbf16>
    %112 = vector.shape_cast %111 : vector<2x80x8xbf16> to vector<160x8xbf16>
    %c4_96 = arith.constant 4 : index
    %c0_97 = arith.constant 0 : index
    %c0_98 = arith.constant 0 : index
    %113 = vector.load %arg7[%c4_96, %c0_97, %c0_98] : memref<9x8x128xbf16, #tpu.memory_space<vmem>>, vector<1x8x128xbf16>
    %114 = vector.shape_cast %113 : vector<1x8x128xbf16> to vector<8x128xbf16>
    %cst_99 = arith.constant dense<0.000000e+00> : vector<160x128xf32>
    %115 = tpu.matmul %112, %114, %cst_99 {dimension_numbers = #tpu.dot_dimension_numbers<[1], [0], [0], [1], [0, 0, 1, 1], [], []>} : vector<160x8xbf16>, vector<8x128xbf16>, vector<160x128xf32> -> vector<160x128xf32>
    %116 = arith.addf %110, %115 : vector<160x128xf32>
    %c0_100 = arith.constant 0 : index
    %c17 = arith.constant 17 : index
    %c0_101 = arith.constant 0 : index
    %117 = vector.load %arg12[%c0_100, %c17, %c0_101] : memref<2x112x8xbf16, #tpu.memory_space<vmem>>, vector<2x80x8xbf16>
    %118 = vector.shape_cast %117 : vector<2x80x8xbf16> to vector<160x8xbf16>
    %c5_102 = arith.constant 5 : index
    %c0_103 = arith.constant 0 : index
    %c0_104 = arith.constant 0 : index
    %119 = vector.load %arg7[%c5_102, %c0_103, %c0_104] : memref<9x8x128xbf16, #tpu.memory_space<vmem>>, vector<1x8x128xbf16>
    %120 = vector.shape_cast %119 : vector<1x8x128xbf16> to vector<8x128xbf16>
    %cst_105 = arith.constant dense<0.000000e+00> : vector<160x128xf32>
    %121 = tpu.matmul %118, %120, %cst_105 {dimension_numbers = #tpu.dot_dimension_numbers<[1], [0], [0], [1], [0, 0, 1, 1], [], []>} : vector<160x8xbf16>, vector<8x128xbf16>, vector<160x128xf32> -> vector<160x128xf32>
    %122 = arith.addf %116, %121 : vector<160x128xf32>
    %c0_106 = arith.constant 0 : index
    %c25 = arith.constant 25 : index
    %c0_107 = arith.constant 0 : index
    %123 = vector.load %arg12[%c0_106, %c25, %c0_107] : memref<2x112x8xbf16, #tpu.memory_space<vmem>>, vector<2x80x8xbf16>
    %124 = vector.shape_cast %123 : vector<2x80x8xbf16> to vector<160x8xbf16>
    %c6_108 = arith.constant 6 : index
    %c0_109 = arith.constant 0 : index
    %c0_110 = arith.constant 0 : index
    %125 = vector.load %arg7[%c6_108, %c0_109, %c0_110] : memref<9x8x128xbf16, #tpu.memory_space<vmem>>, vector<1x8x128xbf16>
    %126 = vector.shape_cast %125 : vector<1x8x128xbf16> to vector<8x128xbf16>
    %cst_111 = arith.constant dense<0.000000e+00> : vector<160x128xf32>
    %127 = tpu.matmul %124, %126, %cst_111 {dimension_numbers = #tpu.dot_dimension_numbers<[1], [0], [0], [1], [0, 0, 1, 1], [], []>} : vector<160x8xbf16>, vector<8x128xbf16>, vector<160x128xf32> -> vector<160x128xf32>
    %128 = arith.addf %122, %127 : vector<160x128xf32>
    %c0_112 = arith.constant 0 : index
    %c26 = arith.constant 26 : index
    %c0_113 = arith.constant 0 : index
    %129 = vector.load %arg12[%c0_112, %c26, %c0_113] : memref<2x112x8xbf16, #tpu.memory_space<vmem>>, vector<2x80x8xbf16>
    %130 = vector.shape_cast %129 : vector<2x80x8xbf16> to vector<160x8xbf16>
    %c7_114 = arith.constant 7 : index
    %c0_115 = arith.constant 0 : index
    %c0_116 = arith.constant 0 : index
    %131 = vector.load %arg7[%c7_114, %c0_115, %c0_116] : memref<9x8x128xbf16, #tpu.memory_space<vmem>>, vector<1x8x128xbf16>
    %132 = vector.shape_cast %131 : vector<1x8x128xbf16> to vector<8x128xbf16>
    %cst_117 = arith.constant dense<0.000000e+00> : vector<160x128xf32>
    %133 = tpu.matmul %130, %132, %cst_117 {dimension_numbers = #tpu.dot_dimension_numbers<[1], [0], [0], [1], [0, 0, 1, 1], [], []>} : vector<160x8xbf16>, vector<8x128xbf16>, vector<160x128xf32> -> vector<160x128xf32>
    %134 = arith.addf %128, %133 : vector<160x128xf32>
    %c0_118 = arith.constant 0 : index
    %c27 = arith.constant 27 : index
    %c0_119 = arith.constant 0 : index
    %135 = vector.load %arg12[%c0_118, %c27, %c0_119] : memref<2x112x8xbf16, #tpu.memory_space<vmem>>, vector<2x80x8xbf16>
    %136 = vector.shape_cast %135 : vector<2x80x8xbf16> to vector<160x8xbf16>
    %c8_120 = arith.constant 8 : index
    %c0_121 = arith.constant 0 : index
    %c0_122 = arith.constant 0 : index
    %137 = vector.load %arg7[%c8_120, %c0_121, %c0_122] : memref<9x8x128xbf16, #tpu.memory_space<vmem>>, vector<1x8x128xbf16>
    %138 = vector.shape_cast %137 : vector<1x8x128xbf16> to vector<8x128xbf16>
    %cst_123 = arith.constant dense<0.000000e+00> : vector<160x128xf32>
    %139 = tpu.matmul %136, %138, %cst_123 {dimension_numbers = #tpu.dot_dimension_numbers<[1], [0], [0], [1], [0, 0, 1, 1], [], []>} : vector<160x8xbf16>, vector<8x128xbf16>, vector<160x128xf32> -> vector<160x128xf32>
    %140 = arith.addf %134, %139 : vector<160x128xf32>
    %c0_124 = arith.constant 0 : index
    %c0_125 = arith.constant 0 : index
    %141 = vector.load %arg8[%c0_124, %c0_125] : memref<1x128xf32, #tpu.memory_space<vmem>>, vector<1x128xf32>
    %142 = vector.broadcast %141 : vector<1x128xf32> to vector<160x128xf32>
    %143 = arith.addf %140, %142 : vector<160x128xf32>
    %cst_126 = arith.constant 0.000000e+00 : f32
    %144 = vector.broadcast %cst_126 : f32 to vector<160x128xf32>
    %145 = arith.maximumf %143, %144 : vector<160x128xf32>
    %c0_127 = arith.constant 0 : index
    %c0_128 = arith.constant 0 : index
    %c0_129 = arith.constant 0 : index
    %146 = vector.load %arg4[%c0_127, %c0_128, %c0_129] : memref<2x100x4xbf16, #tpu.memory_space<vmem>>, vector<2x80x4xbf16>
    %147 = vector.shape_cast %146 : vector<2x80x4xbf16> to vector<160x4xbf16>
    %c0_130 = arith.constant 0 : index
    %c0_131 = arith.constant 0 : index
    %148 = vector.load %arg9[%c0_130, %c0_131] : memref<4x128xbf16, #tpu.memory_space<vmem>>, vector<4x128xbf16>
    %cst_132 = arith.constant dense<0.000000e+00> : vector<160x128xf32>
    %149 = tpu.matmul %147, %148, %cst_132 {dimension_numbers = #tpu.dot_dimension_numbers<[1], [0], [0], [1], [0, 0, 1, 1], [], []>} : vector<160x4xbf16>, vector<4x128xbf16>, vector<160x128xf32> -> vector<160x128xf32>
    %c0_133 = arith.constant 0 : index
    %c0_134 = arith.constant 0 : index
    %150 = vector.load %arg10[%c0_133, %c0_134] : memref<1x128xf32, #tpu.memory_space<vmem>>, vector<1x128xf32>
    %151 = vector.broadcast %150 : vector<1x128xf32> to vector<160x128xf32>
    %152 = arith.addf %149, %151 : vector<160x128xf32>
    %cst_135 = arith.constant 0.000000e+00 : f32
    %153 = vector.broadcast %cst_135 : f32 to vector<160x128xf32>
    %154 = arith.maximumf %152, %153 : vector<160x128xf32>
    %155 = arith.addf %145, %154 : vector<160x128xf32>
    %156 = vector.shape_cast %155 : vector<160x128xf32> to vector<2x80x128xf32>
    %c0_136 = arith.constant 0 : index
    %c0_137 = arith.constant 0 : index
    %c0_138 = arith.constant 0 : index
    %157 = vector.load %arg11[%c0_136, %c0_137, %c0_138] : memref<2x80x128xf32, #tpu.memory_space<vmem>>, vector<2x80x128xf32>
    tpu.vector_store %arg11[%c0_136, %c0_137, %c0_138], %156 {strides = array<i32>} : memref<2x80x128xf32, #tpu.memory_space<vmem>>, vector<2x80x128xf32>,
    return
  }
  func.func @transform_0(%arg0: i32) -> (i32, i32, i32) {
    %c0_i32 = arith.constant 0 : i32
    %c0_i32_0 = arith.constant 0 : i32
    %c0_i32_1 = arith.constant 0 : i32
    return %arg0, %c0_i32, %c0_i32_0 : i32, i32, i32
  }
  func.func @transform_1(%arg0: i32) -> (i32, i32, i32) {
    %c0_i32 = arith.constant 0 : i32
    %c0_i32_0 = arith.constant 0 : i32
    %c0_i32_1 = arith.constant 0 : i32
    return %arg0, %c0_i32, %c0_i32_0 : i32, i32, i32
  }
  func.func @transform_2(%arg0: i32) -> (i32, i32, i32) {
    %c0_i32 = arith.constant 0 : i32
    %c0_i32_0 = arith.constant 0 : i32
    %c0_i32_1 = arith.constant 0 : i32
    return %arg0, %c0_i32, %c0_i32_0 : i32, i32, i32
  }
  func.func @transform_3(%arg0: i32) -> (i32, i32, i32) {
    %c0_i32 = arith.constant 0 : i32
    %c0_i32_0 = arith.constant 0 : i32
    %c0_i32_1 = arith.constant 0 : i32
    return %arg0, %c0_i32, %c0_i32_0 : i32, i32, i32
  }
  func.func @transform_4(%arg0: i32) -> (i32, i32, i32) {
    %c0_i32 = arith.constant 0 : i32
    %c0_i32_0 = arith.constant 0 : i32
    %c0_i32_1 = arith.constant 0 : i32
    %c0_i32_2 = arith.constant 0 : i32
    return %c0_i32, %c0_i32_0, %c0_i32_1 : i32, i32, i32
  }
  func.func @transform_5(%arg0: i32) -> (i32, i32) {
    %c0_i32 = arith.constant 0 : i32
    %c0_i32_0 = arith.constant 0 : i32
    %c0_i32_1 = arith.constant 0 : i32
    return %c0_i32, %c0_i32_0 : i32, i32
  }
  func.func @transform_6(%arg0: i32) -> (i32, i32, i32) {
    %c0_i32 = arith.constant 0 : i32
    %c0_i32_0 = arith.constant 0 : i32
    %c0_i32_1 = arith.constant 0 : i32
    %c0_i32_2 = arith.constant 0 : i32
    return %c0_i32, %c0_i32_0, %c0_i32_1 : i32, i32, i32
  }
  func.func @transform_7(%arg0: i32) -> (i32, i32) {
    %c0_i32 = arith.constant 0 : i32
    %c0_i32_0 = arith.constant 0 : i32
    %c0_i32_1 = arith.constant 0 : i32
    return %c0_i32, %c0_i32_0 : i32, i32
  }
  func.func @transform_8(%arg0: i32) -> (i32, i32) {
    %c0_i32 = arith.constant 0 : i32
    %c0_i32_0 = arith.constant 0 : i32
    %c0_i32_1 = arith.constant 0 : i32
    return %c0_i32, %c0_i32_0 : i32, i32
  }
  func.func @transform_9(%arg0: i32) -> (i32, i32) {
    %c0_i32 = arith.constant 0 : i32
    %c0_i32_0 = arith.constant 0 : i32
    %c0_i32_1 = arith.constant 0 : i32
    return %c0_i32, %c0_i32_0 : i32, i32
  }
  func.func @transform_10(%arg0: i32) -> (i32, i32, i32) {
    %c0_i32 = arith.constant 0 : i32
    %c0_i32_0 = arith.constant 0 : i32
    %c0_i32_1 = arith.constant 0 : i32
    return %arg0, %c0_i32, %c0_i32_0 : i32, i32, i32
  }
}

</mosaic_0001>

<bundles_post_ra>
// kernel: residual_block_forward.1
= control target key start
LH: loop header
LB: loop body
LE: loop exit
PB: predicated region body
PF: predicated region fallthrough
CT: control target
= control target key end

     0   :  { %vm11884_vm0 = vcmask 1041408   ;;  %vm11883_vm1 = vcmask 31744   ;;  %vm504_vm2 = vsmask.f32 3328  ;;  %vm505_vm3 = vsmask.f32 7440  ;;  %s11864_s4 = inlined_call_operand.vmem [shape: bf16[9,4,8], index: 4, kind: input, shape index: {}]   ;;  %s11865_s1 = inlined_call_operand.vmem [shape: bf16[2,100,4], index: 1, kind: input, shape index: {}]   ;;  %s11866_s0 = inlined_call_operand.vmem [shape: bf16[2,100,4], index: 0, kind: input, shape index: {}]   ;;  %s11867_s2 = inlined_call_operand.vmem [shape: bf16[2,100,4], index: 2, kind: input, shape index: {}]   ;;  %s11868_s3 = inlined_call_operand.vmem [shape: bf16[2,100,4], index: 3, kind: input, shape index: {}]   ;;  %s11869_s6 = inlined_call_operand.vmem [shape: bf16[9,8,128], index: 6, kind: input, shape index: {}]   ;;  %s11870_s5 = inlined_call_operand.vmem [shape: f32[1,8], index: 5, kind: input, shape index: {}]   ;;  %s11871_s8 = inlined_call_operand.vmem [shape: bf16[4,128], index: 8, kind: input, shape index: {}]   ;;  %s11872_s7 = inlined_call_operand.vmem [shape: f32[1,128], index: 7, kind: input, shape index: {}]   ;;  %s11873_s9 = inlined_call_operand.vmem [shape: f32[1,128], index: 9, kind: input, shape index: {}]   ;;  %s11874_s10 = inlined_call_operand.vmem [shape: f32[2,80,128], index: 10, kind: output, shape index: {}]  }
   0x1   :  { %v6830_v0 = vld [vmem:[%s11864_s4 + $0x2] sm:$0x3]  ;;  %v7994_v4 = vld [vmem:[%s11865_s1 + $0x8] sm:$0xff]   ;;  %v6871_v6 = vld [vmem:[%s11864_s4 + $0x4] sm:$0x3]  ;;  %v11927_v43 = vmov 0 }
   0x2   :  { %7930 = vmatprep.subr.msk.bf16.mxu0 %vm11884_vm0, %v6830_v0  ;;  %7931 = vmatprep.subr.msk.bf16.mxu1 %vm11884_vm0, %v6830_v0  ;;  %v171_v1 = vsel %vm11884_vm0, %v6830_v0, 0  ;;  %v7992_v2 = vld [vmem:[%s11865_s1] sm:$0xff]   ;;  %v778_v8 = vsel %vm11884_vm0, %v6871_v6, 0  ;;  %v7996_v9 = vld [vmem:[%s11865_s1 + $0x10] sm:$0xff]   ;;  %v7998_v12 = vld [vmem:[%s11865_s1 + $0x18] sm:$0xff]   ;;  %vm1861_vm5 = vcmask 1042432  }
   0x3   :  { %7511 = vmatpush3.bf16.msra.mxu0 %v171_v1  ;;  %7929 = vmatpush3.bf16.msra.mxu1 %v171_v1  ;;  %v7993_v3 = vld [vmem:[%s11865_s1 + $0x3c] sm:$0xff]   ;;  %v7995_v5 = vld [vmem:[%s11865_s1 + $0x44] sm:$0xff]   ;;  %v7997_v10 = vld [vmem:[%s11865_s1 + $0x4c] sm:$0xff]   ;;  %vm1862_vm6 = vcmask 1046532   ;;  %vm2430_vm8 = vsmask.f32 2304 }
   0x4   :  { %7512 = vmatprep.mubr.msk.bf16.mxu0 %vm11883_vm1, %v7992_v2  ;;  %7524 = vmatprep.mubr.msk.bf16.mxu1 %vm11883_vm1, %v7993_v3  ;;  %v65_v7 = vld [vmem:[%s11864_s4] sm:$0x3]  ;;  %v7999_v13 = vld [vmem:[%s11865_s1 + $0x54] sm:$0xff]   ;;  %v6892_v16 = vld [vmem:[%s11864_s4 + $0x6] sm:$0x3]  ;;  %vm3809_vm11 = vcmask 1043456  }
   0x5   :  { %7933 = vmatprep.subr.msk.bf16.mxu0 %vm11884_vm0, %v6871_v6  ;;  %v367_v11 = vsel %vm11884_vm0, %v65_v7, 0  ;;  %7932 = vmatprep.subr.msk.bf16.mxu1 %vm11884_vm0, %v65_v7  ;;  %v8000_v14 = vld [vmem:[%s11865_s1 + $0x20] sm:$0xff]   ;;  %v1016_v19 = vsel %vm11884_vm0, %v6892_v16, 0  ;;  %v8002_v20 = vld [vmem:[%s11865_s1 + $0x34] sm:$0xff]   ;;  %v484_v21 = vld [vmem:[%s11866_s0 + $0x8] sm:$0xf] }
   0x6   :  { %7513 = vmatmul.mubr.msk.bf16.vlgmr.msra.gmra.mxu0 %vm11883_vm1, %v7994_v4  ;;  %7525 = vmatmul.mubr.msk.bf16.vlgmr.msra.gmra.mxu1 %vm11883_vm1, %v7995_v5  ;;  %v8001_v15 = vld [vmem:[%s11866_s0] sm:$0xff]   ;;  %v527_v26 = vshll.u32 %v484_v21, 16  ;;  %v531_v27 = vshrl.u32 %v484_v21, 16  ;;  %v8003_v28 = vld [vmem:[%s11866_s0 + $0x8] sm:$0xff]   ;;  %v8004_v29 = vld [vmem:[%s11866_s0 + $0x10] sm:$0xff]   ;;  %vm36_vm12 = vcmask 60416  }
   0x7   :  { %7555 = vmatpush3.bf16.msra.mxu0 %v778_v8  ;;  %7516 = vmatprep.mubr.msk.bf16.mxu0 %vm11883_vm1, %v7996_v9  ;;  %v482_v17 = vld [vmem:[%s11866_s0] sm:$0xf]  ;;  %v483_v18 = vld [vmem:[%s11866_s0 + $0x4] sm:$0xf]  ;;  %v485_v36 = vld [vmem:[%s11866_s0 + $0xc] sm:$0xf] }
   0x8   :  { %7528 = vmatprep.mubr.msk.bf16.mxu1 %vm11883_vm1, %v7997_v10  ;;  %7533 = vmatpush3.bf16.msra.mxu1 %v367_v11  ;;  %v508_v22 = vshrl.u32 %v482_v17, 16  ;;  %v511_v23 = vshll.u32 %v482_v17, 16  ;;  %v517_v24 = vshll.u32 %v483_v18, 16  ;;  %v521_v25 = vshrl.u32 %v483_v18, 16  ;;  %v486_v37 = vld [vmem:[%s11866_s0 + $0x10] sm:$0xf]  ;;  %vm8199_vm4 = vmor %vm504_vm2, %vm505_vm3 }
   0x9   :  { %7934 = vmatprep.subr.msk.bf16.mxu1 %vm11884_vm0, %v6892_v16  ;;  %v529_v34 = vrot.slane %v527_v26, 5  ;;  %v533_v35 = vrot.slane %v531_v27, 4  ;;  %v537_v40 = vshll.u32 %v485_v36, 16  ;;  %v541_v41 = vshrl.u32 %v485_v36, 16  ;;  %v6913_v42 = vld [vmem:[%s11864_s4 + $0x8] sm:$0x3]  ;;  %vm8445_vm7 = vmor %vm1861_vm5, %vm1862_vm6 }
   0xa   :  { %v510_v30 = vrot.slane %v508_v22, 4  ;;  %v513_v31 = vrot.slane %v511_v23, 5  ;;  %v519_v32 = vrot.slane %v517_v24, 5  ;;  %v523_v33 = vrot.slane %v521_v25, 4  ;;  %7935 = vmatprep.subr.msk.bf16.mxu0 %vm11884_vm0, %v6913_v42  ;;  %v487_v47 = vld [vmem:[%s11866_s0 + $0x14] sm:$0xf] }
   0xb   :  { %v11928_v43 = vsel %vm8199_vm4, 4294967295, %v11927_v43  ;;  %v534_v44 = vor.u32 %v533_v35, %v529_v34  ;;  %v547_v45 = vshll.u32 %v486_v37, 16  ;;  %v1254_v46 = vsel %vm11884_vm0, %v6913_v42, 0  ;;  %v488_v52 = vld [vmem:[%s11866_s0 + $0x18] sm:$0xf]  ;;  %v8006_v8 = vld [vmem:[%s11866_s0 + $0x20] sm:$0xff]  }
   0xc   :  { %v514_v38 = vor.u32 %v513_v31, %v510_v30  ;;  %v524_v39 = vor.u32 %v523_v33, %v519_v32  ;;  %11929 = vst [vmem:[#allocation3_spill] sm:$0xff] %v11928_v43  ;;  %v539_v50 = vrot.slane %v537_v40, 5  ;;  %v543_v51 = vrot.slane %v541_v41, 4  ;;  %v489_v61 = vld [vmem:[%s11866_s0 + $0x1c] sm:$0xf] }
   0xd   :  { %v535_v53 = vrot.slane %v534_v44, 4  ;;  %v549_v54 = vrot.slane %v547_v45, 5  ;;  %v551_v55 = vshrl.u32 %v486_v37, 16  ;;  %v557_v56 = vshll.u32 %v487_v47, 16  ;;  %v8005_v63 = vld [vmem:[%s11866_s0 + $0x18] sm:$0xff]  }
   0xe   :  { %7517 = vmatmul.mubr.msk.bf16.gmra.mxu0 %vm11883_vm1, %v7998_v12  ;;  %7529 = vmatmul.mubr.msk.bf16.gmra.mxu1 %vm11883_vm1, %v7999_v13  ;;  %v515_v48 = vrot.slane %v514_v38, 4  ;;  %v525_v49 = vrot.slane %v524_v39, 4  ;;  %v544_v59 = vor.u32 %v543_v51, %v539_v50  ;;  %v561_v60 = vshrl.u32 %v487_v47, 16  ;;  %v490_v3 = vld [vmem:[%s11866_s0 + $0x20] sm:$0xf]  ;;  %v8007_v38 = vld [vmem:[%s11866_s0 + $0x34] sm:$0xff]  }
   0xf   :  { %7520 = vmatprep.mubr.msk.bf16.mxu0 %vm11883_vm1, %v8000_v14  ;;  %7534 = vmatprep.mubr.msk.bf16.mxu1 %vm11883_vm1, %v8001_v15  ;;  %v540_v0 = vsel %vm8199_vm4, %v535_v53, %v539_v50  ;;  %v553_v1 = vrot.slane %v551_v55, 4  ;;  %v559_v2 = vrot.slane %v557_v56, 5  ;;  %v567_v6 = vshll.u32 %v488_v52, 16  ;;  %v491_v13 = vld [vmem:[%s11866_s0 + $0x24] sm:$0xf] }
  0x10   :  { %v520_v57 = vsel %vm8199_vm4, %v515_v48, %v519_v32  ;;  %v530_v58 = vsel %vm8199_vm4, %v525_v49, %v529_v34  ;;  %v545_v4 = vrot.slane %v544_v59, 4  ;;  %v563_v5 = vrot.slane %v561_v60, 4  ;;  %v492_v18 = vld [vmem:[%s11866_s0 + $0x28] sm:$0x1]  ;;  %v493_v31 = vld [vmem:[%s11866_s0 + $0x34] sm:$0xf] }
  0x11   :  { %v6872_v62 = vcombine.low %v520_v57, %v530_v58  ;;  %v571_v7 = vshrl.u32 %v488_v52, 16  ;;  %v554_v9 = vor.u32 %v553_v1, %v549_v54  ;;  %v577_v10 = vshll.u32 %v489_v61, 16  ;;  %v494_v32 = vld [vmem:[%s11866_s0 + $0x38] sm:$0xf]  ;;  %v496_v48 = vld [vmem:[%s11866_s0 + $0x40] sm:$0xf] }
  0x12   :  { %v581_v11 = vshrl.u32 %v489_v61, 16  ;;  %v587_v12 = vshll.u32 %v490_v3, 16  ;;  %v550_v14 = vsel %vm8199_vm4, %v545_v4, %v549_v54  ;;  %v564_v15 = vor.u32 %v563_v5, %v559_v2  ;;  %v8008_v54 = vld [vmem:[%s11866_s0 + $0x3c] sm:$0xff]   ;;  %v497_v1 = vld [vmem:[%s11866_s0 + $0x44] sm:$0xf] }
  0x13   :  { %v569_v16 = vrot.slane %v567_v6, 5  ;;  %v573_v17 = vrot.slane %v571_v7, 4  ;;  %v579_v21 = vrot.slane %v577_v10, 5  ;;  %v591_v26 = vshrl.u32 %v490_v3, 16  ;;  %v498_v7 = vld [vmem:[%s11866_s0 + $0x48] sm:$0xf] }
  0x14   :  { %v583_v22 = vrot.slane %v581_v11, 4  ;;  %v565_v23 = vrot.slane %v564_v15, 4  ;;  %v589_v25 = vrot.slane %v587_v12, 5  ;;  %v601_v30 = vshrl.u32 %v491_v13, 16  ;;  %v499_v12 = vld [vmem:[%s11866_s0 + $0x4c] sm:$0xf] }
  0x15   :  { %v574_v24 = vor.u32 %v573_v17, %v569_v16  ;;  %v593_v35 = vrot.slane %v591_v26, 4  ;;  %v607_v36 = vshll.u32 %v492_v18, 16  ;;  %v612_v47 = vshrl.u32 %v493_v31, 16  ;;  %v500_v17 = vld [vmem:[%s11866_s0 + $0x50] sm:$0xf]  ;;  %v8009_v18 = vld [vmem:[%s11866_s0 + $0x44] sm:$0xff]  }
  0x16   :  { %7521 = vmatmul.mubr.msk.bf16.gmra.mxu0 %vm11883_vm1, %v8002_v20  ;;  %7535 = vmatmul.mubr.msk.bf16.vlgmr.msra.gmra.mxu1 %vm11883_vm1, %v8003_v28  ;;  %v555_v20 = vrot.slane %v554_v9, 4  ;;  %v584_v28 = vor.u32 %v583_v22, %v579_v21  ;;  %v570_v33 = vsel %vm8199_vm4, %v565_v23, %v569_v16  ;;  %v603_v41 = vrot.slane %v601_v30, 4 }
  0x17   :  { %7538 = vmatprep.mubr.msk.bf16.mxu1 %vm11883_vm1, %v8004_v29  ;;  %7577 = vmatpush3.bf16.msra.mxu1 %v1016_v19  ;;  %v6873_v19 = vcombine.low %v540_v0, %v550_v14  ;;  %v597_v29 = vshll.u32 %v491_v13, 16  ;;  %v575_v34 = vrot.slane %v574_v24, 4  ;;  %v594_v44 = vor.u32 %v593_v35, %v589_v25 }
  0x18   :  { %7556 = vmatprep.mubr.msk.bf16.mxu0 %vm11883_vm1, %v6872_v62  ;;  %v560_v27 = vsel %vm8199_vm4, %v555_v20, %v559_v2  ;;  %v585_v39 = vrot.slane %v584_v28, 4  ;;  %v609_v45 = vrot.slane %v607_v36, 5  ;;  %v615_v51 = vshll.u32 %v493_v31, 16 }
  0x19   :  { %v6874_v37 = vcombine.low %v560_v27, %v570_v33  ;;  %v599_v40 = vrot.slane %v597_v29, 5  ;;  %v580_v42 = vsel %vm8199_vm4, %v575_v34, %v579_v21  ;;  %v621_v52 = vshll.u32 %v494_v32, 16  ;;  %v8299_v27 = vld [vmem:[%s11864_s4 + $0xa] sm:$0x3]  ;;  %v8010_v29 = vld [vmem:[%s11866_s0 + $0x4c] sm:$0xff]  }
  0x1a   :  { %v590_v49 = vsel %vm8199_vm4, %v585_v39, %v589_v25  ;;  %v595_v55 = vrot.slane %v594_v44, 4  ;;  %v614_v56 = vrot.slane %v612_v47, 4  ;;  %v625_v57 = vshrl.u32 %v494_v32, 16  ;;  %v501_v33 = vld [vmem:[%s11866_s0 + $0x54] sm:$0xf]  ;;  %7936 = vmatprep.subr.msk.bf16.mxu1 %vm11884_vm0, %v8299_v27 }
  0x1b   :  { %v604_v50 = vor.u32 %v603_v41, %v599_v40  ;;  %v6875_v53 = vcombine.low %v580_v42, %v590_v49  ;;  %v617_v59 = vrot.slane %v615_v51, 5  ;;  %v623_v60 = vrot.slane %v621_v52, 5 }
  0x1c   :  { %v600_v62 = vsel %vm8199_vm4, %v595_v55, %v599_v40  ;;  %v641_v2 = vshll.u32 %v496_v48, 16  ;;  %v645_v6 = vshrl.u32 %v496_v48, 16  ;;  %v651_v15 = vshll.u32 %v497_v1, 16  ;;  %v503_v48 = vld [vmem:[%s11866_s0 + $0x5c] sm:$0x1] }
  0x1d   :  { %v605_v58 = vrot.slane %v604_v50, 4  ;;  %v618_v4 = vor.u32 %v617_v59, %v614_v56  ;;  %v655_v16 = vshrl.u32 %v497_v1, 16  ;;  %v661_v21 = vshll.u32 %v498_v7, 16 }
  0x1e   :  { %7539 = vmatmul.mubr.msk.bf16.gmra.mxu1 %vm11883_vm1, %v8005_v63  ;;  %7557 = vmatmul.mubr.msk.bf16.vlgmr.msra.gmra.mxu0 %vm11883_vm1, %v6873_v19  ;;  %v627_v63 = vrot.slane %v625_v57, 4  ;;  %v643_v11 = vrot.slane %v641_v2, 5  ;;  %v647_v14 = vrot.slane %v645_v6, 4  ;;  %v665_v22 = vshrl.u32 %v498_v7, 16 }
  0x1f   :  { %7599 = vmatpush3.bf16.msra.mxu0 %v1254_v46  ;;  %7542 = vmatprep.mubr.msk.bf16.mxu1 %vm11883_vm1, %v8006_v8  ;;  %v495_v46 = vld [vmem:[%s11866_s0 + $0x3c] sm:$0xf]  ;;  %v610_v3 = vsel %vm8199_vm4, %v605_v58, %v609_v45  ;;  %v619_v13 = vrot.slane %v618_v4, 4  ;;  %v653_v25 = vrot.slane %v651_v15, 5  ;;  %v657_v26 = vrot.slane %v655_v16, 4 }
  0x20   :  { %7560 = vmatprep.mubr.msk.bf16.mxu0 %vm11883_vm1, %v6874_v37  ;;  %v631_v61 = vshll.u32 %v495_v46, 16  ;;  %v635_v0 = vshrl.u32 %v495_v46, 16  ;;  %v6876_v8 = vcombine.low %v600_v62, %v610_v3  ;;  %v628_v9 = vor.u32 %v627_v63, %v623_v60  ;;  %v6957_v63 = vld [vmem:[%s11864_s4 + $0xc] sm:$0x3] }
  0x21   :  { %v624_v23 = vsel %vm8199_vm4, %v619_v13, %v623_v60  ;;  %v648_v24 = vor.u32 %v647_v14, %v643_v11  ;;  %v663_v31 = vrot.slane %v661_v21, 5  ;;  %v667_v32 = vrot.slane %v665_v22, 4  ;;  %v8012_v60 = vld [vmem:[%s11867_s2] sm:$0xff]   ;;  %7937 = vmatprep.subr.msk.bf16.mxu0 %vm11884_vm0, %v6957_v63  ;;  %v8014_v21 = vld [vmem:[%s11867_s2 + $0x10] sm:$0xff]  }
  0x22   :  { %v633_v5 = vrot.slane %v631_v61, 5  ;;  %v637_v10 = vrot.slane %v635_v0, 4  ;;  %v629_v19 = vrot.slane %v628_v9, 4  ;;  %v658_v36 = vor.u32 %v657_v26, %v653_v25  ;;  %v8015_v22 = vld [vmem:[%s11868_s3] sm:$0xff]  }
  0x23   :  { %v649_v35 = vrot.slane %v648_v24, 4  ;;  %v671_v37 = vshll.u32 %v499_v12, 16  ;;  %v668_v40 = vor.u32 %v667_v32, %v663_v31  ;;  %v675_v41 = vshrl.u32 %v499_v12, 16  ;;  %v1390_v26 = vld [vmem:[%s11867_s2 + $0x4] sm:$0xf] }
  0x24   :  { %v638_v20 = vor.u32 %v637_v10, %v633_v5  ;;  %v634_v28 = vsel %vm8199_vm4, %v629_v19, %v633_v5  ;;  %v681_v42 = vshll.u32 %v500_v17, 16  ;;  %v659_v45 = vrot.slane %v658_v36, 4  ;;  %v8013_v19 = vld [vmem:[%s11867_s2 + $0x8] sm:$0xff]   ;;  %v8018_v36 = vld [vmem:[%s11867_s2 + $0x20] sm:$0xff]  }
  0x25   :  { %v6877_v34 = vcombine.low %v624_v23, %v634_v28  ;;  %v654_v44 = vsel %vm8199_vm4, %v649_v35, %v653_v25  ;;  %v673_v46 = vrot.slane %v671_v37, 5  ;;  %v685_v47 = vshrl.u32 %v500_v17, 16  ;;  %v1389_v25 = vld [vmem:[%s11867_s2] sm:$0xf]  ;;  %v8017_v28 = vld [vmem:[%s11868_s3 + $0x8] sm:$0xff]   ;;  %v8019_v37 = vld [vmem:[%s11868_s3 + $0x10] sm:$0xff]  }
  0x26   :  { %7543 = vmatmul.mubr.msk.bf16.gmra.mxu1 %vm11883_vm1, %v8007_v38  ;;  %7561 = vmatmul.mubr.msk.bf16.gmra.mxu0 %vm11883_vm1, %v6875_v53  ;;  %v639_v30 = vrot.slane %v638_v20, 4  ;;  %v502_v38 = vld [vmem:[%s11866_s0 + $0x58] sm:$0xf]  ;;  %v669_v50 = vrot.slane %v668_v40, 4  ;;  %v677_v51 = vrot.slane %v675_v41, 4  ;;  %v683_v52 = vrot.slane %v681_v42, 5 }
  0x27   :  { %7546 = vmatprep.mubr.msk.bf16.mxu1 %vm11883_vm1, %v8008_v54  ;;  %7564 = vmatprep.mubr.msk.bf16.mxu0 %vm11883_vm1, %v6876_v8  ;;  %v8011_v53 = vld [vmem:[%s11866_s0 + $0x54] sm:$0xff]   ;;  %v664_v54 = vsel %vm8199_vm4, %v659_v45, %v663_v31  ;;  %v687_v55 = vrot.slane %v685_v47, 4  ;;  %v691_v56 = vshll.u32 %v501_v33, 16  ;;  %v695_v57 = vshrl.u32 %v501_v33, 16  ;;  %v1392_v45 = vld [vmem:[%s11867_s2 + $0xc] sm:$0xf] }
  0x28   :  { %v644_v39 = vsel %vm8199_vm4, %v639_v30, %v643_v11  ;;  %v674_v58 = vsel %vm8199_vm4, %v669_v50, %v673_v46  ;;  %v678_v59 = vor.u32 %v677_v51, %v673_v46  ;;  %v701_v61 = vshll.u32 %v502_v38, 16  ;;  %v1393_v46 = vld [vmem:[%s11867_s2 + $0x10] sm:$0xf]  ;;  %v6980_v51 = vld [vmem:[%s11864_s4 + $0xe] sm:$0x3] }
  0x29   :  { %v6878_v49 = vcombine.low %v644_v39, %v654_v44  ;;  %v705_v62 = vshrl.u32 %v502_v38, 16  ;;  %v6879_v0 = vcombine.low %v664_v54, %v674_v58  ;;  %v688_v1 = vor.u32 %v687_v55, %v683_v52 }
  0x2a   :  { %v693_v2 = vrot.slane %v691_v56, 5  ;;  %v697_v3 = vrot.slane %v695_v57, 4  ;;  %v679_v4 = vrot.slane %v678_v59, 4  ;;  %v703_v5 = vrot.slane %v701_v61, 5  ;;  %v1395_v61 = vld [vmem:[%s11867_s2 + $0x18] sm:$0xf] }
  0x2b   :  { %v707_v6 = vrot.slane %v705_v62, 4  ;;  %v711_v7 = vshll.u32 %v503_v48, 16  ;;  %v689_v8 = vrot.slane %v688_v1, 4  ;;  %v1682_v23 = vsel %vm11884_vm0, %v8299_v27, 0  ;;  %v8016_v27 = vld [vmem:[%s11867_s2 + $0x18] sm:$0xff]  }
  0x2c   :  { %v698_v9 = vor.u32 %v697_v3, %v693_v2  ;;  %v684_v10 = vsel %vm8199_vm4, %v679_v4, %v683_v52  ;;  %v1989_v24 = vsel %vm11884_vm0, %v6957_v63, 0  ;;  %v1412_v30 = vshrl.u32 %v1389_v25, 16  ;;  %v1394_v52 = vld [vmem:[%s11867_s2 + $0x14] sm:$0xf] }
  0x2d   :  { %v708_v11 = vor.u32 %v707_v6, %v703_v5  ;;  %v713_v12 = vrot.slane %v711_v7, 5  ;;  %v694_v13 = vsel %vm8199_vm4, %v689_v8, %v693_v2  ;;  %v1415_v31 = vshll.u32 %v1389_v25, 16  ;;  %v8410_v2 = vld [vmem:[%s11866_s0 + $0x4] sm:$0xe]  ;;  %v8020_v3 = vld [vmem:[%s11867_s2 + $0x34] sm:$0xff]  }
  0x2e   :  { %7547 = vmatmul.mubr.msk.bf16.gmra.mxu1 %vm11883_vm1, %v8009_v18  ;;  %7565 = vmatmul.mubr.msk.bf16.gmra.mxu0 %vm11883_vm1, %v6877_v34  ;;  %v699_v14 = vrot.slane %v698_v9, 4  ;;  %v6880_v15 = vcombine.low %v684_v10, %v694_v13  ;;  %v1421_v32 = vshll.u32 %v1390_v26, 16  ;;  %v1425_v33 = vshrl.u32 %v1390_v26, 16  ;;  %v8423_v8 = vld [vmem:[%s11866_s0 + $0x8] sm:$0xf]  ;;  %v8021_v10 = vld [vmem:[%s11868_s3 + $0x18] sm:$0xff]  }
  0x2f   :  { %7550 = vmatprep.mubr.msk.bf16.mxu1 %vm11883_vm1, %v8010_v29  ;;  %7568 = vmatprep.mubr.msk.bf16.mxu0 %vm11883_vm1, %v6878_v49  ;;  %v709_v16 = vrot.slane %v708_v11, 4  ;;  %v1391_v29 = vld [vmem:[%s11867_s2 + $0x8] sm:$0xf]  ;;  %v1414_v38 = vrot.slane %v1412_v30, 4  ;;  %v1417_v39 = vrot.slane %v1415_v31, 5  ;;  %v1441_v49 = vshll.u32 %v1392_v45, 16 }
  0x30   :  { %v704_v17 = vsel %vm8199_vm4, %v699_v14, %v703_v5  ;;  %v1431_v34 = vshll.u32 %v1391_v29, 16  ;;  %v1435_v35 = vshrl.u32 %v1391_v29, 16  ;;  %v1423_v40 = vrot.slane %v1421_v32, 5  ;;  %v8428_v9 = vld [vmem:[%s11866_s0 + $0xc] sm:$0xf]  ;;  %v8022_v11 = vld [vmem:[%s11867_s2 + $0x3c] sm:$0xff]  }
  0x31   :  { %v714_v18 = vsel %vm8199_vm4, %v709_v16, %v713_v12  ;;  %v1427_v41 = vrot.slane %v1425_v33, 4  ;;  %v1418_v47 = vor.u32 %v1417_v39, %v1414_v38  ;;  %v1445_v50 = vshrl.u32 %v1392_v45, 16  ;;  %v8023_v12 = vld [vmem:[%s11868_s3 + $0x20] sm:$0xff]  }
  0x32   :  { %v6881_v20 = vcombine.low %v704_v17, %v714_v18  ;;  %v1433_v42 = vrot.slane %v1431_v34, 5  ;;  %v1437_v44 = vrot.slane %v1435_v35, 4  ;;  %v1451_v54 = vshll.u32 %v1393_v46, 16  ;;  %v1397_v31 = vld [vmem:[%s11867_s2 + $0x20] sm:$0xf] }
  0x33   :  { %v1428_v48 = vor.u32 %v1427_v41, %v1423_v40  ;;  %v1455_v55 = vshrl.u32 %v1393_v46, 16  ;;  %v1461_v56 = vshll.u32 %v1394_v52, 16  ;;  %v1419_v57 = vrot.slane %v1418_v47, 4  ;;  %v8480_v41 = vld [vmem:[%s11866_s0 + $0x10] sm:$0xf] }
  0x34   :  { %v1443_v59 = vrot.slane %v1441_v49, 5  ;;  %v1453_v63 = vrot.slane %v1451_v54, 5  ;;  %v1465_v7 = vshrl.u32 %v1394_v52, 16  ;;  %v1471_v16 = vshll.u32 %v1395_v61, 16  ;;  %v8491_v47 = vld [vmem:[%s11866_s0 + $0x14] sm:$0xf] }
  0x35   :  { %v1429_v58 = vrot.slane %v1428_v48, 4  ;;  %v1463_v1 = vrot.slane %v1461_v56, 5  ;;  %v1424_v4 = vsel %vm8199_vm4, %v1419_v57, %v1423_v40  ;;  %v1866_v25 = vrot.slane %v8423_v8, 5  ;;  %v1398_v52 = vld [vmem:[%s11867_s2 + $0x24] sm:$0xf] }
  0x36   :  { %7551 = vmatmul.mubr.msk.bf16.gmra.mxu1 %vm11883_vm1, %v8011_v53  ;;  %7569 = vmatmul.mubr.msk.bf16.gmra.mxu0 %vm11883_vm1, %v6879_v0  ;;  %v1438_v53 = vor.u32 %v1437_v44, %v1433_v42  ;;  %v1457_v0 = vrot.slane %v1455_v55, 4  ;;  %v1467_v18 = vrot.slane %v1465_v7, 4  ;;  %v1869_v26 = vrot.slane %v8428_v9, 5 }
  0x37   :  { %7578 = vmatprep.mubr.msk.bf16.mxu1 %vm11883_vm1, %v8012_v60  ;;  %7572 = vmatprep.mubr.msk.bf16.mxu0 %vm11883_vm1, %v6880_v15  ;;  %v1447_v60 = vrot.slane %v1445_v50, 4  ;;  %v1434_v5 = vsel %vm8199_vm4, %v1429_v58, %v1433_v42  ;;  %v8461_v30 = vsel %vm11884_vm0, %v6980_v51, 0  ;;  %v1491_v45 = vshll.u32 %v1397_v31, 16  ;;  %v1399_v58 = vld [vmem:[%s11867_s2 + $0x28] sm:$0x1] }
  0x38   :  { %v1439_v62 = vrot.slane %v1438_v53, 4  ;;  %v8439_v13 = vcombine.low %v1424_v4, %v1434_v5  ;;  %v1458_v15 = vor.u32 %v1457_v0, %v1453_v63  ;;  %v1468_v29 = vor.u32 %v1467_v18, %v1463_v1  ;;  %v8024_v53 = vld [vmem:[%s11867_s2 + $0x44] sm:$0xff]   ;;  %v8521_v0 = vld [vmem:[%s11866_s0 + $0x18] sm:$0xf] }
  0x39   :  { %v1448_v6 = vor.u32 %v1447_v60, %v1443_v59  ;;  %v1871_v38 = vrot.slane %v1869_v26, 4  ;;  %v1495_v46 = vshrl.u32 %v1397_v31, 16  ;;  %v1493_v56 = vrot.slane %v1491_v45, 5 }
  0x3a   :  { %v1444_v14 = vsel %vm8199_vm4, %v1439_v62, %v1443_v59  ;;  %v1872_v57 = vrot.slane %v8480_v41, 5  ;;  %v8025_v59 = vld [vmem:[%s11868_s3 + $0x34] sm:$0xff]   ;;  %v1501_v7 = vshll.u32 %v1398_v52, 16  ;;  %vm2431_vm9 = vsmask.f32 6416 }
  0x3b   :  { %v1449_v17 = vrot.slane %v1448_v6, 4  ;;  %vm8910_vm10 = vmor %vm2430_vm8, %vm2431_vm9  ;;  %v11951_v43 = vmov 0.0  }
  0x3c   :  { %v8531_v5 = vsel %vm8445_vm7, %v1871_v38, %v1872_v57  ;;  %v1874_v6 = vrot.slane %v1872_v57, 4  ;;  %v1503_v18 = vrot.slane %v1501_v7, 5  ;;  %v8592_v57 = vld [vmem:[%s11866_s0 + $0x24] sm:$0xf] }
  0x3d   :  { %v1404_v7 = vld [vmem:[%s11867_s2 + $0x44] sm:$0xf] }
  0x3e   :  { %7573 = vmatmul.mubr.msk.bf16.gmra.mxu0 %vm11883_vm1, %v6881_v20  ;;  %7579 = vmatmul.mubr.msk.bf16.vlgmr.msra.gmra.mxu1 %vm11883_vm1, %v8013_v19  ;;  %v1475_v19 = vshrl.u32 %v1395_v61, 16  ;;  %v11930_v20 = vmov 0  ;;  %v1875_v61 = vrot.slane %v8491_v47, 5 }
  0x3f   :  { %7582 = vmatprep.mubr.msk.bf16.mxu1 %vm11883_vm1, %v8014_v21  ;;  %7600 = vmatprep.mubr.msk.bf16.mxu0 %vm11883_vm1, %v8015_v22  ;;  %v11931_v20 = vsel %vm8445_vm7, 4294967295, %v11930_v20  ;;  %v6955_v21 = vrot.slane %v8410_v2, 9  ;;  %v1396_v22 = vld [vmem:[%s11867_s2 + $0x1c] sm:$0xf] }
  0x40   :  { %7621 = vmatpush3.bf16.msra.mxu1 %v1682_v23  ;;  %11932 = vst [vmem:[#allocation4_spill] sm:$0xff] %v11931_v20  ;;  %v1459_v23 = vrot.slane %v1458_v15, 4  ;;  %v1477_v32 = vrot.slane %v1475_v19, 4  ;;  %v1481_v40 = vshll.u32 %v1396_v22, 16  ;;  %v1485_v44 = vshrl.u32 %v1396_v22, 16 }
  0x41   :  { %7938 = vmatprep.subr.msk.bf16.mxu1 %vm11884_vm0, %v6980_v51  ;;  %v8473_v35 = vsel %vm8445_vm7, %v6955_v21, %v1866_v25  ;;  %v1877_v15 = vrot.slane %v1875_v61, 4  ;;  %v1878_v19 = vrot.slane %v8521_v0, 5  ;;  %v1400_v21 = vld [vmem:[%s11867_s2 + $0x34] sm:$0xf] }
  0x42   :  { %v1464_v34 = vsel %vm8199_vm4, %v1459_v23, %v1463_v1  ;;  %v1483_v51 = vrot.slane %v1481_v40, 5  ;;  %v1487_v55 = vrot.slane %v1485_v44, 4  ;;  %v8026_v1 = vld [vmem:[%s11867_s2 + $0x4c] sm:$0xff]   ;;  %v8029_v40 = vld [vmem:[%s11868_s3 + $0x44] sm:$0xff]   ;;  %v1519_v45 = vshll.u32 %v1400_v21, 16 }
  0x44   :  { %v1488_v4 = vor.u32 %v1487_v55, %v1483_v51 }
  0x46   :  { %7583 = vmatmul.mubr.msk.bf16.gmra.mxu1 %vm11883_vm1, %v8016_v27  ;;  %7601 = vmatmul.mubr.msk.bf16.vlgmr.msra.gmra.mxu0 %vm11883_vm1, %v8017_v28  ;;  %v7001_v27 = vld [vmem:[%s11864_s4 + $0x10] sm:$0x3]  ;;  %v1454_v28 = vsel %vm8199_vm4, %v1449_v17, %v1453_v63  ;;  %v1497_v63 = vrot.slane %v1495_v46, 4  ;;  %v8540_v17 = vsel %vm8445_vm7, %v1874_v6, %v1875_v61 }
  0x47   :  { %7643 = vmatpush3.bf16.msra.mxu0 %v1989_v24  ;;  %7586 = vmatprep.mubr.msk.bf16.mxu1 %vm11883_vm1, %v8018_v36  ;;  %v1473_v24 = vrot.slane %v1471_v16, 5  ;;  %v8467_v33 = vcombine.low %v1444_v14, %v1454_v28  ;;  %v1868_v36 = vrot.slane %v1866_v25, 4  ;;  %v8516_v62 = vsel %vm11884_vm0, %v7001_v27, 0  ;;  %v8536_v14 = vld [vmem:[%s11866_s0 + $0x1c] sm:$0xf] }
  0x48   :  { %7604 = vmatprep.mubr.msk.bf16.mxu0 %vm11883_vm1, %v8019_v37  ;;  %7939 = vmatprep.subr.msk.bf16.mxu0 %vm11884_vm0, %v7001_v27  ;;  %v1469_v37 = vrot.slane %v1468_v29, 4  ;;  %v1489_v16 = vrot.slane %v1488_v4, 4  ;;  %v6959_v22 = vcombine.low %v8531_v5, %v8540_v17  ;;  %v8559_v28 = vsel %vm8445_vm7, %v1877_v15, %v1878_v19 }
  0x49   :  { %v1478_v39 = vor.u32 %v1477_v32, %v1473_v24  ;;  %v8486_v42 = vsel %vm8445_vm7, %v1868_v36, %v1869_v26  ;;  %v1401_v26 = vld [vmem:[%s11867_s2 + $0x38] sm:$0xf]  ;;  %v1880_v29 = vrot.slane %v1878_v19, 4  ;;  %v1881_v31 = vrot.slane %v8536_v14, 5  ;;  %v1402_v32 = vld [vmem:[%s11867_s2 + $0x3c] sm:$0xf] }
  0x4a   :  { %v1474_v48 = vsel %vm8199_vm4, %v1469_v37, %v1473_v24  ;;  %v6958_v49 = vcombine.low %v8473_v35, %v8486_v42  ;;  %v1494_v27 = vsel %vm8199_vm4, %v1489_v16, %v1493_v56  ;;  %v1525_v46 = vshll.u32 %v1401_v26, 16 }
  0x4b   :  { %v1479_v50 = vrot.slane %v1478_v39, 4  ;;  %v8503_v54 = vcombine.low %v1464_v34, %v1474_v48  ;;  %v8028_v34 = vld [vmem:[%s11867_s2 + $0x54] sm:$0xff]   ;;  %v1516_v39 = vshrl.u32 %v1400_v21, 16  ;;  %v8577_v44 = vsel %vm8445_vm7, %v1880_v29, %v1881_v31 }
  0x4c   :  { %v1529_v48 = vshrl.u32 %v1401_v26, 16  ;;  %v1539_v61 = vshrl.u32 %v1402_v32, 16  ;;  %v1883_v4 = vrot.slane %v1881_v31, 4  ;;  %v1887_v15 = vrot.slane %v8592_v57, 5 }
  0x4d   :  { %v1484_v60 = vsel %vm8199_vm4, %v1479_v50, %v1483_v51  ;;  %v8582_v50 = vld [vmem:[%s11866_s0 + $0x20] sm:$0xf]  ;;  %v8030_v51 = vld [vmem:[%s11868_s3 + $0x4c] sm:$0xff]   ;;  %v1518_v55 = vrot.slane %v1516_v39, 4  ;;  %v1555_v26 = vshll.u32 %v1404_v7, 16 }
  0x4e   :  { %7587 = vmatmul.mubr.msk.bf16.gmra.mxu1 %vm11883_vm1, %v8020_v3  ;;  %7605 = vmatmul.mubr.msk.bf16.gmra.mxu0 %vm11883_vm1, %v8021_v10  ;;  %v8027_v3 = vld [vmem:[%s11868_s3 + $0x3c] sm:$0xff]   ;;  %v1498_v10 = vor.u32 %v1497_v63, %v1493_v56  ;;  %v8568_v36 = vcombine.low %v1484_v60, %v1494_v27  ;;  %v1535_v56 = vshll.u32 %v1402_v32, 16  ;;  %v1531_v60 = vrot.slane %v1529_v48, 4  ;;  %v8031_v48 = vld [vmem:[%s11868_s3 + $0x54] sm:$0xff]  }
  0x4f   :  { %7590 = vmatprep.mubr.msk.bf16.mxu1 %vm11883_vm1, %v8022_v11  ;;  %7608 = vmatprep.mubr.msk.bf16.mxu0 %vm11883_vm1, %v8023_v12  ;;  %v1505_v11 = vshrl.u32 %v1398_v52, 16  ;;  %v1511_v12 = vshll.u32 %v1399_v58, 16  ;;  %v1521_v58 = vrot.slane %v1519_v45, 5  ;;  %v1403_v63 = vld [vmem:[%s11867_s2 + $0x40] sm:$0xf]  ;;  %v1884_v6 = vrot.slane %v8582_v50, 5 }
  0x50   :  { %v1499_v23 = vrot.slane %v1498_v10, 4  ;;  %v1541_v19 = vrot.slane %v1539_v61, 4  ;;  %v1545_v21 = vshll.u32 %v1403_v63, 16  ;;  %v1559_v32 = vshrl.u32 %v1404_v7, 16  ;;  %v1405_v45 = vld [vmem:[%s11867_s2 + $0x48] sm:$0xf] }
  0x51   :  { %v1507_v24 = vrot.slane %v1505_v11, 4  ;;  %v1513_v25 = vrot.slane %v1511_v12, 5  ;;  %v1522_v11 = vor.u32 %v1521_v58, %v1518_v55  ;;  %v8610_v16 = vsel %vm8445_vm7, %v1883_v4, %v1884_v6 }
  0x52   :  { %v1504_v37 = vsel %vm8199_vm4, %v1499_v23, %v1503_v18  ;;  %v1547_v31 = vrot.slane %v1545_v21, 5  ;;  %v1557_v55 = vrot.slane %v1555_v26, 5  ;;  %v1561_v61 = vrot.slane %v1559_v32, 4  ;;  %v1407_v26 = vld [vmem:[%s11867_s2 + $0x50] sm:$0xf] }
  0x53   :  { %v1508_v38 = vor.u32 %v1507_v24, %v1503_v18  ;;  %v1886_v18 = vrot.slane %v1884_v6, 4  ;;  %v1523_v23 = vrot.slane %v1522_v11, 4  ;;  %v8650_v6 = vld [vmem:[%s11866_s0 + $0x38] sm:$0xe] }
  0x54   :  { %v6956_v32 = vrot.slane %v8650_v6, 9 }
  0x55   :  { %v1509_v52 = vrot.slane %v1508_v38, 4  ;;  %v8617_v27 = vsel %vm8445_vm7, %v1886_v18, %v1887_v15  ;;  %v8659_v18 = vld [vmem:[%s11866_s0 + $0x3c] sm:$0xf] }
  0x56   :  { %7591 = vmatmul.mubr.msk.bf16.gmra.mxu1 %vm11883_vm1, %v8024_v53  ;;  %7609 = vmatmul.mubr.msk.bf16.gmra.mxu0 %vm11883_vm1, %v8025_v59  ;;  %v6960_v53 = vcombine.low %v8559_v28, %v8577_v44  ;;  %v1527_v59 = vrot.slane %v1525_v46, 5  ;;  %v6961_v39 = vcombine.low %v8610_v16, %v8617_v27  ;;  %v1406_v46 = vld [vmem:[%s11867_s2 + $0x4c] sm:$0xf]  ;;  %v1897_v42 = vrot.slane %v8659_v18, 5 }
  0x57   :  { %7594 = vmatprep.mubr.msk.bf16.mxu1 %vm11883_vm1, %v8026_v1  ;;  %7612 = vmatprep.mubr.msk.bf16.mxu0 %vm11883_vm1, %v8027_v3  ;;  %v1514_v1 = vsel %vm8199_vm4, %v1509_v52, %v1513_v25  ;;  %v1537_v3 = vrot.slane %v1535_v56, 5  ;;  %v1549_v25 = vshrl.u32 %v1403_v63, 16  ;;  %v1889_v56 = vrot.slane %v1887_v15, 4 }
  0x58   :  { %v8603_v10 = vcombine.low %v1504_v37, %v1514_v1  ;;  %v1532_v12 = vor.u32 %v1531_v60, %v1527_v59  ;;  %v1528_v37 = vsel %vm8199_vm4, %v1523_v23, %v1527_v59  ;;  %v1565_v1 = vshll.u32 %v1405_v45, 16 }
  0x59   :  { %v1542_v29 = vor.u32 %v1541_v19, %v1537_v3  ;;  %v1575_v4 = vshll.u32 %v1406_v46, 16  ;;  %v1562_v15 = vor.u32 %v1561_v61, %v1557_v55  ;;  %v8664_v19 = vld [vmem:[%s11866_s0 + $0x40] sm:$0xf]  ;;  %v8709_v61 = vld [vmem:[%s11866_s0 + $0x48] sm:$0xf] }
  0x5a   :  { %v1533_v24 = vrot.slane %v1532_v12, 4  ;;  %v1567_v21 = vrot.slane %v1565_v1, 5 }
  0x5b   :  { %v1543_v52 = vrot.slane %v1542_v29, 4 }
  0x5c   :  { %v1538_v38 = vsel %vm8199_vm4, %v1533_v24, %v1537_v3  ;;  %v1569_v3 = vshrl.u32 %v1405_v45, 16  ;;  %v1577_v24 = vrot.slane %v1575_v4, 5  ;;  %v1585_v45 = vshll.u32 %v1407_v26, 16 }
  0x5d   :  { %v1548_v63 = vsel %vm8199_vm4, %v1543_v52, %v1547_v31  ;;  %v1589_v52 = vshrl.u32 %v1407_v26, 16 }
  0x5e   :  { %7595 = vmatmul.mubr.msk.bf16.gmra.mxu1 %vm11883_vm1, %v8028_v34  ;;  %7613 = vmatmul.mubr.msk.bf16.gmra.mxu0 %vm11883_vm1, %v8029_v40  ;;  %v8622_v34 = vld [vmem:[%s11866_s0 + $0x28] sm:$0xf]  ;;  %v1551_v40 = vrot.slane %v1549_v25, 4  ;;  %v1571_v23 = vrot.slane %v1569_v3, 4  ;;  %v1579_v25 = vshrl.u32 %v1406_v46, 16  ;;  %v8699_v46 = vsel %vm8445_vm7, %v6956_v32, %v1897_v42 }
  0x5f   :  { %7616 = vmatprep.mubr.msk.bf16.mxu0 %vm11883_vm1, %v8030_v51  ;;  %7622 = vmatprep.mubr.msk.bf16.mxu1 %vm11883_vm1, %v8439_v13  ;;  %v1827_v13 = vld [vmem:[%s11866_s0 + $0x2c] sm:$0x1]  ;;  %v8642_v51 = vcombine.low %v1528_v37, %v1538_v38  ;;  %v1890_v59 = vrot.slane %v8622_v34, 5  ;;  %v1900_v38 = vrot.slane %v8664_v19, 5  ;;  %v1591_v3 = vrot.slane %v1589_v52, 4 }
  0x60   :  { %v1552_v58 = vor.u32 %v1551_v40, %v1547_v31  ;;  %v1893_v60 = vrot.slane %v1827_v13, 5  ;;  %v1563_v31 = vrot.slane %v1562_v15, 4  ;;  %v1572_v35 = vor.u32 %v1571_v23, %v1567_v21 }
  0x61   :  { %v8654_v11 = vsel %vm8445_vm7, %v1889_v56, %v1890_v59  ;;  %v1892_v12 = vrot.slane %v1890_v59, 4  ;;  %v1581_v40 = vrot.slane %v1579_v25, 4  ;;  %v1902_v4 = vrot.slane %v1900_v38, 4  ;;  %v8730_v25 = vld [vmem:[%s11866_s0 + $0x4c] sm:$0xf] }
  0x62   :  { %v1553_v7 = vrot.slane %v1552_v58, 4  ;;  %v1568_v37 = vsel %vm8199_vm4, %v1563_v31, %v1567_v21  ;;  %v1587_v58 = vrot.slane %v1585_v45, 5  ;;  %v1906_v31 = vrot.slane %v8709_v61, 5 }
  0x63   :  { %v1582_v56 = vor.u32 %v1581_v40, %v1577_v24  ;;  %v2124_v40 = vld [vmem:[%s11865_s1 + $0x4] sm:$0xe] }
  0x64   :  { %v1558_v29 = vsel %vm8199_vm4, %v1553_v7, %v1557_v55  ;;  %v8704_v55 = vld [vmem:[%s11866_s0 + $0x44] sm:$0xf]  ;;  %v1409_v7 = vld [vmem:[%s11867_s2 + $0x58] sm:$0xf]  ;;  %v1592_v26 = vor.u32 %v1591_v3, %v1587_v58 }
  0x65   :  { %v8686_v13 = vcombine.low %v1548_v63, %v1558_v29  ;;  %v1583_v23 = vrot.slane %v1582_v56, 4  ;;  %v1903_v29 = vrot.slane %v8704_v55, 5  ;;  %v1605_v17 = vshll.u32 %v1409_v7, 16 }
  0x66   :  { %7617 = vmatmul.mubr.msk.bf16.gmra.mxu0 %vm11883_vm1, %v8031_v48  ;;  %7623 = vmatmul.mubr.msk.bf16.vlgmr.msra.gmra.mxu1 %vm11883_vm1, %v8467_v33  ;;  %v8682_v33 = vsel %vm8445_vm7, %v1892_v12, %v1893_v60  ;;  %v1899_v48 = vrot.slane %v1897_v42, 4  ;;  %v1410_v12 = vld [vmem:[%s11867_s2 + $0x5c] sm:$0x1]  ;;  %v8753_v42 = vld [vmem:[%s11866_s0 + $0x54] sm:$0xf] }
  0x67   :  { %7626 = vmatprep.mubr.msk.bf16.mxu1 %vm11883_vm1, %v8503_v54  ;;  %7644 = vmatprep.mubr.msk.bf16.mxu0 %vm11883_vm1, %v6958_v49  ;;  %v6962_v54 = vcombine.low %v8654_v11, %v8682_v33  ;;  %v1408_v49 = vld [vmem:[%s11867_s2 + $0x54] sm:$0xf]  ;;  %v1588_v5 = vsel %vm8199_vm4, %v1583_v23, %v1587_v58  ;;  %v1607_v45 = vrot.slane %v1605_v17, 5  ;;  %v1909_v58 = vrot.slane %v8730_v25, 5 }
  0x68   :  { %7665 = vmatpush3.bf16.msra.mxu1 %v8461_v30  ;;  %v1573_v30 = vrot.slane %v1572_v35, 4  ;;  %v1595_v59 = vshll.u32 %v1408_v49, 16  ;;  %v1599_v60 = vshrl.u32 %v1408_v49, 16  ;;  %v8715_v1 = vsel %vm8445_vm7, %v1899_v48, %v1900_v38  ;;  %v8743_v35 = vld [vmem:[%s11866_s0 + $0x50] sm:$0xf] }
  0x69   :  { %v6963_v21 = vcombine.low %v8699_v46, %v8715_v1  ;;  %v1905_v49 = vrot.slane %v1903_v29, 4  ;;  %v8766_v38 = vld [vmem:[%s11866_s0 + $0x58] sm:$0xf]  ;;  %v1911_v23 = vrot.slane %v1909_v58, 4  ;;  %v6978_v17 = vrot.slane %v2124_v40, 9 }
  0x6a   :  { %v1578_v63 = vsel %vm8199_vm4, %v1573_v30, %v1577_v24  ;;  %v1597_v24 = vrot.slane %v1595_v59, 5  ;;  %v1601_v32 = vrot.slane %v1599_v60, 4  ;;  %v2125_v30 = vld [vmem:[%s11865_s1 + $0x8] sm:$0xf]  ;;  %v2126_v59 = vld [vmem:[%s11865_s1 + $0xc] sm:$0xf] }
  0x6b   :  { %v8723_v15 = vcombine.low %v1568_v37, %v1578_v63  ;;  %v8778_v52 = vsel %vm8445_vm7, %v1905_v49, %v1906_v31  ;;  %v2173_v40 = vrot.slane %v2126_v59, 5 }
  0x6c   :  { %v1602_v37 = vor.u32 %v1601_v32, %v1597_v24 }
  0x6e   :  { %7627 = vmatmul.mubr.msk.bf16.gmra.mxu1 %vm11883_vm1, %v8568_v36  ;;  %7645 = vmatmul.mubr.msk.bf16.vlgmr.msra.gmra.mxu0 %vm11883_vm1, %v6959_v22  ;;  %v1609_v22 = vshrl.u32 %v1409_v7, 16  ;;  %v1615_v36 = vshll.u32 %v1410_v12, 16  ;;  %v1603_v56 = vrot.slane %v1602_v37, 4  ;;  %v2170_v37 = vrot.slane %v2125_v30, 5 }
  0x6f   :  { %7687 = vmatpush3.bf16.msra.mxu0 %v8516_v62  ;;  %7630 = vmatprep.mubr.msk.bf16.mxu1 %vm11883_vm1, %v8603_v10  ;;  %v1593_v62 = vrot.slane %v1592_v26, 4  ;;  %v8761_v10 = vsel %vm8445_vm7, %v1902_v4, %v1903_v29  ;;  %v1912_v4 = vrot.slane %v8743_v35, 5  ;;  %v8797_v26 = vld [vmem:[%s11866_s0 + $0x5c] sm:$0xf]  ;;  %v1838_v29 = vld [vmem:[%s11866_s0 + $0x60] sm:$0x1] }
  0x70   :  { %7648 = vmatprep.mubr.msk.bf16.mxu0 %vm11883_vm1, %v6960_v53  ;;  %v1611_v28 = vrot.slane %v1609_v22, 4  ;;  %v1617_v44 = vrot.slane %v1615_v36, 5  ;;  %v1908_v53 = vrot.slane %v1906_v31, 4  ;;  %v6964_v63 = vcombine.low %v8761_v10, %v8778_v52  ;;  %v2127_v22 = vld [vmem:[%s11865_s1 + $0x10] sm:$0xf] }
  0x71   :  { %v1598_v48 = vsel %vm8199_vm4, %v1593_v62, %v1597_v24  ;;  %v1608_v7 = vsel %vm8199_vm4, %v1603_v56, %v1607_v45  ;;  %v1915_v24 = vrot.slane %v8753_v42, 5  ;;  %v1914_v32 = vrot.slane %v1912_v4, 4  ;;  %v2128_v36 = vld [vmem:[%s11865_s1 + $0x14] sm:$0xf]  ;;  %v2129_v62 = vld [vmem:[%s11865_s1 + $0x18] sm:$0xf] }
  0x72   :  { %v6943_v60 = vcombine.low %v1588_v5, %v1598_v48  ;;  %v1612_v3 = vor.u32 %v1611_v28, %v1607_v45  ;;  %v8791_v12 = vsel %vm8445_vm7, %v1908_v53, %v1909_v58  ;;  %v1918_v5 = vrot.slane %v8766_v38, 5  ;;  %v2130_v45 = vld [vmem:[%s11865_s1 + $0x1c] sm:$0xf] }
  0x73   :  { %v8820_v10 = vsel %vm8445_vm7, %v1911_v23, %v1912_v4  ;;  %v1917_v49 = vrot.slane %v1915_v24, 4  ;;  %v8847_v11 = vsel %vm8445_vm7, %v6978_v17, %v2170_v37  ;;  %v2172_v33 = vrot.slane %v2170_v37, 4 }
  0x74   :  { %v1613_v31 = vrot.slane %v1612_v3, 4  ;;  %v6965_v27 = vcombine.low %v8791_v12, %v8820_v10  ;;  %v1921_v53 = vrot.slane %v8797_v26, 5  ;;  %v1924_v30 = vrot.slane %v1838_v29, 5 }
  0x75   :  { %v8854_v48 = vsel %vm8445_vm7, %v2172_v33, %v2173_v40  ;;  %v2176_v52 = vrot.slane %v2127_v22, 5  ;;  %v2179_v56 = vrot.slane %v2128_v36, 5  ;;  %v2182_v58 = vrot.slane %v2129_v62, 5  ;;  %v2132_v22 = vld [vmem:[%s11865_s1 + $0x24] sm:$0xf] }
  0x76   :  { %7631 = vmatmul.mubr.msk.bf16.gmra.mxu1 %vm11883_vm1, %v8642_v51  ;;  %7649 = vmatmul.mubr.msk.bf16.gmra.mxu0 %vm11883_vm1, %v6961_v39  ;;  %v1618_v16 = vsel %vm8199_vm4, %v1613_v31, %v1617_v44  ;;  %v8837_v39 = vsel %vm8445_vm7, %v1914_v32, %v1915_v24  ;;  %v1920_v51 = vrot.slane %v1918_v5, 4  ;;  %v2175_v44 = vrot.slane %v2173_v40, 4  ;;  %v2131_v32 = vld [vmem:[%s11865_s1 + $0x20] sm:$0xf] }
  0x77   :  { %7634 = vmatprep.mubr.msk.bf16.mxu1 %vm11883_vm1, %v8686_v13  ;;  %7652 = vmatprep.mubr.msk.bf16.mxu0 %vm11883_vm1, %v6962_v54  ;;  %v8839_v28 = vcombine.low %v1608_v7, %v1618_v16  ;;  %v8843_v13 = vsel %vm8445_vm7, %v1917_v49, %v1918_v5  ;;  %v6981_v59 = vcombine.low %v8847_v11, %v8854_v48  ;;  %v1923_v4 = vrot.slane %v1921_v53, 4 }
  0x78   :  { %v6966_v54 = vcombine.low %v8837_v39, %v8843_v13  ;;  %v8860_v3 = vsel %vm8445_vm7, %v1920_v51, %v1921_v53  ;;  %v2185_v7 = vrot.slane %v2130_v45, 5  ;;  %v8864_v23 = vsel %vm8445_vm7, %v2175_v44, %v2176_v52  ;;  %v2135_v13 = vld [vmem:[%s11865_s1 + $0x38] sm:$0xe] }
  0x79   :  { %v2178_v24 = vrot.slane %v2176_v52, 4  ;;  %v2181_v29 = vrot.slane %v2179_v56, 4  ;;  %v2184_v31 = vrot.slane %v2182_v58, 4  ;;  %v8871_v5 = vsel %vm8445_vm7, %v1923_v4, %v1924_v30 }
  0x7a   :  { %v2434_v17 = vshrl.u32 %v8410_v2, 16  ;;  %v6967_v36 = vcombine.low %v8860_v3, %v8871_v5  ;;  %v2437_v37 = vshll.u32 %v8410_v2, 16  ;;  %v2446_v2 = vshll.u32 %v8423_v8, 16 }
  0x7b   :  { %v8887_v62 = vsel %vm8445_vm7, %v2178_v24, %v2179_v56  ;;  %v8891_v49 = vsel %vm8445_vm7, %v2181_v29, %v2182_v58  ;;  %v8900_v1 = vsel %vm8445_vm7, %v2184_v31, %v2185_v7  ;;  %v2187_v51 = vrot.slane %v2185_v7, 4 }
  0x7c   :  { %v6982_v46 = vcombine.low %v8864_v23, %v8887_v62  ;;  %v6983_v40 = vcombine.low %v8891_v49, %v8900_v1  ;;  %v2439_v45 = vrot.slane %v2437_v37, 6  ;;  %v2188_v11 = vrot.slane %v2131_v32, 5  ;;  %v2134_v37 = vld [vmem:[%s11865_s1 + $0x2c] sm:$0x1]  ;;  %v2138_v62 = vld [vmem:[%s11865_s1 + $0x44] sm:$0xf] }
  0x7d   :  { %v2448_v44 = vrot.slane %v2446_v2, 6  ;;  %v2191_v30 = vrot.slane %v2132_v22, 5  ;;  %v11933_v48 = vmov 0  ;;  %v2466_v7 = vshll.u32 %v8480_v41, 16  ;;  %v2133_v22 = vld [vmem:[%s11865_s1 + $0x28] sm:$0xf] }
  0x7e   :  { %7635 = vmatmul.mubr.msk.bf16.gmra.mxu1 %vm11883_vm1, %v8723_v15  ;;  %7653 = vmatmul.mubr.msk.bf16.gmra.mxu0 %vm11883_vm1, %v6963_v21  ;;  %v2436_v15 = vrot.slane %v2434_v17, 5  ;;  %v2443_v21 = vshrl.u32 %v8423_v8, 16  ;;  %v11934_v48 = vsel %vm8910_vm10, 4294967295, %v11933_v48  ;;  %v8916_v8 = vsel %vm8445_vm7, %v2187_v51, %v2188_v11 }
  0x7f   :  { %7638 = vmatprep.mubr.msk.bf16.mxu1 %vm11883_vm1, %v6943_v60  ;;  %7656 = vmatprep.mubr.msk.bf16.mxu0 %vm11883_vm1, %v6964_v63  ;;  %v2453_v60 = vshrl.u32 %v8428_v9, 16  ;;  %v2456_v63 = vshll.u32 %v8428_v9, 16  ;;  %11935 = vst [vmem:[#allocation5_spill] sm:$0xff] %v11934_v48  ;;  %v2190_v56 = vrot.slane %v2188_v11, 4  ;;  %v2463_v9 = vshrl.u32 %v8480_v41, 16 }
  0x80   :  { %v2445_v16 = vrot.slane %v2443_v21, 5  ;;  %v2440_v33 = vor.u32 %v2439_v45, %v2436_v15  ;;  %v2473_v24 = vshrl.u32 %v8491_v47, 16  ;;  %v2476_v17 = vshll.u32 %v8491_v47, 16 }
  0x81   :  { %v2455_v53 = vrot.slane %v2453_v60, 5  ;;  %v2458_v52 = vrot.slane %v2456_v63, 6  ;;  %v8923_v31 = vsel %vm8445_vm7, %v2190_v56, %v2191_v30  ;;  %v2465_v32 = vrot.slane %v2463_v9, 5  ;;  %v2137_v9 = vld [vmem:[%s11865_s1 + $0x40] sm:$0xf] }
  0x82   :  { %v2441_v58 = vrot.slane %v2440_v33, 4  ;;  %v2449_v4 = vor.u32 %v2448_v44, %v2445_v16  ;;  %v6984_v15 = vcombine.low %v8916_v8, %v8923_v31  ;;  %v2468_v21 = vrot.slane %v2466_v7, 6 }
  0x83   :  { %v2459_v29 = vor.u32 %v2458_v52, %v2455_v53  ;;  %v2475_v45 = vrot.slane %v2473_v24, 5  ;;  %v2478_v12 = vrot.slane %v2476_v17, 6  ;;  %v2193_v10 = vrot.slane %v2191_v30, 4  ;;  %v2136_v53 = vld [vmem:[%s11865_s1 + $0x3c] sm:$0xf] }
  0x84   :  { %v2450_v41 = vsel %vm8910_vm10, %v2441_v58, %v2449_v4  ;;  %v2451_v47 = vrot.slane %v2449_v4, 4  ;;  %v2469_v2 = vor.u32 %v2468_v21, %v2465_v32  ;;  %v2194_v60 = vrot.slane %v2133_v22, 5 }
  0x85   :  { %v2197_v16 = vrot.slane %v2134_v37, 5  ;;  %v2479_v51 = vor.u32 %v2478_v12, %v2475_v45  ;;  %v2483_v11 = vshrl.u32 %v8521_v0, 16  ;;  %v2486_v39 = vshll.u32 %v8521_v0, 16 }
  0x86   :  { %7639 = vmatmul.mubr.msk.bf16.gmra.mxu1 %vm11883_vm1, %v8839_v28  ;;  %7657 = vmatmul.mubr.msk.bf16.gmra.mxu0 %vm11883_vm1, %v6965_v27  ;;  %v2461_v28 = vrot.slane %v2459_v29, 4  ;;  %v2460_v27 = vsel %vm8910_vm10, %v2451_v47, %v2459_v29  ;;  %v8958_v33 = vsel %vm8445_vm7, %v2193_v10, %v2194_v60  ;;  %v2196_v44 = vrot.slane %v2194_v60, 4 }
  0x87   :  { %7660 = vmatprep.mubr.msk.bf16.mxu0 %vm11883_vm1, %v6966_v54  ;;  %7666 = vmatprep.mubr.msk.bf16.mxu1 %vm11883_vm1, %v6981_v59  ;;  %v7002_v63 = vcombine.low %v2450_v41, %v2460_v27  ;;  %v2471_v59 = vrot.slane %v2469_v2, 4  ;;  %v2481_v30 = vrot.slane %v2479_v51, 4  ;;  %v2485_v52 = vrot.slane %v2483_v11, 5 }
  0x88   :  { %v2470_v54 = vsel %vm8910_vm10, %v2461_v28, %v2469_v2  ;;  %v2488_v0 = vrot.slane %v2486_v39, 6  ;;  %v2493_v56 = vshrl.u32 %v8536_v14, 16  ;;  %v2198_v4 = vsel %vm8445_vm7, %v2196_v44, %v2197_v16 }
  0x89   :  { %v2480_v58 = vsel %vm8910_vm10, %v2471_v59, %v2479_v51  ;;  %v2496_v7 = vshll.u32 %v8536_v14, 16  ;;  %v6979_v24 = vrot.slane %v2135_v13, 9  ;;  %v6985_v32 = vcombine.low %v8958_v33, %v2198_v4 }
  0x8a   :  { %v7003_v29 = vcombine.low %v2470_v54, %v2480_v58  ;;  %v2489_v17 = vor.u32 %v2488_v0, %v2485_v52  ;;  %v2495_v22 = vrot.slane %v2493_v56, 5  ;;  %v2201_v41 = vrot.slane %v2136_v53, 5  ;;  %v2140_v52 = vld [vmem:[%s11865_s1 + $0x4c] sm:$0xf] }
  0x8b   :  { %v2498_v37 = vrot.slane %v2496_v7, 6  ;;  %v2204_v47 = vrot.slane %v2137_v9, 5  ;;  %v2503_v14 = vshrl.u32 %v8582_v50, 16  ;;  %v2506_v23 = vshll.u32 %v8582_v50, 16  ;;  %v2139_v50 = vld [vmem:[%s11865_s1 + $0x48] sm:$0xf] }
  0x8c   :  { %v2490_v3 = vsel %vm8910_vm10, %v2481_v30, %v2489_v17  ;;  %v2491_v5 = vrot.slane %v2489_v17, 4  ;;  %v8996_v49 = vsel %vm8445_vm7, %v6979_v24, %v2201_v41  ;;  %v2203_v1 = vrot.slane %v2201_v41, 4 }
  0x8d   :  { %v2508_v21 = vrot.slane %v2506_v23, 6  ;;  %v2516_v45 = vshll.u32 %v8592_v57, 16  ;;  %v2206_v12 = vrot.slane %v2204_v47, 4  ;;  %v2207_v60 = vrot.slane %v2138_v62, 5 }
  0x8e   :  { %7661 = vmatmul.mubr.msk.bf16.gmra.mxu0 %vm11883_vm1, %v6967_v36  ;;  %7667 = vmatmul.mubr.msk.bf16.vlgmr.msra.gmra.mxu1 %vm11883_vm1, %v6982_v46  ;;  %v2513_v36 = vshrl.u32 %v8592_v57, 16  ;;  %v2499_v46 = vor.u32 %v2498_v37, %v2495_v22  ;;  %v2205_v27 = vsel %vm8445_vm7, %v2203_v1, %v2204_v47  ;;  %v2428_v57 = vld [vmem:[%s11866_s0 + $0x2c] sm:$0x3]  ;;  %v2210_v54 = vrot.slane %v2139_v50, 5 }
  0x8f   :  { %7670 = vmatprep.mubr.msk.bf16.mxu1 %vm11883_vm1, %v6983_v40  ;;  %7688 = vmatprep.mubr.msk.bf16.mxu0 %vm11883_vm1, %v7002_v63  ;;  %v2505_v40 = vrot.slane %v2503_v14, 5  ;;  %v6986_v63 = vcombine.low %v8996_v49, %v2205_v27  ;;  %v2518_v11 = vrot.slane %v2516_v45, 6  ;;  %v2208_v39 = vsel %vm8445_vm7, %v2206_v12, %v2207_v60  ;;  %v2143_v12 = vld [vmem:[%s11865_s1 + $0x58] sm:$0xf] }
  0x90   :  { %v2515_v28 = vrot.slane %v2513_v36, 5  ;;  %v2500_v10 = vsel %vm8910_vm10, %v2491_v5, %v2499_v46  ;;  %v2501_v2 = vrot.slane %v2499_v46, 4  ;;  %v2209_v13 = vrot.slane %v2207_v60, 4 }
  0x91   :  { %v7004_v16 = vcombine.low %v2490_v3, %v2500_v10  ;;  %v2509_v51 = vor.u32 %v2508_v21, %v2505_v40  ;;  %v2523_v59 = vshrl.u32 %v8622_v34, 16  ;;  %v2526_v30 = vshll.u32 %v8622_v34, 16  ;;  %v2141_v34 = vld [vmem:[%s11865_s1 + $0x50] sm:$0xf] }
  0x92   :  { %v2519_v53 = vor.u32 %v2518_v11, %v2515_v28  ;;  %v2211_v0 = vsel %vm8445_vm7, %v2209_v13, %v2210_v54  ;;  %v2533_v9 = vshrl.u32 %v2428_v57, 16  ;;  %v2536_v58 = vshll.u32 %v2428_v57, 16 }
  0x93   :  { %v2510_v33 = vsel %vm8910_vm10, %v2501_v2, %v2509_v51  ;;  %v2511_v44 = vrot.slane %v2509_v51, 4  ;;  %v2525_v56 = vrot.slane %v2523_v59, 5  ;;  %v6987_v31 = vcombine.low %v2208_v39, %v2211_v0 }
  0x94   :  { %v2528_v4 = vrot.slane %v2526_v30, 6  ;;  %v2535_v24 = vrot.slane %v2533_v9, 5  ;;  %v2212_v17 = vrot.slane %v2210_v54, 4  ;;  %v2213_v37 = vrot.slane %v2140_v52, 5 }
  0x95   :  { %v2520_v8 = vsel %vm8910_vm10, %v2511_v44, %v2519_v53  ;;  %v2216_v41 = vrot.slane %v2141_v34, 5  ;;  %v2542_v47 = vshrl.u32 %v8650_v6, 16  ;;  %v2551_v3 = vshrl.u32 %v8659_v18, 16 }
  0x96   :  { %7671 = vmatmul.mubr.msk.bf16.gmra.mxu1 %vm11883_vm1, %v6984_v15  ;;  %7689 = vmatmul.mubr.msk.bf16.vlgmr.msra.gmra.mxu0 %vm11883_vm1, %v7003_v29  ;;  %v2521_v15 = vrot.slane %v2519_v53, 4  ;;  %v7005_v7 = vcombine.low %v2510_v33, %v2520_v8  ;;  %v2538_v29 = vrot.slane %v2536_v58, 6  ;;  %v2529_v22 = vor.u32 %v2528_v4, %v2525_v56  ;;  %v2144_v53 = vld [vmem:[%s11865_s1 + $0x5c] sm:$0xf] }
  0x97   :  { %7674 = vmatprep.mubr.msk.bf16.mxu1 %vm11883_vm1, %v6985_v32  ;;  %7692 = vmatprep.mubr.msk.bf16.mxu0 %vm11883_vm1, %v7004_v16  ;;  %v2545_v32 = vshll.u32 %v8650_v6, 16  ;;  %v2554_v5 = vshll.u32 %v8659_v18, 16  ;;  %v2214_v62 = vsel %vm8445_vm7, %v2212_v17, %v2213_v37  ;;  %v2215_v46 = vrot.slane %v2213_v37, 4  ;;  %v2142_v6 = vld [vmem:[%s11865_s1 + $0x54] sm:$0xf] }
  0x98   :  { %v2539_v14 = vor.u32 %v2538_v29, %v2535_v24  ;;  %v2530_v23 = vsel %vm8910_vm10, %v2521_v15, %v2529_v22  ;;  %v2531_v36 = vrot.slane %v2529_v22, 4  ;;  %v2544_v49 = vrot.slane %v2542_v47, 5 }
  0x99   :  { %v2547_v1 = vrot.slane %v2545_v32, 6  ;;  %v2553_v40 = vrot.slane %v2551_v3, 5  ;;  %v2556_v21 = vrot.slane %v2554_v5, 6  ;;  %v2217_v18 = vsel %vm8445_vm7, %v2215_v46, %v2216_v41 }
  0x9a   :  { %v2540_v28 = vsel %vm8910_vm10, %v2531_v36, %v2539_v14  ;;  %v2561_v45 = vshrl.u32 %v8664_v19, 16  ;;  %v2564_v50 = vshll.u32 %v8664_v19, 16  ;;  %v6988_v27 = vcombine.low %v2214_v62, %v2217_v18 }
  0x9b   :  { %v7006_v10 = vcombine.low %v2530_v23, %v2540_v28  ;;  %v2548_v2 = vor.u32 %v2547_v1, %v2544_v49  ;;  %v2218_v60 = vrot.slane %v2216_v41, 4  ;;  %v2557_v16 = vor.u32 %v2556_v21, %v2553_v40 }
  0x9c   :  { %v2563_v51 = vrot.slane %v2561_v45, 5  ;;  %v2566_v11 = vrot.slane %v2564_v50, 6  ;;  %v2219_v57 = vrot.slane %v2142_v6, 5  ;;  %v2222_v39 = vrot.slane %v2143_v12, 5 }
  0x9d   :  { %v2549_v19 = vrot.slane %v2548_v2, 4  ;;  %v2571_v13 = vshrl.u32 %v8704_v55, 16  ;;  %v2559_v54 = vrot.slane %v2557_v16, 4  ;;  %v2581_v56 = vshrl.u32 %v8709_v61, 16 }
  0x9e   :  { %7675 = vmatmul.mubr.msk.bf16.gmra.mxu1 %vm11883_vm1, %v6986_v63  ;;  %7693 = vmatmul.mubr.msk.bf16.gmra.mxu0 %vm11883_vm1, %v7005_v7  ;;  %v2574_v63 = vshll.u32 %v8704_v55, 16  ;;  %v2567_v59 = vor.u32 %v2566_v11, %v2563_v51  ;;  %v2220_v33 = vsel %vm8445_vm7, %v2218_v60, %v2219_v57  ;;  %v2221_v44 = vrot.slane %v2219_v57, 4  ;;  %v2145_v55 = vld [vmem:[%s11865_s1 + $0x60] sm:$0x1] }
  0x9f   :  { %7678 = vmatprep.mubr.msk.bf16.mxu1 %vm11883_vm1, %v6987_v31  ;;  %7696 = vmatprep.mubr.msk.bf16.mxu0 %vm11883_vm1, %v7006_v10  ;;  %v2558_v30 = vsel %vm8910_vm10, %v2549_v19, %v2557_v16  ;;  %v2573_v52 = vrot.slane %v2571_v13, 5  ;;  %v2584_v8 = vshll.u32 %v8709_v61, 16  ;;  %v2583_v7 = vrot.slane %v2581_v56, 5  ;;  %v2429_v10 = vld [vmem:[%s11866_s0 + $0x60] sm:$0x3] }
  0xa0   :  { %v2576_v0 = vrot.slane %v2574_v63, 6  ;;  %v2568_v9 = vsel %vm8910_vm10, %v2559_v54, %v2567_v59  ;;  %v2223_v58 = vsel %vm8445_vm7, %v2221_v44, %v2222_v39  ;;  %v2569_v34 = vrot.slane %v2567_v59, 4 }
  0xa1   :  { %v7007_v31 = vcombine.low %v2558_v30, %v2568_v9  ;;  %v6989_v15 = vcombine.low %v2220_v33, %v2223_v58  ;;  %v2586_v24 = vrot.slane %v2584_v8, 6  ;;  %v2224_v29 = vrot.slane %v2222_v39, 4 }
  0xa2   :  { %v2577_v4 = vor.u32 %v2576_v0, %v2573_v52  ;;  %v2225_v17 = vrot.slane %v2144_v53, 5  ;;  %v2228_v22 = vrot.slane %v2145_v55, 5  ;;  %v2591_v47 = vshrl.u32 %v8730_v25, 16 }
  0xa3   :  { %v2594_v61 = vshll.u32 %v8730_v25, 16  ;;  %v2587_v14 = vor.u32 %v2586_v24, %v2583_v7  ;;  %v2601_v5 = vshrl.u32 %v8743_v35, 16  ;;  %v2604_v62 = vshll.u32 %v8743_v35, 16 }
  0xa4   :  { %v2578_v37 = vsel %vm8910_vm10, %v2569_v34, %v2577_v4  ;;  %v2579_v41 = vrot.slane %v2577_v4, 4  ;;  %v2226_v32 = vsel %vm8445_vm7, %v2224_v29, %v2225_v17  ;;  %v2227_v3 = vrot.slane %v2225_v17, 4 }
  0xa5   :  { %v2593_v23 = vrot.slane %v2591_v47, 5  ;;  %v2596_v36 = vrot.slane %v2594_v61, 6  ;;  %v2611_v46 = vshrl.u32 %v8753_v42, 16  ;;  %v2589_v1 = vrot.slane %v2587_v14, 4 }
  0xa6   :  { %7679 = vmatmul.mubr.msk.bf16.gmra.mxu1 %vm11883_vm1, %v6988_v27  ;;  %7697 = vmatmul.mubr.msk.bf16.gmra.mxu0 %vm11883_vm1, %v7007_v31  ;;  %v2588_v49 = vsel %vm8910_vm10, %v2579_v41, %v2587_v14  ;;  %v2229_v25 = vsel %vm8445_vm7, %v2227_v3, %v2228_v22  ;;  %v2603_v40 = vrot.slane %v2601_v5, 5  ;;  %v2606_v18 = vrot.slane %v2604_v62, 6 }
  0xa7   :  { %7682 = vmatprep.mubr.msk.bf16.mxu1 %vm11883_vm1, %v6989_v15  ;;  %v7008_v21 = vcombine.low %v2578_v37, %v2588_v49  ;;  %v6990_v6 = vcombine.low %v2226_v32, %v2229_v25  ;;  %v2597_v28 = vor.u32 %v2596_v36, %v2593_v23  ;;  %v2613_v45 = vrot.slane %v2611_v46, 5  ;;  %v7065_v23 = vld [vmem:[%s11869_s6 + $0x4] sm:$0xf]  ;;  %v3656_v46 = vld [vmem:[%s11869_s6] sm:$0xf] }
  0xa8   :  { %v2614_v50 = vshll.u32 %v8753_v42, 16  ;;  %v2621_v12 = vshrl.u32 %v8766_v38, 16  ;;  %v2624_v35 = vshll.u32 %v8766_v38, 16  ;;  %v2607_v60 = vor.u32 %v2606_v18, %v2603_v40  ;;  %7940 = vmatprep.subr.msk.bf16.mxu1 %vm3809_vm11, %v7065_v23  ;;  %7941 = vmatprep.subr.msk.bf16.mxu0 %vm3809_vm11, %v3656_v46 }
  0xa9   :  { %7700 = vmatprep.mubr.msk.bf16.mxu0 %vm11883_vm1, %v7008_v21  ;;  %v2598_v27 = vsel %vm8910_vm10, %v2589_v1, %v2597_v28  ;;  %v2599_v2 = vrot.slane %v2597_v28, 4  ;;  %v2631_v16 = vshrl.u32 %v8797_v26, 16  ;;  %v2634_v57 = vshll.u32 %v8797_v26, 16 }
  0xaa   :  { %v2616_v51 = vrot.slane %v2614_v50, 6  ;;  %v2623_v11 = vrot.slane %v2621_v12, 5  ;;  %v2626_v42 = vrot.slane %v2624_v35, 6  ;;  %v2609_v19 = vrot.slane %v2607_v60, 4 }
  0xab   :  { %v2608_v38 = vsel %vm8910_vm10, %v2599_v2, %v2607_v60  ;;  %v2633_v39 = vrot.slane %v2631_v16, 5  ;;  %v2641_v13 = vshrl.u32 %v2429_v10, 16  ;;  %v2636_v33 = vrot.slane %v2634_v57, 6 }
  0xac   :  { %v7009_v63 = vcombine.low %v2598_v27, %v2608_v38  ;;  %v2617_v54 = vor.u32 %v2616_v51, %v2613_v45  ;;  %v2627_v59 = vor.u32 %v2626_v42, %v2623_v11  ;;  %v2644_v53 = vshll.u32 %v2429_v10, 16 }
  0xad   :  { %v2643_v44 = vrot.slane %v2641_v13, 5  ;;  %v2637_v0 = vor.u32 %v2636_v33, %v2633_v39  ;;  %v3811_v62 = vsel %vm3809_vm11, %v7065_v23, 0  ;;  %v3987_v25 = vsel %vm3809_vm11, %v3656_v46, 0 }
  0xae   :  { %7683 = vmatmul.mubr.msk.bf16.gmra.mxu1 %vm11883_vm1, %v6990_v6  ;;  %7701 = vmatmul.mubr.msk.bf16.gmra.mxu0 %vm11883_vm1, %v7009_v63  ;;  %v2618_v30 = vsel %vm8910_vm10, %v2609_v19, %v2617_v54  ;;  %v2619_v26 = vrot.slane %v2617_v54, 4  ;;  %v2629_v52 = vrot.slane %v2627_v59, 4  ;;  %v2646_v56 = vrot.slane %v2644_v53, 6 }
  0xaf   :  { %v2639_v9 = vrot.slane %v2637_v0, 4  ;;  %7709 = vmatpush3.bf16.msra.mxu1 %v3811_v62  ;;  %7731 = vmatpush3.bf16.msra.mxu0 %v3987_v25  ;;  %v2847_v27 = vlaneseq }
  0xb0   :  { %v2628_v55 = vsel %vm8910_vm10, %v2619_v26, %v2627_v59  ;;  %v2638_v34 = vsel %vm8910_vm10, %v2629_v52, %v2637_v0  ;;  %v2647_v8 = vor.u32 %v2646_v56, %v2643_v44 }
  0xb1   :  { %v7010_v58 = vcombine.low %v2618_v30, %v2628_v55  ;;  %v9154_v19 = vshrl.u32 %v2847_v27, 7 }
  0xb2   :  { %v2648_v31 = vsel %vm8910_vm10, %v2639_v9, %v2647_v8 }
  0xb3   :  { %7704 = vmatprep.mubr.msk.bf16.mxu0 %vm11883_vm1, %v7010_v58  ;;  %v7011_v15 = vcombine.low %v2638_v34, %v2648_v31  ;;  %v2850_v44 = vadd.s32 16, %v9154_v19 }
  0xb5   :  { %v9167_v58 = vmul.u32.u64.low 3435973837, %v2850_v44  ;;  %v9168_v34 = vmul.u32.u64.high 3435973837, %v2850_v44, %v9167_v58 }
  0xb6   :  { %7705 = vmatmul.mubr.msk.bf16.gmra.mxu0 %vm11883_vm1, %v7011_v15 }
  0xc6   :  { %v7514_v4 = vpop.f32.mrf.mxu0  ;;  %v9116_v7 = vpop.f32.mrf.mxu1 }
  0xc8   :  { %v207_v24 = vpop.f32.mrf.mxu0  ;;  %v9118_v29 = vpop.f32.mrf.mxu1 }
  0xca   :  { %v7515_v17 = vpop.f32.mrf.mxu0  ;;  %v9120_v22 = vpop.f32.mrf.mxu1 }
  0xcc   :  { %v9122_v37 = vpop.f32.mrf.mxu0  ;;  %v9124_v41 = vpop.f32.mrf.mxu1 }
  0xce   :  { %v7518_v47 = vpop.f32.mrf.mxu0  ;;  %v9126_v61 = vpop.f32.mrf.mxu1 }
  0xd0   :  { %v223_v14 = vpop.f32.mrf.mxu0  ;;  %v9128_v32 = vpop.f32.mrf.mxu1 }
  0xd2   :  { %v7519_v3 = vpop.f32.mrf.mxu0  ;;  %v9130_v5 = vpop.f32.mrf.mxu1 }
  0xd4   :  { %v9135_v36 = vpop.f32.mrf.mxu0  ;;  %v9142_v49 = vpop.f32.mrf.mxu1 }
  0xd6   :  { %v7522_v1 = vpop.f32.mrf.mxu0  ;;  %v7536_v40 = vpop.f32.mrf.mxu1 }
  0xd7   :  { %v412_v21 = vadd.f32 %v7536_v40, %v7514_v4  ;;  %v9184_v40 = vadd.s32 24, %v9154_v19 }
  0xd8   :  { %v239_v6 = vpop.f32.mrf.mxu0  ;;  %v403_v28 = vpop.f32.mrf.mxu1 }
  0xd9   :  { %v404_v18 = vadd.f32 %v403_v28, %v207_v24  ;;  %v2896_v28 = vshrl.u32 %v9168_v34, 3 }
  0xda   :  { %v7523_v45 = vpop.f32.mrf.mxu0  ;;  %v7537_v50 = vpop.f32.mrf.mxu1 }
  0xdb   :  { %v415_v12 = vadd.f32 %v7537_v50, %v7515_v17  ;;  %v9191_v50 = vadd.s32 8, %v9154_v19 }
  0xdc   :  { %v9146_v35 = vpop.f32.mrf.mxu0  ;;  %v9148_v10 = vpop.f32.mrf.mxu1 }
  0xde   :  { %v7540_v2 = vpop.f32.mrf.mxu1  ;;  %v7558_v60 = vpop.f32.mrf.mxu0 }
  0xdf   :  { %v428_v16 = vadd.f32 %v7540_v2, %v7518_v47  ;;  %v9150_v51 = vadd.f32 %v7558_v60, %v412_v21 }
  0xe0   :  { %v419_v11 = vpop.f32.mrf.mxu1  ;;  %v814_v42 = vpop.f32.mrf.mxu0 }
  0xe1   :  { %v420_v57 = vadd.f32 %v419_v11, %v223_v14  ;;  %v9152_v38 = vadd.f32 %v814_v42, %v404_v18 }
  0xe2   :  { %v7541_v39 = vpop.f32.mrf.mxu1  ;;  %v7559_v13 = vpop.f32.mrf.mxu0 }
  0xe3   :  { %v431_v63 = vadd.f32 %v7541_v39, %v7519_v3  ;;  %v9156_v54 = vadd.f32 %v7559_v13, %v415_v12  ;;  %v9177_v3 = vmul.u32.u64.low 3435973837, %v9154_v19  ;;  %v9178_v23 = vmul.u32.u64.high 3435973837, %v9154_v19, %v9177_v3 }
  0xe4   :  { %v9158_v59 = vpop.f32.mrf.mxu1  ;;  %v9160_v33 = vpop.f32.mrf.mxu0  ;;  %v9206_v39 = vmul.u32.u64.low 3435973837, %v9191_v50  ;;  %v9207_v13 = vmul.u32.u64.high 3435973837, %v9191_v50, %v9206_v39 }
  0xe6   :  { %v7544_v53 = vpop.f32.mrf.mxu1  ;;  %v7562_v30 = vpop.f32.mrf.mxu0 }
  0xe7   :  { %v444_v26 = vadd.f32 %v7544_v53, %v7522_v1  ;;  %v9163_v52 = vadd.f32 %v7562_v30, %v428_v16  ;;  %v2897_v16 = vmul.u32 10, %v2896_v28  ;;  %v9245_v28 = vadd.s32 56, %v9154_v19 }
  0xe8   :  { %v435_v0 = vpop.f32.mrf.mxu1  ;;  %v830_v56 = vpop.f32.mrf.mxu0 }
  0xe9   :  { %v436_v55 = vadd.f32 %v435_v0, %v239_v6  ;;  %v9165_v9 = vadd.f32 %v830_v56, %v420_v57  ;;  %v2874_v57 = vshrl.u32 %v9178_v23, 3  ;;  %v9218_v34 = vsub.s32 %v2850_v44, %v2897_v16 }
  0xea   :  { %v7545_v8 = vpop.f32.mrf.mxu1  ;;  %v7563_v31 = vpop.f32.mrf.mxu0  ;;  %v9233_v23 = vadd.s32 32, %v9154_v19 }
  0xeb   :  { %v447_v15 = vadd.f32 %v7545_v8, %v7523_v45  ;;  %v9170_v4 = vadd.f32 %v7563_v31, %v431_v63  ;;  %v2875_v8 = vmul.u32 10, %v2874_v57  ;;  %vm3090_vm13 = vcmp.ne.s32.totalorder %v9218_v34, 0 }
  0xec   :  { %v9172_v24 = vpop.f32.mrf.mxu1  ;;  %v9174_v17 = vpop.f32.mrf.mxu0  ;;  %vm3110_vm14 = vcmp.lt.s32.totalorder %v9218_v34, 0 }
  0xed   :  { %vm9270_vm15 = vmand %vm3110_vm14, %vm3090_vm13 }
  0xee   :  { %v7548_v47 = vpop.f32.mrf.mxu1  ;;  %v7566_v14 = vpop.f32.mrf.mxu0 }
  0xef   :  { %v460_v62 = vadd.f32 %v7548_v47, %v9116_v7  ;;  %v9181_v46 = vadd.f32 %v7566_v14, %v444_v26 }
  0xf0   :  { %v451_v25 = vpop.f32.mrf.mxu1  ;;  %v846_v1 = vpop.f32.mrf.mxu0 }
  0xf1   :  { %v452_v21 = vadd.f32 %v451_v25, %v9118_v29  ;;  %v9187_v6 = vadd.f32 %v846_v1, %v436_v55  ;;  %v9201_v60 = vmul.u32.u64.low 3435973837, %v9184_v40  ;;  %v9202_v29 = vmul.u32.u64.high 3435973837, %v9184_v40, %v9201_v60 }
  0xf2   :  { %v7549_v18 = vpop.f32.mrf.mxu1  ;;  %v7567_v45 = vpop.f32.mrf.mxu0  ;;  %v9237_v25 = vsub.s32 %v9154_v19, %v2875_v8 }
  0xf3   :  { %v463_v7 = vadd.f32 %v7549_v18, %v9120_v22  ;;  %v9194_v12 = vadd.f32 %v7567_v45, %v447_v15  ;;  %v9210_v22 = vadd.s32 48, %v9154_v19  ;;  %v8052_v18 = vmov 0  }
  0xf4   :  { %v9196_v27 = vpop.f32.mrf.mxu1  ;;  %v9198_v2 = vpop.f32.mrf.mxu0  ;;  %37 = vst.msk [vmem:[#allocation2] sm:$0xf] %vm36_vm12, %v8052_v18  ;;  %38 = vst.msk [vmem:[#allocation2 + $0x4] sm:$0xf] %vm36_vm12, %v8052_v18  ;;  %vm3088_vm2 = vcmp.ne.s32.totalorder %v9237_v25, 0  ;;  %vm3108_vm3 = vcmp.lt.s32.totalorder %v9237_v25, 0 }
  0xf5   :  { %v9221_v31 = vmul.u32.u64.low 3435973837, %v9210_v22  ;;  %v9222_v15 = vmul.u32.u64.high 3435973837, %v9210_v22, %v9221_v31  ;;  %39 = vst.msk [vmem:[#allocation2 + $0x38] sm:$0xf] %vm36_vm12, %v8052_v18  ;;  %40 = vst.msk [vmem:[#allocation2 + $0x3c] sm:$0xf] %vm36_vm12, %v8052_v18 }
  0xf6   :  { %v7552_v11 = vpop.f32.mrf.mxu1  ;;  %v7570_v42 = vpop.f32.mrf.mxu0  ;;  %41 = vst.msk [vmem:[#allocation2 + $0x30] sm:$0xf] %vm36_vm12, %v8052_v18  ;;  %42 = vst.msk [vmem:[#allocation2 + $0x34] sm:$0xf] %vm36_vm12, %v8052_v18 }
  0xf7   :  { %v476_v63 = vadd.f32 %v7552_v11, %v9126_v61  ;;  %v9213_v53 = vadd.f32 %v7570_v42, %v460_v62  ;;  %43 = vst.msk [vmem:[#allocation2 + $0x68] sm:$0xf] %vm36_vm12, %v8052_v18  ;;  %44 = vst.msk [vmem:[#allocation2 + $0x6c] sm:$0xf] %vm36_vm12, %v8052_v18  ;;  %v9263_v42 = vmul.u32.u64.low 3435973837, %v9233_v23  ;;  %v9264_v57 = vmul.u32.u64.high 3435973837, %v9233_v23, %v9263_v42 }
  0xf8   :  { %v467_v30 = vpop.f32.mrf.mxu1  ;;  %v862_v26 = vpop.f32.mrf.mxu0  ;;  %vm9299_vm5 = vmand %vm3108_vm3, %vm3088_vm2 }
  0xf9   :  { %v468_v0 = vadd.f32 %v467_v30, %v9128_v32  ;;  %v9216_v56 = vadd.f32 %v862_v26, %v452_v21  ;;  %v2907_v32 = vshrl.u32 %v9202_v29, 3  ;;  %v9257_v29 = vadd.s32 40, %v9154_v19 }
  0xfa   :  { %v7553_v55 = vpop.f32.mrf.mxu1  ;;  %v7571_v58 = vpop.f32.mrf.mxu0 }
  0xfb   :  { %v479_v47 = vadd.f32 %v7553_v55, %v9130_v5  ;;  %v9225_v61 = vadd.f32 %v7571_v58, %v463_v7  ;;  %v2885_v5 = vshrl.u32 %v9207_v13, 3  ;;  %v3150_v7 = vadd.s32 10, %v9218_v34 }
  0xfc   :  { %v9227_v14 = vpop.f32.mrf.mxu1  ;;  %v9229_v3 = vpop.f32.mrf.mxu0  ;;  %v2908_v60 = vmul.u32 10, %v2907_v32  ;;  %v9281_v55 = vmul.u32.u64.low 3435973837, %v9245_v28  ;;  %v9282_v58 = vmul.u32.u64.high 3435973837, %v9245_v28, %v9281_v55  ;;  %v3148_v32 = vadd.s32 10, %v9237_v25 }
  0xfd   :  { %v2886_v30 = vmul.u32 10, %v2885_v5 }
  0xfe   :  { %v7574_v44 = vpop.f32.mrf.mxu0  ;;  %v7580_v62 = vpop.f32.mrf.mxu1 }
  0xff   :  { %v9240_v1 = vadd.f32 %v7574_v44, %v476_v63  ;;  %v1133_v21 = vadd.f32 %v7580_v62, %v9150_v51  ;;  %v9290_v44 = vsub.s32 %v9184_v40, %v2908_v60  ;;  %v9307_v40 = vadd.s32 80, %v9154_v19 }
 0x100   :  { %v878_v51 = vpop.f32.mrf.mxu0  ;;  %v1052_v45 = vpop.f32.mrf.mxu1 }
 0x101   :  { %v9259_v16 = vadd.f32 %v878_v51, %v468_v0  ;;  %v1131_v11 = vadd.f32 %v1052_v45, %v9152_v38  ;;  %v2940_v38 = vshrl.u32 %v9222_v15, 3  ;;  %v9304_v51 = vsub.s32 %v9191_v50, %v2886_v30 }
 0x102   :  { %v7575_v39 = vpop.f32.mrf.mxu0  ;;  %v7581_v13 = vpop.f32.mrf.mxu1  ;;  %v9293_v62 = vmul.u32.u64.low 3435973837, %v9257_v29  ;;  %v9294_v15 = vmul.u32.u64.high 3435973837, %v9257_v29, %v9293_v62  ;;  %v3168_v50 = vsel %vm9299_vm5, %v3148_v32, %v9237_v25  ;;  %vm3091_vm8 = vcmp.ne.s32.totalorder %v9290_v44, 0 }
 0x103   :  { %v9277_v26 = vadd.f32 %v7575_v39, %v479_v47  ;;  %v1134_v0 = vadd.f32 %v7581_v13, %v9156_v54  ;;  %v3170_v54 = vsel %vm9270_vm15, %v3150_v7, %v9218_v34  ;;  %v2941_v45 = vmul.u32 10, %v2940_v38  ;;  %v9315_v34 = vld [vmem:[%s11869_s6 + $0x8] sm:$0xf] }
 0x104   :  { %v9284_v8 = vpop.f32.mrf.mxu0  ;;  %v9286_v31 = vpop.f32.mrf.mxu1  ;;  %vm9317_vm6 = vcmp.lt.s32.totalorder %v3170_v54, 8  ;;  %vm3111_vm9 = vcmp.lt.s32.totalorder %v9290_v44, 0  ;;  %7942 = vmatprep.subr.msk.bf16.mxu1 %vm3809_vm11, %v9315_v34  ;;  %v2918_v30 = vshrl.u32 %v9264_v57, 3  ;;  %v9338_v25 = vadd.s32 64, %v9154_v19 }
 0x105   :  { %vm3089_vm13 = vcmp.ne.s32.totalorder %v9304_v51, 0  ;;  %v9344_v32 = vsub.s32 %v9210_v22, %v2941_v45  ;;  %vm3109_vm14 = vcmp.lt.s32.totalorder %v9304_v51, 0  ;;  %v2951_v54 = vshrl.u32 %v9282_v58, 3  ;;  %vm9371_vm2 = vmand %vm3111_vm9, %vm3091_vm8 }
 0x106   :  { %v7584_v5 = vpop.f32.mrf.mxu1  ;;  %v7602_v18 = vpop.f32.mrf.mxu0  ;;  %v407_v47 = vadd.f32 %v9148_v10, %v9122_v37  ;;  %v3151_v22 = vadd.s32 10, %v9290_v44  ;;  %v2929_v45 = vshrl.u32 %v9294_v15, 3  ;;  %vm9363_vm15 = vcmp.lt.s32.totalorder %v3168_v50, 8  ;;  %vm9389_vm3 = vmand %vm3109_vm14, %vm3089_vm13 }
 0x107   :  { %v1137_v60 = vadd.f32 %v7584_v5, %v9163_v52  ;;  %v9310_v42 = vadd.f32 %v7602_v18, %v1133_v21  ;;  %v9331_v52 = vld [vmem:[%s11869_s6 + $0xc] sm:$0xf]  ;;  %v3149_v37 = vadd.s32 10, %v9304_v51  ;;  %vm3094_vm5 = vcmp.ne.s32.totalorder %v9344_v32, 0 }
 0x108   :  { %v1068_v7 = vpop.f32.mrf.mxu1  ;;  %v1290_v39 = vpop.f32.mrf.mxu0  ;;  %7943 = vmatprep.subr.msk.bf16.mxu0 %vm3809_vm11, %v9331_v52  ;;  %v2952_v13 = vmul.u32 10, %v2951_v54 }
 0x109   :  { %v1135_v21 = vadd.f32 %v1068_v7, %v9165_v9  ;;  %v9334_v63 = vadd.f32 %v1290_v39, %v1131_v11  ;;  %v9347_v62 = vmul.u32.u64.low 3435973837, %v9307_v40  ;;  %v9348_v9 = vmul.u32.u64.high 3435973837, %v9307_v40, %v9347_v62 }
 0x10a   :  { %v7585_v38 = vpop.f32.mrf.mxu1  ;;  %v7603_v55 = vpop.f32.mrf.mxu0  ;;  %v11877_v39 = vmov 0.0   ;;  %v9395_v62 = vadd.s32 88, %v9154_v19  ;;  %v3169_v54 = vsel %vm9389_vm3, %v3149_v37, %v9304_v51  ;;  %v3154_v7 = vadd.s32 10, %v9344_v32 }
 0x10b   :  { %11942 = vst [vmem:[#allocation6_spill] sm:$0xff] %v9334_v63  ;;  %v1138_v11 = vadd.f32 %v7585_v38, %v9170_v4  ;;  %v9351_v57 = vadd.f32 %v7603_v55, %v1134_v0  ;;  %v9377_v10 = vmul.u32.u64.low 3435973837, %v9338_v25  ;;  %v9378_v0 = vmul.u32.u64.high 3435973837, %v9338_v25, %v9377_v10 }
 0x10c   :  { %v9357_v5 = vpop.f32.mrf.mxu1  ;;  %v9359_v18 = vpop.f32.mrf.mxu0  ;;  %v9383_v50 = vsel %vm9317_vm6, 1.0, %v11877_v39  ;;  %v2919_v55 = vmul.u32 10, %v2918_v30  ;;  %vm3114_vm6 = vcmp.lt.s32.totalorder %v9344_v32, 0  ;;  %v3171_v30 = vsel %vm9371_vm2, %v3151_v22, %v9290_v44 }
 0x10d   :  { %11943 = vst [vmem:[#allocation7_spill] sm:$0xff] %v9351_v57  ;;  %11948 = vst [vmem:[#allocation8_spill] sm:$0xff] %v9383_v50  ;;  %v9404_v50 = vsel %vm9363_vm15, 1.0, %v11951_v43  ;;  %v2930_v57 = vmul.u32 10, %v2929_v45  ;;  %v9410_v63 = vadd.s32 72, %v9154_v19  ;;  %v9437_v22 = vadd.f32 %v9158_v59, %v9135_v36 }
 0x10e   :  { %v7588_v58 = vpop.f32.mrf.mxu1  ;;  %v7606_v15 = vpop.f32.mrf.mxu0  ;;  %11952 = vst [vmem:[#allocation9_spill] sm:$0xff] %v9404_v50  ;;  %vm9423_vm8 = vmand %vm3114_vm6, %vm3094_vm5  ;;  %v9443_v37 = vsub.s32 %v9245_v28, %v2952_v13  ;;  %vm9459_vm9 = vcmp.lt.s32.totalorder %v3171_v30, 8  ;;  %vm9463_vm13 = vcmp.lt.s32.totalorder %v3169_v54, 8 }
 0x10f   :  { %v1141_v10 = vadd.f32 %v7588_v58, %v9181_v46  ;;  %v9398_v48 = vadd.f32 %v7606_v15, %v1137_v60  ;;  %v9453_v38 = vsub.s32 %v9257_v29, %v2930_v57 }
 0x110   :  { %v1084_v39 = vpop.f32.mrf.mxu1  ;;  %v1306_v20 = vpop.f32.mrf.mxu0  ;;  %v9456_v36 = vmul.u32.u64.low 3435973837, %v9410_v63  ;;  %v9457_v59 = vmul.u32.u64.high 3435973837, %v9410_v63, %v9456_v36  ;;  %vm3095_vm2 = vcmp.ne.s32.totalorder %v9443_v37, 0  ;;  %vm3115_vm3 = vcmp.lt.s32.totalorder %v9443_v37, 0 }
 0x111   :  { %v1139_v46 = vadd.f32 %v1084_v39, %v9187_v6  ;;  %v9413_v60 = vadd.f32 %v1306_v20, %v1135_v21  ;;  %v9428_v6 = vsub.s32 %v9233_v23, %v2919_v55  ;;  %v2984_v20 = vshrl.u32 %v9348_v9, 3  ;;  %vm9509_vm0 = vmand %vm3115_vm3, %vm3095_vm2 }
 0x112   :  { %v7589_v58 = vpop.f32.mrf.mxu1  ;;  %v7607_v15 = vpop.f32.mrf.mxu0  ;;  %v9432_v21 = vmul.u32.u64.low 3435973837, %v9395_v62  ;;  %v9433_v51 = vmul.u32.u64.high 3435973837, %v9395_v62, %v9432_v21  ;;  %v9446_v23 = vadd.f32 %v9160_v33, %v407_v47  ;;  %v3174_v33 = vsel %vm9423_vm8, %v3154_v7, %v9344_v32 }
 0x113   :  { %v1142_v45 = vadd.f32 %v7589_v58, %v9194_v12  ;;  %v9440_v4 = vadd.f32 %v7607_v15, %v1138_v11  ;;  %v2962_v11 = vshrl.u32 %v9378_v0, 3  ;;  %vm3092_vm14 = vcmp.ne.s32.totalorder %v9428_v6, 0 }
 0x114   :  { %v9448_v39 = vpop.f32.mrf.mxu1  ;;  %v9450_v9 = vpop.f32.mrf.mxu0  ;;  %vm3112_vm15 = vcmp.lt.s32.totalorder %v9428_v6, 0  ;;  %v3152_v47 = vadd.s32 10, %v9428_v6  ;;  %v2985_v55 = vmul.u32 10, %v2984_v20  ;;  %vm9479_vm5 = vcmp.lt.s32.totalorder %v3174_v33, 8 }
 0x115   :  { %vm3093_vm6 = vcmp.ne.s32.totalorder %v9453_v38, 0  ;;  %vm3113_vm8 = vcmp.lt.s32.totalorder %v9453_v38, 0  ;;  %v9486_v7 = vadd.s32 112, %v9154_v19  ;;  %vm9495_vm1 = vmand %vm3112_vm15, %vm3092_vm14  ;;  %v3155_v15 = vadd.s32 10, %v9443_v37 }
 0x116   :  { %v7592_v29 = vpop.f32.mrf.mxu1  ;;  %v7610_v57 = vpop.f32.mrf.mxu0  ;;  %v2963_v44 = vmul.u32 10, %v2962_v11  ;;  %v9503_v36 = vsel %vm9459_vm9, 1.0, %v11951_v43  ;;  %v9515_v33 = vsub.s32 %v9307_v40, %v2985_v55  ;;  %v2995_v11 = vshrl.u32 %v9433_v51, 3  ;;  %vm9530_vm9 = vmand %vm3113_vm8, %vm3093_vm6 }
 0x117   :  { %v1145_v13 = vadd.f32 %v7592_v29, %v9213_v53  ;;  %v9475_v30 = vadd.f32 %v7610_v57, %v1141_v10  ;;  %11965 = vst [vmem:[#allocation12_spill] sm:$0xff] %v9503_v36  ;;  %v9524_v57 = vsel %vm9463_vm13, 1.0, %v11951_v43  ;;  %v9535_v40 = vadd.s32 96, %v9154_v19 }
 0x118   :  { %v1100_v32 = vpop.f32.mrf.mxu1  ;;  %v1322_v54 = vpop.f32.mrf.mxu0  ;;  %11969 = vst [vmem:[#allocation14_spill] sm:$0xff] %v9524_v57  ;;  %v3172_v28 = vsel %vm9495_vm1, %v3152_v47, %v9428_v6  ;;  %v2973_v55 = vshrl.u32 %v9457_v59, 3  ;;  %v9560_v0 = vmul.u32.u64.low 3435973837, %v9486_v7  ;;  %v9561_v57 = vmul.u32.u64.high 3435973837, %v9486_v7, %v9560_v0 }
 0x119   :  { %11959 = vst [vmem:[#allocation10_spill] sm:$0xff] %v9475_v30  ;;  %v1143_v53 = vadd.f32 %v1100_v32, %v9216_v56  ;;  %v9489_v10 = vadd.f32 %v1322_v54, %v1139_v46  ;;  %v3153_v46 = vadd.s32 10, %v9453_v38  ;;  %v9551_v54 = vadd.s32 120, %v9154_v19 }
 0x11a   :  { %v7593_v20 = vpop.f32.mrf.mxu1  ;;  %v7611_v21 = vpop.f32.mrf.mxu0  ;;  %vm3098_vm1 = vcmp.ne.s32.totalorder %v9515_v33, 0  ;;  %vm3118_vm13 = vcmp.lt.s32.totalorder %v9515_v33, 0  ;;  %v2996_v59 = vmul.u32 10, %v2995_v11  ;;  %v2974_v56 = vmul.u32 10, %v2973_v55 }
 0x11b   :  { %11962 = vst [vmem:[#allocation11_spill] sm:$0xff] %v9489_v10  ;;  %v1146_v29 = vadd.f32 %v7593_v20, %v9225_v61  ;;  %v9519_v12 = vadd.f32 %v7611_v21, %v1142_v45  ;;  %v9544_v45 = vsel %vm9479_vm5, 1.0, %v11951_v43  ;;  %v3175_v20 = vsel %vm9509_vm0, %v3155_v15, %v9443_v37  ;;  %vm9607_vm5 = vmand %vm3118_vm13, %vm3098_vm1 }
 0x11c   :  { %v9537_v51 = vpop.f32.mrf.mxu1  ;;  %v9539_v61 = vpop.f32.mrf.mxu0  ;;  %11972 = vst [vmem:[#allocation15_spill] sm:$0xff] %v9544_v45  ;;  %v9557_v21 = vsub.s32 %v9338_v25, %v2963_v44  ;;  %v3173_v6 = vsel %vm9530_vm9, %v3153_v46, %v9453_v38  ;;  %v9572_v25 = vmul.u32.u64.low 3435973837, %v9535_v40  ;;  %v9573_v58 = vmul.u32.u64.high 3435973837, %v9535_v40, %v9572_v25 }
 0x11d   :  { %11968 = vst [vmem:[#allocation13_spill] sm:$0xff] %v9519_v12  ;;  %v9576_v0 = vmul.u32.u64.low 3435973837, %v9551_v54  ;;  %v9577_v32 = vmul.u32.u64.high 3435973837, %v9551_v54, %v9576_v0  ;;  %v9580_v38 = vadd.s32 104, %v9154_v19  ;;  %vm9587_vm15 = vcmp.lt.s32.totalorder %v3172_v28, 8 }
 0x11e   :  { %v7596_v45 = vpop.f32.mrf.mxu1  ;;  %v7614_v36 = vpop.f32.mrf.mxu0  ;;  %vm3096_vm0 = vcmp.ne.s32.totalorder %v9557_v21, 0  ;;  %vm3116_vm14 = vcmp.lt.s32.totalorder %v9557_v21, 0  ;;  %vm9591_vm2 = vcmp.lt.s32.totalorder %v3175_v20, 8  ;;  %vm9595_vm3 = vcmp.lt.s32.totalorder %v3173_v6, 8 }
 0x11f   :  { %v1149_v37 = vadd.f32 %v7596_v45, %v9240_v1  ;;  %v9569_v47 = vadd.f32 %v7614_v36, %v1145_v13  ;;  %v3156_v20 = vadd.s32 10, %v9557_v21  ;;  %v9613_v6 = vsub.s32 %v9395_v62, %v2996_v59  ;;  %vm9625_vm6 = vmand %vm3116_vm14, %vm3096_vm0 }
 0x120   :  { %v1116_v15 = vpop.f32.mrf.mxu1  ;;  %v1338_v44 = vpop.f32.mrf.mxu0  ;;  %v9630_v0 = vsub.s32 %v9410_v63, %v2974_v56  ;;  %v9633_v62 = vmul.u32.u64.low 3435973837, %v9580_v38  ;;  %v9634_v59 = vmul.u32.u64.high 3435973837, %v9580_v38, %v9633_v62  ;;  %v3039_v55 = vshrl.u32 %v9577_v32, 3 }
 0x121   :  { %11973 = vst [vmem:[#allocation16_spill] sm:$0xff] %v9569_v47  ;;  %v1147_v46 = vadd.f32 %v1116_v15, %v9259_v16  ;;  %v9583_v11 = vadd.f32 %v1338_v44, %v1143_v53  ;;  %v3158_v16 = vadd.s32 10, %v9515_v33  ;;  %v439_v15 = vadd.f32 %v9172_v24, %v9146_v35 }
 0x122   :  { %v7597_v1 = vpop.f32.mrf.mxu1  ;;  %v7615_v13 = vpop.f32.mrf.mxu0  ;;  %v9638_v35 = vadd.f32 %v9174_v17, %v9437_v22  ;;  %v455_v24 = vadd.f32 %v9196_v27, %v9124_v41  ;;  %v9656_v17 = vsel %vm9591_vm2, 1.0, %v11951_v43  ;;  %v9661_v41 = vsel %vm9595_vm3, 1.0, %v11951_v43 }
 0x123   :  { %11974 = vst [vmem:[#allocation17_spill] sm:$0xff] %v9583_v11  ;;  %v1150_v53 = vadd.f32 %v7597_v1, %v9277_v26  ;;  %v9601_v25 = vadd.f32 %v7615_v13, %v1146_v29  ;;  %v9645_v1 = vsel %vm9587_vm15, 1.0, %v11951_v43  ;;  %v3028_v13 = vshrl.u32 %v9561_v57, 3  ;;  %11987 = vst [vmem:[#allocation20_spill] sm:$0xff] %v9656_v17 }
 0x124   :  { %v9617_v44 = vpop.f32.mrf.mxu1  ;;  %v9619_v26 = vpop.f32.mrf.mxu0  ;;  %11986 = vst [vmem:[#allocation19_spill] sm:$0xff] %v9645_v1  ;;  %v9649_v63 = vadd.f32 %v9198_v2, %v439_v15  ;;  %11988 = vst [vmem:[#allocation21_spill] sm:$0xff] %v9661_v41  ;;  %v3178_v27 = vsel %vm9607_vm5, %v3158_v16, %v9515_v33  ;;  %v3176_v2 = vsel %vm9625_vm6, %v3156_v20, %v9557_v21  ;;  %vm3099_vm8 = vcmp.ne.s32.totalorder %v9613_v6, 0 }
 0x125   :  { %11981 = vst [vmem:[#allocation18_spill] sm:$0xff] %v9601_v25  ;;  %v3006_v57 = vshrl.u32 %v9573_v58, 3  ;;  %vm3119_vm9 = vcmp.lt.s32.totalorder %v9613_v6, 0  ;;  %vm3097_vm1 = vcmp.ne.s32.totalorder %v9630_v0, 0  ;;  %v9679_v33 = vadd.s32 144, %v9154_v19 }
 0x126   :  { %v7618_v56 = vpop.f32.mrf.mxu0  ;;  %v9651_v50 = vpop.f32.mrf.mxu1  ;;  %vm3117_vm13 = vcmp.lt.s32.totalorder %v9630_v0, 0  ;;  %v3029_v21 = vmul.u32 10, %v3028_v13  ;;  %v9685_v16 = vadd.s32 128, %v9154_v19  ;;  %v9689_v58 = vadd.f32 %v9227_v14, %v9142_v49  ;;  %vm9708_vm15 = vmand %vm3119_vm9, %vm3099_vm8 }
 0x127   :  { %v9666_v22 = vadd.f32 %v7618_v56, %v1149_v37  ;;  %vm9693_vm0 = vcmp.lt.s32.totalorder %v3178_v27, 8  ;;  %vm9697_vm14 = vcmp.lt.s32.totalorder %v3176_v2, 8  ;;  %v3159_v15 = vadd.s32 10, %v9613_v6  ;;  %vm9724_vm2 = vmand %vm3117_vm13, %vm3097_vm1 }
 0x128   :  { %v1354_v36 = vpop.f32.mrf.mxu0  ;;  %v9673_v45 = vpop.f32.mrf.mxu1  ;;  %v3157_v14 = vadd.s32 10, %v9630_v0  ;;  %v3007_v62 = vmul.u32 10, %v3006_v57  ;;  %v9714_v13 = vadd.s32 152, %v9154_v19  ;;  %v3040_v2 = vmul.u32 10, %v3039_v55 }
 0x129   :  { %11989 = vst [vmem:[#allocation22_spill] sm:$0xff] %v9666_v22  ;;  %v9681_v37 = vadd.f32 %v1354_v36, %v1147_v46  ;;  %v3017_v36 = vshrl.u32 %v9634_v59, 3  ;;  %v9734_v41 = vsub.s32 %v9486_v7, %v3029_v21  ;;  %v9758_v7 = vsel %vm9697_vm14, 1.0, %v11951_v43 }
 0x12a   :  { %v7619_v28 = vpop.f32.mrf.mxu0  ;;  %v9691_v20 = vpop.f32.mrf.mxu1  ;;  %v9737_v17 = vmul.u32.u64.low 3435973837, %v9685_v16  ;;  %v9738_v1 = vmul.u32.u64.high 3435973837, %v9685_v16, %v9737_v17  ;;  %12001 = vst [vmem:[#allocation26_spill] sm:$0xff] %v9758_v7  ;;  %v9772_v21 = vmul.u32.u64.low 3435973837, %v9714_v13  ;;  %v9773_v32 = vmul.u32.u64.high 3435973837, %v9714_v13, %v9772_v21 }
 0x12b   :  { %11990 = vst [vmem:[#allocation23_spill] sm:$0xff] %v9681_v37  ;;  %v9702_v29 = vadd.f32 %v7619_v28, %v1150_v53  ;;  %v9730_v57 = vmul.u32.u64.low 3435973837, %v9679_v33  ;;  %v9731_v28 = vmul.u32.u64.high 3435973837, %v9679_v33, %v9730_v57  ;;  %v9744_v37 = vadd.f32 %v9229_v3, %v455_v24  ;;  %v9769_v17 = vld [vmem:[#allocation2] sm:$0x8] }
 0x12c   :  { %v9716_v56 = vpop.f32.mrf.mxu0  ;;  %v9718_v27 = vpop.f32.mrf.mxu1  ;;  %v9753_v57 = vsel %vm9693_vm0, 1.0, %v11951_v43  ;;  %v3177_v3 = vsel %vm9724_vm2, %v3157_v14, %v9630_v0  ;;  %v9767_v24 = vsub.s32 %v9535_v40, %v3007_v62  ;;  %vm3681_vm3 = vcmask 1040384   ;;  %v3415_v0 = vld [vmem:[#allocation2] sm:$0xc] }
 0x12d   :  { %11995 = vst [vmem:[#allocation24_spill] sm:$0xff] %v9702_v29  ;;  %v9741_v29 = vadd.s32 136, %v9154_v19  ;;  %12000 = vst [vmem:[#allocation25_spill] sm:$0xff] %v9753_v57  ;;  %v3179_v19 = vsel %vm9708_vm15, %v3159_v15, %v9613_v6  ;;  %vm3682_vm5 = vcmask 1044484   ;;  %v9780_v6 = vsub.s32 %v9551_v54, %v3040_v2 }
 0x12e   :  { %v9746_v55 = vpop.f32.mrf.mxu1  ;;  %v9748_v59 = vpop.f32.mrf.mxu0  ;;  %v3018_v15 = vmul.u32 10, %v3017_v36  ;;  %vm3102_vm6 = vcmp.ne.s32.totalorder %v9734_v41, 0  ;;  %vm3122_vm8 = vcmp.lt.s32.totalorder %v9734_v41, 0  ;;  %vm9792_vm9 = vcmp.lt.s32.totalorder %v3179_v19, 8  ;;  %v9801_v36 = vld [vmem:[#allocation2 + $0x4] sm:$0xf]  ;;  %vm9808_vm14 = vmor %vm3681_vm3, %vm3682_vm5 }
 0x12f   :  { %v9785_v40 = vmul.u32.u64.low 3435973837, %v9741_v29  ;;  %v9786_v49 = vmul.u32.u64.high 3435973837, %v9741_v29, %v9785_v40  ;;  %vm9796_vm1 = vcmp.lt.s32.totalorder %v3177_v3, 8  ;;  %v3162_v2 = vadd.s32 10, %v9734_v41  ;;  %vm9820_vm15 = vmand %vm3122_vm8, %vm3102_vm6 }
 0x130   :  { %v9775_v46 = vpop.f32.mrf.mxu1  ;;  %v9777_v7 = vpop.f32.mrf.mxu0  ;;  %v7063_v21 = vrot.slane %v9769_v17, 11  ;;  %vm3100_vm13 = vcmp.ne.s32.totalorder %v9767_v24, 0  ;;  %vm3120_vm0 = vcmp.lt.s32.totalorder %v9767_v24, 0  ;;  %v3441_v3 = vshrl.u32 %v3415_v0, 16 }
 0x131   :  { %v3444_v40 = vshll.u32 %v3415_v0, 16  ;;  %vm3103_vm2 = vcmp.ne.s32.totalorder %v9780_v6, 0  ;;  %vm3123_vm3 = vcmp.lt.s32.totalorder %v9780_v6, 0  ;;  %v9827_v11 = vsub.s32 %v9580_v38, %v3018_v15  ;;  %vm9857_vm5 = vmand %vm3120_vm0, %vm3100_vm13 }
 0x132   :  { %v9788_v14 = vpop.f32.mrf.mxu1  ;;  %v9790_v62 = vpop.f32.mrf.mxu0  ;;  %v3072_v0 = vshrl.u32 %v9731_v28, 3  ;;  %v9833_v47 = vsel %vm9792_vm9, 1.0, %v11951_v43  ;;  %v3160_v12 = vadd.s32 10, %v9767_v24  ;;  %v3686_v10 = vrot.slane %v9801_v36, 7  ;;  %vm9873_vm6 = vmand %vm3123_vm3, %vm3103_vm2 }
 0x133   :  { %12011 = vst [vmem:[#allocation28_spill] sm:$0xff] %v9833_v47  ;;  %v3050_v30 = vshrl.u32 %v9738_v1, 3  ;;  %v1132_v38 = vadd.f32 %v9286_v31, %v9446_v23  ;;  %v9851_v53 = vsel %vm9796_vm1, 1.0, %v11951_v43  ;;  %v3182_v31 = vsel %vm9820_vm15, %v3162_v2, %v9734_v41 }
 0x134   :  { %v9812_v57 = vpop.f32.mrf.mxu1  ;;  %v9814_v22 = vpop.f32.mrf.mxu0  ;;  %12013 = vst [vmem:[#allocation30_spill] sm:$0xff] %v9851_v53  ;;  %v9867_v23 = vsel %vm9808_vm14, %v7063_v21, %v3686_v10  ;;  %v3443_v54 = vrot.slane %v3441_v3, 6  ;;  %v3083_v53 = vshrl.u32 %v9773_v32, 3  ;;  %vm3101_vm8 = vcmp.ne.s32.totalorder %v9827_v11, 0 }
 0x135   :  { %12008 = vst [vmem:[#allocation27_spill] sm:$0xff] %v9814_v22  ;;  %v9840_v22 = vadd.f32 %v9284_v8, %v9689_v58  ;;  %v3163_v8 = vadd.s32 10, %v9780_v6  ;;  %12016 = vst [vmem:[#allocation31_spill] sm:$0xff] %v9867_v23  ;;  %vm3121_vm9 = vcmp.lt.s32.totalorder %v9827_v11, 0  ;;  %v3446_v25 = vrot.slane %v3444_v40, 7 }
 0x136   :  { %v9844_v15 = vpop.f32.mrf.mxu1  ;;  %v9846_v28 = vpop.f32.mrf.mxu0  ;;  %v3073_v41 = vmul.u32 10, %v3072_v0  ;;  %v3180_v2 = vsel %vm9857_vm5, %v3160_v12, %v9767_v24  ;;  %v9887_v21 = vrot.slane %v3686_v10, 4  ;;  %v3051_v23 = vmul.u32 10, %v3050_v30  ;;  %vm9910_vm13 = vmand %vm3121_vm9, %vm3101_vm8  ;;  %v3658_v12 = vld [vmem:[#allocation2 + $0x38] sm:$0x8] }
 0x137   :  { %12012 = vst [vmem:[#allocation29_spill] sm:$0xff] %v9846_v28  ;;  %v3061_v3 = vshrl.u32 %v9786_v49, 3  ;;  %v3161_v40 = vadd.s32 10, %v9827_v11  ;;  %v11886_v0 = vshrl.u32 %v9801_v36, 16  ;;  %v11885_v1 = vshll.u32 %v9801_v36, 16 }
 0x138   :  { %v9878_v47 = vpop.f32.mrf.mxu1  ;;  %v9880_v28 = vpop.f32.mrf.mxu0  ;;  %12021 = vst [vmem:[#allocation34_spill] sm:$0xff] %v9887_v21  ;;  %v1136_v10 = vadd.f32 %v9357_v5, %v9638_v35  ;;  %vm9902_vm1 = vcmp.lt.s32.totalorder %v3182_v31, 8  ;;  %vm3437_vm0 = vsmask.f32 1280  ;;  %v3084_v24 = vmul.u32 10, %v3083_v53 }
 0x139   :  { %12019 = vst [vmem:[#allocation32_spill] sm:$0xff] %v9878_v47  ;;  %12020 = vst [vmem:[#allocation33_spill] sm:$0xff] %v9880_v28  ;;  %v3183_v28 = vsel %vm9873_vm6, %v3163_v8, %v9780_v6  ;;  %v9915_v6 = vadd.f32 %v9359_v18, %v1132_v38  ;;  %vm3200_vm15 = vcmp.lt.s32.totalorder %v3180_v2, 8  ;;  %v3447_v35 = vor.u32 %v3446_v25, %v3443_v54 }
 0x13a   :  { %v9890_v32 = vpop.f32.mrf.mxu1  ;;  %v9892_v47 = vpop.f32.mrf.mxu0  ;;  %v9922_v8 = vsub.s32 %v9679_v33, %v3073_v41  ;;  %vm9924_vm2 = vcmp.lt.s32.totalorder %v3183_v28, 8  ;;  %vm3438_vm3 = vsmask.f32 5392  ;;  %v9929_v58 = vsub.s32 %v9685_v16, %v3051_v23 }
 0x13b   :  { %v3062_v53 = vmul.u32 10, %v3061_v3  ;;  %v9938_v54 = vsel %vm9902_vm1, 1.0, %v11951_v43  ;;  %v3181_v33 = vsel %vm9910_vm13, %v3161_v40, %v9827_v11  ;;  %v3452_v28 = vrot.slane %v11886_v0, 6  ;;  %v3426_v3 = vld [vmem:[#allocation2 + $0x38] sm:$0xc]  ;;  %vm9979_vm9 = vmor %vm3437_vm0, %vm3438_vm3 }
 0x13c   :  { %v9917_v49 = vpop.f32.mrf.mxu1  ;;  %v9919_v5 = vpop.f32.mrf.mxu0  ;;  %12028 = vst [vmem:[#allocation35_spill] sm:$0xff] %v9938_v54  ;;  %v3455_v16 = vrot.slane %v11885_v1, 7  ;;  %v1140_v23 = vadd.f32 %v9448_v39, %v9649_v63  ;;  %v9950_v25 = vadd.f32 %v9450_v9, %v1136_v10  ;;  %v9953_v41 = vsel %vm3200_vm15, 1.0, %v11951_v43  ;;  %v9971_v9 = vld [vmem:[#allocation2 + $0x3c] sm:$0xf] }
 0x13d   :  { %12029 = vst [vmem:[#allocation36_spill] sm:$0xff] %v9953_v41  ;;  %v9956_v2 = vsub.s32 %v9714_v13, %v3084_v24  ;;  %v9965_v30 = vsel %vm9924_vm2, 1.0, %v11951_v43  ;;  %v9967_v39 = vrot.slane %v3447_v35, 4  ;;  %vm3106_vm5 = vcmp.ne.s32.totalorder %v9922_v8, 0 }
 0x13e   :  { %v9931_v18 = vpop.f32.mrf.mxu1  ;;  %v9933_v38 = vpop.f32.mrf.mxu0  ;;  %12031 = vst [vmem:[#allocation38_spill] sm:$0xff] %v9965_v30  ;;  %vm3126_vm6 = vcmp.lt.s32.totalorder %v9922_v8, 0  ;;  %vm9973_vm8 = vcmp.lt.s32.totalorder %v3181_v33, 8  ;;  %vm3104_vm1 = vcmp.ne.s32.totalorder %v9929_v58, 0  ;;  %vm3124_vm13 = vcmp.lt.s32.totalorder %v9929_v58, 0 }
 0x13f   :  { %12032 = vst [vmem:[#allocation39_spill] sm:$0xff] %v9967_v39  ;;  %v9986_v10 = vsub.s32 %v9741_v29, %v3062_v53  ;;  %v9992_v31 = vor.u32 %v3455_v16, %v3452_v28  ;;  %v9996_v33 = vsel %vm3809_vm11, %v9315_v34, 0  ;;  %v3549_v1 = vshrl.u32 %v3426_v3, 16  ;;  %vm10000_vm0 = vmand %vm3126_vm6, %vm3106_vm5 }
 0x140   :  { %v9958_v11 = vpop.f32.mrf.mxu1  ;;  %v9960_v40 = vpop.f32.mrf.mxu0  ;;  %12040 = vst [vmem:[#allocation43_spill] sm:$0xff] %v9996_v33  ;;  %v3552_v0 = vshll.u32 %v3426_v3, 16  ;;  %v3166_v29 = vadd.s32 10, %v9922_v8  ;;  %v3164_v53 = vadd.s32 10, %v9929_v58  ;;  %vm3107_vm15 = vcmp.ne.s32.totalorder %v9956_v2, 0  ;;  %vm10025_vm3 = vmand %vm3124_vm13, %vm3104_vm1 }
 0x141   :  { %12030 = vst [vmem:[#allocation37_spill] sm:$0xff] %v9960_v40  ;;  %12039 = vst [vmem:[#allocation42_spill] sm:$0xff] %v9992_v31  ;;  %vm3127_vm2 = vcmp.lt.s32.totalorder %v9956_v2, 0  ;;  %v10015_v16 = vsel %vm9973_vm8, 1.0, %v11951_v43  ;;  %v7064_v41 = vrot.slane %v3658_v12, 11  ;;  %v3717_v54 = vrot.slane %v9971_v9, 7 }
 0x142   :  { %v9988_v24 = vpop.f32.mrf.mxu1  ;;  %v9990_v35 = vpop.f32.mrf.mxu0  ;;  %12045 = vst [vmem:[#allocation46_spill] sm:$0xff] %v10015_v16  ;;  %v3167_v63 = vadd.s32 10, %v9956_v2  ;;  %vm3105_vm5 = vcmp.ne.s32.totalorder %v9986_v10, 0  ;;  %vm3125_vm6 = vcmp.lt.s32.totalorder %v9986_v10, 0  ;;  %v4157_v16 = vshrl.u32 %v3658_v12, 16  ;;  %vm10042_vm8 = vmand %vm3127_vm2, %vm3107_vm15 }
 0x143   :  { %12037 = vst [vmem:[#allocation40_spill] sm:$0xff] %v9988_v24  ;;  %12038 = vst [vmem:[#allocation41_spill] sm:$0xff] %v9990_v35  ;;  %v3554_v35 = vrot.slane %v3552_v0, 7  ;;  %v3558_v24 = vshrl.u32 %v9971_v9, 16  ;;  %v3186_v12 = vsel %vm10000_vm0, %v3166_v29, %v9922_v8  ;;  %v3184_v39 = vsel %vm10025_vm3, %v3164_v53, %v9929_v58 }
 0x144   :  { %v10008_v28 = vpop.f32.mrf.mxu1  ;;  %v10010_v34 = vpop.f32.mrf.mxu0  ;;  %v3165_v31 = vadd.s32 10, %v9986_v10  ;;  %v10066_v8 = vsel %vm3809_vm11, %v9331_v52, 0  ;;  %vm10072_vm1 = vmand %vm3125_vm6, %vm3105_vm5  ;;  %v3187_v52 = vsel %vm10042_vm8, %v3167_v63, %v9956_v2  ;;  %v1799_v33 = vadd.f32 %v9651_v50, %v9310_v42 }
 0x145   :  { %12043 = vst [vmem:[#allocation44_spill] sm:$0xff] %v10008_v28  ;;  %12044 = vst [vmem:[#allocation45_spill] sm:$0xff] %v10010_v34  ;;  %v3551_v28 = vrot.slane %v3549_v1, 6  ;;  %v10058_v1 = vadd.f32 %v9539_v61, %v1140_v23  ;;  %v1148_v61 = vadd.f32 %v9617_v44, %v9840_v22  ;;  %v10087_v23 = vrot.slane %v4157_v16, 11 }
 0x146   :  { %v10033_v21 = vpop.f32.mrf.mxu1  ;;  %v10035_v3 = vpop.f32.mrf.mxu0  ;;  %vm3206_vm13 = vcmp.lt.s32.totalorder %v3186_v12, 8  ;;  %vm3204_vm0 = vcmp.lt.s32.totalorder %v3184_v39, 8  ;;  %v3185_v44 = vsel %vm10072_vm1, %v3165_v31, %v9986_v10  ;;  %vm3207_vm15 = vcmp.lt.s32.totalorder %v3187_v52, 8  ;;  %v4403_v10 = vld [vmem:[#allocation2 + $0x4] sm:$0x8] }
 0x147   :  { %12048 = vst [vmem:[#allocation47_spill] sm:$0xff] %v10033_v21  ;;  %12049 = vst [vmem:[#allocation48_spill] sm:$0xff] %v10035_v3  ;;  %v11890_v3 = vshll.u32 %v9971_v9, 16  ;;  %v1144_v21 = vadd.f32 %v9537_v51, %v9744_v37  ;;  %v10078_v51 = vsel %vm9808_vm14, %v7064_v41, %v3717_v54  ;;  %v10085_v37 = vrot.slane %v3717_v54, 4 }
 0x148   :  { %v10060_v0 = vpop.f32.mrf.mxu1  ;;  %v10062_v40 = vpop.f32.mrf.mxu0  ;;  %12054 = vst [vmem:[#allocation49_spill] sm:$0xff] %v10078_v51  ;;  %v3555_v22 = vor.u32 %v3554_v35, %v3551_v28  ;;  %v3560_v54 = vrot.slane %v3558_v24, 6  ;;  %v4108_v50 = vshrl.u32 %v9769_v17, 16  ;;  %v12057_v39 = vshrl.u32 %v9801_v36, 16  ;;  %v12059_v35 = vld [vmem:[#allocation7_spill] sm:$0xff] }
 0x149   :  { %12055 = vst [vmem:[#allocation50_spill] sm:$0xff] %v10085_v37  ;;  %v10090_v30 = vadd.f32 %v9619_v26, %v1144_v21  ;;  %v3563_v2 = vrot.slane %v11890_v3, 7  ;;  %v12056_v26 = vld [vmem:[#allocation6_spill] sm:$0xff]  ;;  %v1800_v31 = vadd.f32 %v9691_v20, %v12059_v35  ;;  %v10117_v28 = vadd.f32 %v9716_v56, %v1148_v61  ;;  %v12074_v3 = vld [vmem:[#allocation13_spill] sm:$0xff] }
 0x14a   :  { %v10094_v29 = vpop.f32.mrf.mxu1  ;;  %v10096_v41 = vpop.f32.mrf.mxu0  ;;  %v1797_v21 = vadd.f32 %v9673_v45, %v12056_v26  ;;  %v10112_v34 = vrot.slane %v12057_v39, 7  ;;  %v10120_v45 = vsel %vm3206_vm13, 1.0, %v11951_v43  ;;  %v10123_v16 = vsel %vm3204_vm0, 1.0, %v11951_v43 }
 0x14b   :  { %v1798_v17 = vadd.f32 %v9718_v27, %v9915_v6  ;;  %vm3205_vm2 = vcmp.lt.s32.totalorder %v3185_v44, 8  ;;  %vm4104_vm3 = vsmask.f32 256  ;;  %vm4105_vm5 = vsmask.f32 4368 }
 0x14c   :  { %v10105_v53 = vpop.f32.mrf.mxu1  ;;  %v10107_v42 = vpop.f32.mrf.mxu0  ;;  %12058 = vst [vmem:[#allocation6_spill] sm:$0xff] %v10112_v34  ;;  %v10130_v20 = vsel %vm3207_vm15, 1.0, %v11951_v43  ;;  %v10132_v56 = vrot.slane %v3555_v22, 4  ;;  %v10134_v58 = vor.u32 %v3563_v2, %v3560_v54  ;;  %v4426_v61 = vshrl.u32 %v4403_v10, 16  ;;  %vm10158_vm6 = vmor %vm4104_vm3, %vm4105_vm5 }
 0x14d   :  { %v1803_v52 = vadd.f32 %v9746_v55, %v9398_v48  ;;  %v2106_v26 = vadd.f32 %v9748_v59, %v1799_v33  ;;  %v10141_v39 = vrot.slane %v4108_v50, 11  ;;  %v12063_v44 = vshll.u32 %v9801_v36, 16 }
 0x14e   :  { %v10127_v63 = vpop.f32.mrf.mxu0  ;;  %v7668_v12 = vpop.f32.mrf.mxu1  ;;  %12060 = vst [vmem:[#allocation7_spill] sm:$0xff] %v10132_v56  ;;  %12061 = vst [vmem:[#allocation51_spill] sm:$0xff] %v10134_v58  ;;  %v1801_v22 = vadd.f32 %v9775_v46, %v9413_v60  ;;  %v2104_v54 = vadd.f32 %v9777_v7, %v1797_v21  ;;  %v10152_v2 = vsel %vm3205_vm2, 1.0, %v11951_v43  ;;  %v10154_v48 = vrot.slane %v3558_v24, 7  ;;  %v12067_v24 = vld [vmem:[#allocation27_spill] sm:$0xff]  ;;  %v12073_v21 = vld [vmem:[#allocation33_spill] sm:$0xff] }
 0x14f   :  { %12062 = vst [vmem:[#allocation52_spill] sm:$0xff] %v10141_v39  ;;  %v10146_v35 = vor.u32 %v10112_v34, %v12063_v44  ;;  %v1804_v59 = vadd.f32 %v9788_v14, %v9440_v4  ;;  %v2107_v36 = vadd.f32 %v9790_v62, %v1800_v31  ;;  %v1802_v60 = vadd.f32 %v9812_v57, %v9950_v25  ;;  %v10181_v57 = vld [vmem:[%s11869_s6 + $0x10] sm:$0xf]  ;;  %v12069_v14 = vld [vmem:[#allocation10_spill] sm:$0xff]  ;;  %v12070_v25 = vld [vmem:[#allocation29_spill] sm:$0xff] }
 0x150   :  { %v10139_v27 = vpop.f32.mrf.mxu0  ;;  %v2329_v6 = vpop.f32.mrf.mxu1  ;;  %v2105_v33 = vadd.f32 %v12067_v24, %v1798_v17  ;;  %v10176_v4 = vrot.slane %v4426_v61, 11  ;;  %v1807_v62 = vadd.f32 %v9844_v15, %v12069_v14  ;;  %v2110_v10 = vadd.f32 %v12070_v25, %v1803_v52  ;;  %v12071_v31 = vld [vmem:[#allocation11_spill] sm:$0xff]  ;;  %v12072_v17 = vld [vmem:[#allocation32_spill] sm:$0xff]  ;;  %v12081_v39 = vld [vmem:[#allocation41_spill] sm:$0xff] }
 0x151   :  { %12064 = vst [vmem:[#allocation53_spill] sm:$0xff] %v10146_v35  ;;  %v1805_v44 = vadd.f32 %v12072_v17, %v12071_v31  ;;  %v2108_v50 = vadd.f32 %v12073_v21, %v1801_v22  ;;  %v10198_v15 = vadd.f32 %v9892_v47, %v1804_v59  ;;  %v2410_v52 = vadd.f32 %v7668_v12, %v2106_v26  ;;  %v10203_v14 = vld [vmem:[%s11869_s6 + $0x14] sm:$0xf]  ;;  %v12075_v17 = vld [vmem:[#allocation16_spill] sm:$0xff]  ;;  %v10215_v47 = vld [vmem:[%s11870_s5] ss:$0 sm:$0xff] }
 0x152   :  { %v10167_v7 = vpop.f32.mrf.mxu0  ;;  %v7669_v43 = vpop.f32.mrf.mxu1  ;;  %12068 = vst [vmem:[#allocation27_spill] sm:$0xff] %v10176_v4  ;;  %v1808_v4 = vadd.f32 %v9890_v32, %v12074_v3  ;;  %v1806_v25 = vadd.f32 %v9917_v49, %v10058_v1  ;;  %v10208_v31 = vadd.f32 %v9919_v5, %v1802_v60  ;;  %v1811_v22 = vadd.f32 %v9931_v18, %v12075_v17  ;;  %v12077_v49 = vld [vmem:[#allocation17_spill] sm:$0xff]  ;;  %v4414_v18 = vld [vmem:[#allocation2 + $0x3c] sm:$0x8]  ;;  %v12079_v17 = vld [vmem:[#allocation18_spill] sm:$0xff] }
 0x153   :  { %v10219_v3 = vsel %vm3809_vm11, %v10181_v57, 0  ;;  %v10222_v12 = vadd.f32 %v9933_v38, %v1807_v62  ;;  %v1809_v5 = vadd.f32 %v9958_v11, %v12077_v49  ;;  %v2408_v1 = vadd.f32 %v2329_v6, %v2104_v54  ;;  %v12078_v59 = vld [vmem:[#allocation37_spill] sm:$0xff]  ;;  %v12080_v61 = vld [vmem:[#allocation40_spill] sm:$0xff]  ;;  %v12086_v49 = vld [vmem:[#allocation47_spill] sm:$0xff] }
 0x154   :  { %v10188_v24 = vpop.f32.mrf.mxu0  ;;  %v2332_v46 = vpop.f32.mrf.mxu1  ;;  %12076 = vst [vmem:[#allocation10_spill] sm:$0xff] %v10219_v3  ;;  %v10227_v60 = vadd.f32 %v12078_v59, %v1805_v44  ;;  %v1812_v35 = vadd.f32 %v12080_v61, %v12079_v17  ;;  %v10232_v34 = vadd.f32 %v12081_v39, %v1808_v4  ;;  %v10236_v38 = vsel %vm3809_vm11, %v10203_v14, 0  ;;  %v12083_v11 = vld [vmem:[#allocation44_spill] sm:$0xff]  ;;  %v12085_v61 = vld [vmem:[#allocation22_spill] sm:$0xff] }
 0x155   :  { %12082 = vst [vmem:[#allocation29_spill] sm:$0xff] %v10236_v38  ;;  %v1810_v6 = vadd.f32 %v12083_v11, %v10090_v30  ;;  %v2411_v54 = vadd.f32 %v7669_v43, %v2107_v36  ;;  %v1815_v39 = vadd.f32 %v12086_v49, %v12085_v61  ;;  %v12087_v4 = vld [vmem:[#allocation48_spill] sm:$0xff]  ;;  %v4520_v51 = vshrl.u32 %v4414_v18, 16  ;;  %v12088_v38 = vld [vmem:[#allocation23_spill] sm:$0xff] }
 0x156   :  { %v7672_v21 = vpop.f32.mrf.mxu1  ;;  %v7690_v32 = vpop.f32.mrf.mxu0  ;;  %v10247_v59 = vadd.f32 %v12087_v4, %v1811_v22  ;;  %v1813_v37 = vadd.f32 %v10060_v0, %v12088_v38  ;;  %v2409_v22 = vadd.f32 %v2332_v46, %v2105_v33  ;;  %v12090_v18 = vld [vmem:[#allocation8_spill] sm:$0xff]  ;;  %v12091_v38 = vshll.u32 %v9971_v9, 16 }
 0x157   :  { %v2829_v26 = vadd.f32 %v7690_v32, %v2410_v52  ;;  %v12084_v52 = vld [vmem:[#allocation45_spill] sm:$0xff]  ;;  %v10274_v9 = vadd.f32 %v10107_v42, %v1810_v6  ;;  %vm3778_vm8 = vcmask 64512  }
 0x158   :  { %v2345_v56 = vpop.f32.mrf.mxu1  ;;  %v2748_v3 = vpop.f32.mrf.mxu0  ;;  %v10242_v32 = vadd.f32 %v12084_v52, %v1806_v25  ;;  %v12089_v25 = vld [vmem:[#allocation24_spill] sm:$0xff] }
 0x159   :  { %v3257_v62 = vadd.f32 %v10215_v47, %v2829_v26  ;;  %v2827_v44 = vadd.f32 %v2748_v3, %v2408_v1  ;;  %v10253_v3 = vadd.f32 %v10062_v40, %v1809_v5  ;;  %v1816_v1 = vadd.f32 %v10094_v29, %v12089_v25 }
 0x15a   :  { %v7673_v17 = vpop.f32.mrf.mxu1  ;;  %v7691_v58 = vpop.f32.mrf.mxu0  ;;  %v10258_v26 = vadd.f32 %v10096_v41, %v1812_v35  ;;  %v2414_v40 = vadd.f32 %v7672_v21, %v2110_v10  ;;  %v10268_v35 = vrot.slane %v4520_v51, 11  ;;  %v2412_v33 = vadd.f32 %v2345_v56, %v2108_v50  ;;  %v12093_v56 = vld [vmem:[#allocation12_spill] sm:$0xff] }
 0x15b   :  { %v3277_v30 = vmax.f32 %v3257_v62, 0.0  ;;  %v3255_v36 = vadd.f32 %v10215_v47, %v2827_v44  ;;  %v2830_v43 = vadd.f32 %v7691_v58, %v2411_v54  ;;  %v10265_v58 = vor.u32 %v10154_v48, %v12091_v38  ;;  %v12092_v62 = vld [vmem:[#allocation9_spill] sm:$0xff] }
 0x15c   :  { %v2348_v11 = vpop.f32.mrf.mxu1  ;;  %v2751_v52 = vpop.f32.mrf.mxu0  ;;  %v2415_v25 = vadd.f32 %v7673_v17, %v10198_v15 }
 0x15d   :  { %v3297_v61 = vmul.f32 %v12090_v18, %v3277_v30  ;;  %v3275_v49 = vmax.f32 %v3255_v36, 0.0  ;;  %v3258_v0 = vadd.f32 %v10215_v47, %v2830_v43  ;;  %v2828_v5 = vadd.f32 %v2751_v52, %v2409_v22 }
 0x15e   :  { %v7676_v54 = vpop.f32.mrf.mxu1  ;;  %v7694_v29 = vpop.f32.mrf.mxu0  ;;  %v1814_v30 = vadd.f32 %v10105_v53, %v10117_v28  ;;  %v10281_v52 = vadd.f32 %v10127_v63, %v1815_v39  ;;  %v2413_v15 = vadd.f32 %v2348_v11, %v10208_v31  ;;  %v10292_v63 = vadd.f32 %v10139_v27, %v1813_v37  ;;  %v12095_v27 = vld [vmem:[#allocation15_spill] sm:$0xff] }
 0x15f   :  { %v7283_v46 = vpack.c.bf16 %v3297_v61, %v3297_v61  ;;  %v3295_v44 = vmul.f32 %v12092_v62, %v3275_v49  ;;  %v3278_v4 = vmax.f32 %v3258_v0, 0.0  ;;  %v3256_v10 = vadd.f32 %v10215_v47, %v2828_v5  ;;  %v12094_v0 = vld [vmem:[#allocation14_spill] sm:$0xff] }
 0x160   :  { %v2833_v21 = vadd.f32 %v7694_v29, %v2414_v40  ;;  %v2361_v36 = vpop.f32.mrf.mxu1  ;;  %v2764_v43 = vpop.f32.mrf.mxu0  ;;  %v10295_v39 = vadd.f32 %v10167_v7, %v1816_v1  ;;  %v2418_v37 = vadd.f32 %v7676_v54, %v10222_v12 }
 0x161   :  { %3397 = vst.msk [vmem:[#allocation2 + $0x10] sm:$0xf] %vm36_vm12, %v7283_v46  ;;  %v7281_v51 = vpack.c.bf16 %v3295_v44, %v3295_v44  ;;  %v3298_v50 = vmul.f32 %v12093_v56, %v3278_v4  ;;  %v2831_v22 = vadd.f32 %v2764_v43, %v2412_v33  ;;  %v3276_v53 = vmax.f32 %v3256_v10, 0.0  ;;  %v12096_v10 = vld [vmem:[#allocation19_spill] sm:$0xff] }
 0x162   :  { %v3261_v42 = vadd.f32 %v10215_v47, %v2833_v21  ;;  %v7677_v28 = vpop.f32.mrf.mxu1  ;;  %v7695_v6 = vpop.f32.mrf.mxu0  ;;  %v10299_v46 = vadd.f32 %v10188_v24, %v1814_v30  ;;  %v2416_v1 = vadd.f32 %v2361_v36, %v10227_v60 }
 0x163   :  { %3395 = vst.msk [vmem:[#allocation2 + $0x8] sm:$0xf] %vm36_vm12, %v7281_v51  ;;  %v7284_v61 = vpack.c.bf16 %v3298_v50, %v3298_v50  ;;  %v3259_v17 = vadd.f32 %v10215_v47, %v2831_v22  ;;  %v2834_v49 = vadd.f32 %v7695_v6, %v2415_v25  ;;  %v3296_v38 = vmul.f32 %v12094_v0, %v3276_v53  ;;  %v12097_v22 = vld [vmem:[#allocation20_spill] sm:$0xff]  ;;  %v12098_v0 = vld [vmem:[#allocation21_spill] sm:$0xff] }
 0x164   :  { %v3281_v40 = vmax.f32 %v3261_v42, 0.0  ;;  %v2364_v5 = vpop.f32.mrf.mxu1  ;;  %v2767_v29 = vpop.f32.mrf.mxu0  ;;  %v2419_v24 = vadd.f32 %v7677_v28, %v10232_v34 }
 0x165   :  { %3398 = vst.msk [vmem:[#allocation2 + $0x14] sm:$0xf] %vm36_vm12, %v7284_v61  ;;  %v3279_v31 = vmax.f32 %v3259_v17, 0.0  ;;  %v3262_v11 = vadd.f32 %v10215_v47, %v2834_v49  ;;  %v2832_v33 = vadd.f32 %v2767_v29, %v2413_v15  ;;  %v7282_v62 = vpack.c.bf16 %v3296_v38, %v3296_v38 }
 0x166   :  { %v3301_v7 = vmul.f32 %v12095_v27, %v3281_v40  ;;  %v7680_v44 = vpop.f32.mrf.mxu1  ;;  %v7698_v4 = vpop.f32.mrf.mxu0  ;;  %v2417_v25 = vadd.f32 %v2364_v5, %v10242_v32 }
 0x167   :  { %v3299_v21 = vmul.f32 %v12096_v10, %v3279_v31  ;;  %v3282_v30 = vmax.f32 %v3262_v11, 0.0  ;;  %v3260_v43 = vadd.f32 %v10215_v47, %v2832_v33  ;;  %3396 = vst.msk [vmem:[#allocation2 + $0xc] sm:$0xf] %vm36_vm12, %v7282_v62  ;;  %v2422_v12 = vadd.f32 %v7680_v44, %v10247_v59  ;;  %v12099_v44 = vld [vmem:[#allocation25_spill] sm:$0xff] }
 0x168   :  { %v7287_v51 = vpack.c.bf16 %v3301_v7, %v3301_v7  ;;  %v2837_v54 = vadd.f32 %v7698_v4, %v2418_v37  ;;  %v2377_v56 = vpop.f32.mrf.mxu1  ;;  %v2780_v60 = vpop.f32.mrf.mxu0  ;;  %v10312_v36 = vld [vmem:[#allocation2 + $0x10] sm:$0xf] }
 0x169   :  { %v7285_v50 = vpack.c.bf16 %v3299_v21, %v3299_v21  ;;  %v3302_v53 = vmul.f32 %v12097_v22, %v3282_v30  ;;  %v3280_v42 = vmax.f32 %v3260_v43, 0.0  ;;  %v2420_v34 = vadd.f32 %v2377_v56, %v10253_v3  ;;  %v12100_v21 = vld [vmem:[#allocation34_spill] sm:$0xff]  ;;  %v12101_v56 = vld [vmem:[#allocation31_spill] sm:$0xff] }
 0x16a   :  { %3401 = vst.msk [vmem:[#allocation2 + $0x20] sm:$0xf] %vm36_vm12, %v7287_v51  ;;  %v3265_v28 = vadd.f32 %v10215_v47, %v2837_v54  ;;  %v2835_v6 = vadd.f32 %v2780_v60, %v2416_v1  ;;  %v7681_v61 = vpop.f32.mrf.mxu1  ;;  %v7699_v32 = vpop.f32.mrf.mxu0  ;;  %v10318_v15 = vld [vmem:[#allocation2 + $0x8] sm:$0xf]  ;;  %v3695_v59 = vrot.slane %v10312_v36, 7  ;;  %v3480_v17 = vshrl.u32 %v10312_v36, 16 }
 0x16b   :  { %3399 = vst.msk [vmem:[#allocation2 + $0x18] sm:$0xf] %vm36_vm12, %v7285_v50  ;;  %v7288_v49 = vpack.c.bf16 %v3302_v53, %v3302_v53  ;;  %v3300_v38 = vmul.f32 %v12098_v0, %v3280_v42  ;;  %v2423_v3 = vadd.f32 %v7681_v61, %v10258_v26  ;;  %v2838_v40 = vadd.f32 %v7699_v32, %v2419_v24  ;;  %v12102_v50 = vld [vmem:[#allocation26_spill] sm:$0xff] }
 0x16c   :  { %v3285_v5 = vmax.f32 %v3265_v28, 0.0  ;;  %v3263_v29 = vadd.f32 %v10215_v47, %v2835_v6  ;;  %v2380_v31 = vpop.f32.mrf.mxu1  ;;  %v2783_v11 = vpop.f32.mrf.mxu0  ;;  %v3689_v33 = vrot.slane %v10318_v15, 7  ;;  %v3460_v62 = vshrl.u32 %v10318_v15, 16  ;;  %v12103_v6 = vld [vmem:[#allocation28_spill] sm:$0xff] }
 0x16d   :  { %3402 = vst.msk [vmem:[#allocation2 + $0x24] sm:$0xf] %vm36_vm12, %v7288_v49  ;;  %v7286_v37 = vpack.c.bf16 %v3300_v38, %v3300_v38  ;;  %v3266_v27 = vadd.f32 %v10215_v47, %v2838_v40  ;;  %v2421_v7 = vadd.f32 %v2380_v31, %v10274_v9  ;;  %v2836_v1 = vadd.f32 %v2783_v11, %v2417_v25  ;;  %v10354_v31 = vld [vmem:[#allocation2 + $0x14] sm:$0xf] }
 0x16e   :  { %v3305_v26 = vmul.f32 %v12099_v44, %v3285_v5  ;;  %v3283_v4 = vmax.f32 %v3263_v29, 0.0  ;;  %v7684_v10 = vpop.f32.mrf.mxu1  ;;  %v3690_v24 = vsel %vm9808_vm14, %v12100_v21, %v3689_v33  ;;  %v3691_v30 = vrot.slane %v3689_v33, 4  ;;  %v10341_v25 = vld [vmem:[#allocation2 + $0xc] sm:$0xf]  ;;  %v7702_v49 = vpop.f32.mrf.mxu0 }
 0x16f   :  { %3400 = vst.msk [vmem:[#allocation2 + $0x1c] sm:$0xf] %vm36_vm12, %v7286_v37  ;;  %v3286_v43 = vmax.f32 %v3266_v27, 0.0  ;;  %v3264_v51 = vadd.f32 %v10215_v47, %v2836_v1  ;;  %v10338_v54 = vadd.f32 %v7684_v10, %v10281_v52  ;;  %v7066_v9 = vcombine.low %v12101_v56, %v3690_v24  ;;  %v12104_v37 = vld [vmem:[#allocation30_spill] sm:$0xff] }
 0x170   :  { %v7291_v60 = vpack.c.bf16 %v3305_v26, %v3305_v26  ;;  %v3303_v22 = vmul.f32 %v12102_v50, %v3283_v4  ;;  %v2393_v53 = vpop.f32.mrf.mxu1  ;;  %v3462_v42 = vrot.slane %v3460_v62, 6  ;;  %v3463_v28 = vshll.u32 %v10318_v15, 16  ;;  %v2796_v1 = vpop.f32.mrf.mxu0  ;;  %v12120_v15 = vld [vmem:[#allocation6_spill] sm:$0xff] }
 0x171   :  { %v3306_v61 = vmul.f32 %v12103_v6, %v3286_v43  ;;  %v3284_v32 = vmax.f32 %v3264_v51, 0.0  ;;  %v2424_v52 = vadd.f32 %v2393_v53, %v10292_v63  ;;  %7710 = vmatprep.mubr.msk.bf16.mxu1 %vm3778_vm8, %v7066_v9  ;;  %v3692_v0 = vrot.slane %v10341_v25, 7 }
 0x172   :  { %3405 = vst.msk [vmem:[#allocation2 + $0x40] sm:$0xf] %vm36_vm12, %v7291_v60  ;;  %v7289_v38 = vpack.c.bf16 %v3303_v22, %v3303_v22  ;;  %v2841_v40 = vadd.f32 %v7702_v49, %v2422_v12  ;;  %v7685_v5 = vpop.f32.mrf.mxu1  ;;  %v3465_v29 = vrot.slane %v3463_v28, 7  ;;  %v10356_v11 = vld [vmem:[#allocation2 + $0x18] sm:$0xf]  ;;  %v3697_v33 = vrot.slane %v3695_v59, 4  ;;  %v7703_v51 = vpop.f32.mrf.mxu0 }
 0x173   :  { %v7292_v63 = vpack.c.bf16 %v3306_v61, %v3306_v61  ;;  %v3304_v27 = vmul.f32 %v12104_v37, %v3284_v32  ;;  %v2427_v44 = vadd.f32 %v7685_v5, %v10295_v39  ;;  %v3693_v12 = vsel %vm9808_vm14, %v3691_v30, %v3692_v0  ;;  %v12105_v22 = vld [vmem:[#allocation42_spill] sm:$0xff] }
 0x174   :  { %3403 = vst.msk [vmem:[#allocation2 + $0x28] sm:$0xf] %vm36_vm12, %v7289_v38  ;;  %v3269_v26 = vadd.f32 %v10215_v47, %v2841_v40  ;;  %v2839_v4 = vadd.f32 %v2796_v1, %v2420_v34  ;;  %v2396_v10 = vpop.f32.mrf.mxu1  ;;  %v3466_v21 = vor.u32 %v3465_v29, %v3462_v42  ;;  %v3694_v24 = vrot.slane %v3692_v0, 4  ;;  %v2799_v42 = vpop.f32.mrf.mxu0  ;;  %v12109_v0 = vld [vmem:[#allocation35_spill] sm:$0xff] }
 0x175   :  { %3406 = vst.msk [vmem:[#allocation2 + $0x44] sm:$0xf] %vm36_vm12, %v7292_v63  ;;  %v7290_v43 = vpack.c.bf16 %v3304_v27, %v3304_v27  ;;  %v2425_v56 = vadd.f32 %v2396_v10, %v10299_v46  ;;  %v3698_v9 = vrot.slane %v10354_v31, 7  ;;  %v3701_v39 = vrot.slane %v10356_v11, 7  ;;  %v12107_v46 = vld [vmem:[#allocation39_spill] sm:$0xff] }
 0x176   :  { %v3289_v60 = vmax.f32 %v3269_v26, 0.0  ;;  %v3267_v30 = vadd.f32 %v10215_v47, %v2839_v4  ;;  %v2842_v50 = vadd.f32 %v7703_v51, %v2423_v3  ;;  %v12106_v53 = vrot.slane %v12105_v22, 4  ;;  %v7706_v63 = vpop.f32.mrf.mxu0 }
 0x177   :  { %3404 = vst.msk [vmem:[#allocation2 + $0x2c] sm:$0xf] %vm36_vm12, %v7290_v43  ;;  %v3468_v6 = vrot.slane %v3466_v21, 4  ;;  %v12108_v61 = vsel %vm9979_vm9, %v12107_v46, %v12105_v22  ;;  %v3696_v3 = vsel %vm9808_vm14, %v3694_v24, %v3695_v59  ;;  %v3699_v49 = vsel %vm9808_vm14, %v3697_v33, %v3698_v9  ;;  %v12110_v59 = vld [vmem:[#allocation36_spill] sm:$0xff]  ;;  %v12112_v22 = vld [vmem:[#allocation43_spill] sm:$0xff] }
 0x178   :  { %v3467_v34 = vsel %vm9979_vm9, %v12106_v53, %v3466_v21  ;;  %v3309_v38 = vmul.f32 %v12109_v0, %v3289_v60  ;;  %v3287_v40 = vmax.f32 %v3267_v30, 0.0  ;;  %v3270_v5 = vadd.f32 %v10215_v47, %v2842_v50  ;;  %v12111_v60 = vld [vmem:[#allocation38_spill] sm:$0xff] }
 0x179   :  { %v7086_v32 = vcombine.low %v12108_v61, %v3467_v34  ;;  %v2840_v29 = vadd.f32 %v2799_v42, %v2421_v7  ;;  %v7067_v37 = vcombine.low %v3693_v12, %v3696_v3  ;;  %v3700_v27 = vrot.slane %v3698_v9, 4  ;;  %v2812_v7 = vpop.f32.mrf.mxu0  ;;  %v12113_v3 = vld [vmem:[#allocation46_spill] sm:$0xff] }
 0x17a   :  { %v3470_v1 = vshrl.u32 %v10341_v25, 16  ;;  %v3473_v26 = vshll.u32 %v10341_v25, 16  ;;  %v7295_v4 = vpack.c.bf16 %v3309_v38, %v3309_v38  ;;  %v3307_v10 = vmul.f32 %v12110_v59, %v3287_v40 }
 0x17b   :  { %7732 = vmatprep.mubr.msk.bf16.mxu0 %vm3778_vm8, %v7086_v32  ;;  %v3290_v21 = vmax.f32 %v3270_v5, 0.0  ;;  %v3268_v33 = vadd.f32 %v10215_v47, %v2840_v29  ;;  %v2845_v24 = vadd.f32 %v7706_v63, %v10338_v54  ;;  %7711 = vmatmul.mubr.msk.bf16.vlgmr.msra.gmra.mxu1 %vm3778_vm8, %v7067_v37  ;;  %v3702_v12 = vsel %vm9808_vm14, %v3700_v27, %v3701_v39  ;;  %v7707_v42 = vpop.f32.mrf.mxu0 }
 0x17c   :  { %v3472_v43 = vrot.slane %v3470_v1, 6  ;;  %v3475_v51 = vrot.slane %v3473_v26, 7  ;;  %3409 = vst.msk [vmem:[#allocation2 + $0x50] sm:$0xf] %vm36_vm12, %v7295_v4  ;;  %v7293_v9 = vpack.c.bf16 %v3307_v10, %v3307_v10  ;;  %v2843_v50 = vadd.f32 %v2812_v7, %v2424_v52  ;;  %7753 = vmatpush3.bf16.msra.mxu1 %v12112_v22 }
 0x17d   :  { %v3310_v30 = vmul.f32 %v12111_v60, %v3290_v21  ;;  %v3288_v54 = vmax.f32 %v3268_v33, 0.0  ;;  %v3273_v53 = vadd.f32 %v10215_v47, %v2845_v24  ;;  %v7068_v34 = vcombine.low %v3699_v49, %v3702_v12  ;;  %7944 = vmatprep.subr.msk.bf16.mxu1 %vm3809_vm11, %v10181_v57  ;;  %v2815_v63 = vpop.f32.mrf.mxu0 }
 0x17e   :  { %v3476_v46 = vor.u32 %v3475_v51, %v3472_v43  ;;  %v3482_v61 = vrot.slane %v3480_v17, 6  ;;  %3407 = vst.msk [vmem:[#allocation2 + $0x48] sm:$0xf] %vm36_vm12, %v7293_v9  ;;  %v3271_v52 = vadd.f32 %v10215_v47, %v2843_v50  ;;  %v2846_v38 = vadd.f32 %v7707_v42, %v2427_v44 }
 0x17f   :  { %v7296_v32 = vpack.c.bf16 %v3310_v30, %v3310_v30  ;;  %v3308_v0 = vmul.f32 %v12113_v3, %v3288_v54  ;;  %v3293_v40 = vmax.f32 %v3273_v53, 0.0  ;;  %7714 = vmatprep.mubr.msk.bf16.mxu1 %vm3778_vm8, %v7068_v34  ;;  %v3483_v29 = vshll.u32 %v10312_v36, 16  ;;  %v10437_v30 = vld [vmem:[#allocation2 + $0x1c] sm:$0xf]  ;;  %v10445_v34 = vld [vmem:[#allocation2 + $0x24] sm:$0xf] }
 0x180   :  { %v3477_v49 = vsel %vm9979_vm9, %v3468_v6, %v3476_v46  ;;  %v3478_v5 = vrot.slane %v3476_v46, 4  ;;  %v3291_v37 = vmax.f32 %v3271_v52, 0.0  ;;  %v3274_v27 = vadd.f32 %v10215_v47, %v2846_v38 }
 0x181   :  { %3410 = vst.msk [vmem:[#allocation2 + $0x54] sm:$0xf] %vm36_vm12, %v7296_v32  ;;  %v7294_v57 = vpack.c.bf16 %v3308_v0, %v3308_v0  ;;  %v2844_v4 = vadd.f32 %v2815_v63, %v2425_v56  ;;  %v3313_v59 = vmul.f32 %v10120_v45, %v3293_v40  ;;  %v3485_v44 = vrot.slane %v3483_v29, 7 }
 0x182   :  { %v3490_v10 = vshrl.u32 %v10354_v31, 16  ;;  %v3493_v6 = vshll.u32 %v10354_v31, 16  ;;  %v3311_v21 = vmul.f32 %v10123_v16, %v3291_v37  ;;  %v3294_v33 = vmax.f32 %v3274_v27, 0.0 }
 0x183   :  { %3408 = vst.msk [vmem:[#allocation2 + $0x4c] sm:$0xf] %vm36_vm12, %v7294_v57  ;;  %v3272_v24 = vadd.f32 %v10215_v47, %v2844_v4  ;;  %v3500_v7 = vshrl.u32 %v10356_v11, 16  ;;  %v7299_v12 = vpack.c.bf16 %v3313_v59, %v3313_v59  ;;  %v3486_v56 = vor.u32 %v3485_v44, %v3482_v61  ;;  %v10439_v47 = vld [vmem:[#allocation2 + $0x20] sm:$0xf] }
 0x184   :  { %v3492_v45 = vrot.slane %v3490_v10, 6  ;;  %v3495_v43 = vrot.slane %v3493_v6, 7  ;;  %v7297_v51 = vpack.c.bf16 %v3311_v21, %v3311_v21  ;;  %v3314_v9 = vmul.f32 %v10130_v20, %v3294_v33  ;;  %v3425_v20 = vld [vmem:[#allocation2 + $0x28] sm:$0x7] }
 0x185   :  { %v3292_v60 = vmax.f32 %v3272_v24, 0.0  ;;  %v3502_v16 = vrot.slane %v3500_v7, 6  ;;  %3413 = vst.msk [vmem:[#allocation2 + $0x60] sm:$0xf] %vm36_vm12, %v7299_v12  ;;  %v3487_v54 = vsel %vm9979_vm9, %v3478_v5, %v3486_v56  ;;  %v3488_v50 = vrot.slane %v3486_v56, 4 }
 0x186   :  { %v3496_v22 = vor.u32 %v3495_v43, %v3492_v45  ;;  %v3503_v53 = vshll.u32 %v10356_v11, 16  ;;  %3411 = vst.msk [vmem:[#allocation2 + $0x58] sm:$0xf] %vm36_vm12, %v7297_v51  ;;  %v7300_v42 = vpack.c.bf16 %v3314_v9, %v3314_v9  ;;  %v7087_v46 = vcombine.low %v3477_v49, %v3487_v54  ;;  %v10477_v51 = vld [vmem:[#allocation2 + $0x40] sm:$0xf] }
 0x187   :  { %v3312_v61 = vmul.f32 %v10152_v2, %v3292_v60  ;;  %v3703_v32 = vrot.slane %v3701_v39, 4  ;;  %v3704_v38 = vrot.slane %v10437_v30, 7  ;;  %v3707_v49 = vrot.slane %v10439_v47, 7  ;;  %v10482_v54 = vld [vmem:[#allocation2 + $0x44] sm:$0xf] }
 0x188   :  { %v3497_v3 = vsel %vm9979_vm9, %v3488_v50, %v3496_v22  ;;  %v3498_v0 = vrot.slane %v3496_v22, 4  ;;  %v3505_v52 = vrot.slane %v3503_v53, 7  ;;  %3414 = vst.msk [vmem:[#allocation2 + $0x64] sm:$0xf] %vm36_vm12, %v7300_v42  ;;  %7733 = vmatmul.mubr.msk.bf16.vlgmr.msra.gmra.mxu0 %vm3778_vm8, %v7087_v46  ;;  %v3710_v2 = vrot.slane %v10445_v34, 7 }
 0x189   :  { %v7298_v40 = vpack.c.bf16 %v3312_v61, %v3312_v61  ;;  %v3713_v5 = vrot.slane %v3425_v20, 7  ;;  %7775 = vmatpush3.bf16.msra.mxu0 %v10066_v8  ;;  %v3705_v63 = vsel %vm9808_vm14, %v3703_v32, %v3704_v38  ;;  %v3706_v57 = vrot.slane %v3704_v38, 4 }
 0x18a   :  { %v3506_v39 = vor.u32 %v3505_v52, %v3502_v16  ;;  %v3510_v37 = vshrl.u32 %v10437_v30, 16  ;;  %v3709_v27 = vrot.slane %v3707_v49, 4  ;;  %v3712_v4 = vrot.slane %v3710_v2, 4  ;;  %7945 = vmatprep.subr.msk.bf16.mxu0 %vm3809_vm11, %v10203_v14 }
 0x18b   :  { %3412 = vst.msk [vmem:[#allocation2 + $0x5c] sm:$0xf] %vm36_vm12, %v7298_v40  ;;  %v3513_v59 = vshll.u32 %v10437_v30, 16  ;;  %v3520_v44 = vshrl.u32 %v10439_v47, 16  ;;  %v3708_v21 = vsel %vm9808_vm14, %v3706_v57, %v3707_v49  ;;  %v11911_v16 = vshll.u32 %v10439_v47, 16 }
 0x18c   :  { %v3507_v8 = vsel %vm9979_vm9, %v3498_v0, %v3506_v39  ;;  %v3508_v33 = vrot.slane %v3506_v39, 4  ;;  %v3512_v24 = vrot.slane %v3510_v37, 6  ;;  %v7069_v56 = vcombine.low %v3705_v63, %v3708_v21 }
 0x18d   :  { %v7088_v12 = vcombine.low %v3497_v3, %v3507_v8  ;;  %v3711_v45 = vsel %vm9808_vm14, %v3709_v27, %v3710_v2  ;;  %v3714_v43 = vsel %vm9808_vm14, %v3712_v4, %v3713_v5  ;;  %v3515_v14 = vrot.slane %v3513_v59, 7  ;;  %v12114_v27 = vld [vmem:[#allocation50_spill] sm:$0xff] }
 0x18e   :  { %v7070_v9 = vcombine.low %v3711_v45, %v3714_v43  ;;  %v3522_v60 = vrot.slane %v3520_v44, 6  ;;  %7715 = vmatmul.mubr.msk.bf16.gmra.mxu1 %vm3778_vm8, %v7069_v56  ;;  %v10486_v50 = vrot.slane %v3510_v37, 7  ;;  %v10488_v22 = vrot.slane %v3520_v44, 7  ;;  %v10506_v4 = vld [vmem:[#allocation2 + $0x48] sm:$0xf] }
 0x18f   :  { %7736 = vmatprep.mubr.msk.bf16.mxu0 %vm3778_vm8, %v7088_v12  ;;  %v11910_v42 = vshrl.u32 %v10445_v34, 16  ;;  %v11907_v46 = vshll.u32 %v10445_v34, 16  ;;  %v3516_v61 = vor.u32 %v3515_v14, %v3512_v24  ;;  %v3525_v32 = vrot.slane %v11911_v16, 7  ;;  %v12115_v24 = vld [vmem:[#allocation49_spill] sm:$0xff]  ;;  %v12125_v16 = vld [vmem:[#allocation27_spill] sm:$0xff] }
 0x190   :  { %7718 = vmatprep.mubr.msk.bf16.mxu1 %vm3778_vm8, %v7070_v9  ;;  %v3540_v3 = vshrl.u32 %v3425_v20, 16  ;;  %v3543_v0 = vshll.u32 %v3425_v20, 16  ;;  %v3720_v40 = vrot.slane %v10477_v51, 7  ;;  %v3723_v49 = vrot.slane %v10482_v54, 7 }
 0x191   :  { %v3532_v52 = vrot.slane %v11910_v42, 6  ;;  %v3535_v38 = vrot.slane %v11907_v46, 7  ;;  %v3517_v2 = vsel %vm9979_vm9, %v3508_v33, %v3516_v61  ;;  %v3518_v5 = vrot.slane %v3516_v61, 4 }
 0x192   :  { %v3526_v39 = vor.u32 %v3525_v32, %v3522_v60  ;;  %v3542_v63 = vrot.slane %v3540_v3, 6  ;;  %v3545_v37 = vrot.slane %v3543_v0, 7  ;;  %v3721_v20 = vsel %vm9808_vm14, %v12114_v27, %v3720_v40 }
 0x193   :  { %v3536_v57 = vor.u32 %v3535_v38, %v3532_v52  ;;  %v3722_v44 = vrot.slane %v3720_v40, 4  ;;  %v7071_v12 = vcombine.low %v12115_v24, %v3721_v20  ;;  %v3725_v56 = vrot.slane %v3723_v49, 4  ;;  %v10525_v40 = vld [vmem:[#allocation2 + $0x50] sm:$0xf] }
 0x194   :  { %v3527_v8 = vsel %vm9979_vm9, %v3518_v5, %v3526_v39  ;;  %v3528_v21 = vrot.slane %v3526_v39, 4  ;;  %v3546_v43 = vor.u32 %v3545_v37, %v3542_v63  ;;  %v3726_v60 = vrot.slane %v10506_v4, 7  ;;  %v10531_v63 = vld [vmem:[#allocation2 + $0x4c] sm:$0xf] }
 0x195   :  { %v7089_v33 = vcombine.low %v3517_v2, %v3527_v8  ;;  %v3538_v45 = vrot.slane %v3536_v57, 4  ;;  %v3724_v9 = vsel %vm9808_vm14, %v3722_v44, %v3723_v49  ;;  %v3568_v61 = vshrl.u32 %v10477_v51, 16  ;;  %v10541_v8 = vld [vmem:[#allocation2 + $0x58] sm:$0xf] }
 0x196   :  { %v3537_v14 = vsel %vm9979_vm9, %v3528_v21, %v3536_v57  ;;  %v11906_v32 = vshll.u32 %v10477_v51, 16  ;;  %7719 = vmatmul.mubr.msk.bf16.gmra.mxu1 %vm3778_vm8, %v7071_v12  ;;  %v11899_v0 = vshrl.u32 %v10482_v54, 16  ;;  %v11897_v52 = vshll.u32 %v10482_v54, 16  ;;  %v10533_v57 = vld [vmem:[#allocation2 + $0x54] sm:$0xf] }
 0x197   :  { %7737 = vmatmul.mubr.msk.bf16.gmra.mxu0 %vm3778_vm8, %v7089_v33  ;;  %v3547_v3 = vsel %vm9979_vm9, %v3538_v45, %v3546_v43  ;;  %v11898_v38 = vshrl.u32 %v10506_v4, 16  ;;  %v3727_v2 = vsel %vm9808_vm14, %v3725_v56, %v3726_v60  ;;  %v3570_v5 = vrot.slane %v3568_v61, 6 }
 0x198   :  { %v7090_v49 = vcombine.low %v3537_v14, %v3547_v3  ;;  %v3573_v39 = vrot.slane %v11906_v32, 7  ;;  %v7072_v37 = vcombine.low %v3724_v9, %v3727_v2  ;;  %v10535_v27 = vrot.slane %v3568_v61, 7  ;;  %v12116_v14 = vld [vmem:[#allocation51_spill] sm:$0xff] }
 0x199   :  { %v3580_v20 = vrot.slane %v11899_v0, 6  ;;  %v3583_v44 = vrot.slane %v11897_v52, 7  ;;  %v3590_v24 = vrot.slane %v11898_v38, 6  ;;  %v11900_v12 = vshll.u32 %v10506_v4, 16 }
 0x19a   :  { %7740 = vmatprep.mubr.msk.bf16.mxu0 %vm3778_vm8, %v7090_v49  ;;  %v3574_v21 = vor.u32 %v3573_v39, %v3570_v5  ;;  %v3728_v56 = vrot.slane %v3726_v60, 4  ;;  %7722 = vmatprep.mubr.msk.bf16.mxu1 %vm3778_vm8, %v7072_v37  ;;  %v3729_v45 = vrot.slane %v10531_v63, 7  ;;  %v3732_v43 = vrot.slane %v10525_v40, 7  ;;  %v12118_v5 = vld [vmem:[#allocation7_spill] sm:$0xff] }
 0x19b   :  { %v3584_v33 = vor.u32 %v3583_v44, %v3580_v20  ;;  %v3735_v9 = vrot.slane %v10533_v57, 7  ;;  %v12117_v61 = vrot.slane %v12116_v14, 4  ;;  %v3593_v2 = vrot.slane %v11900_v12, 7 }
 0x19c   :  { %v3576_v49 = vrot.slane %v3574_v21, 4  ;;  %v3738_v60 = vrot.slane %v10541_v8, 7  ;;  %v12119_v39 = vsel %vm9979_vm9, %v12118_v5, %v12116_v14  ;;  %v3730_v44 = vsel %vm9808_vm14, %v3728_v56, %v3729_v45 }
 0x19d   :  { %v3575_v3 = vsel %vm9979_vm9, %v12117_v61, %v3574_v21  ;;  %v3586_v20 = vrot.slane %v3584_v33, 4  ;;  %v3731_v52 = vrot.slane %v3729_v45, 4  ;;  %v3594_v21 = vor.u32 %v3593_v2, %v3590_v24 }
 0x19e   :  { %v7091_v37 = vcombine.low %v12119_v39, %v3575_v3  ;;  %v3585_v61 = vsel %vm9979_vm9, %v3576_v49, %v3584_v33  ;;  %v3734_v38 = vrot.slane %v3732_v43, 4  ;;  %v3737_v0 = vrot.slane %v3735_v9, 4 }
 0x19f   :  { %v3733_v12 = vsel %vm9808_vm14, %v3731_v52, %v3732_v43  ;;  %v3598_v18 = vshrl.u32 %v10531_v63, 16  ;;  %v11903_v14 = vshll.u32 %v10531_v63, 16  ;;  %v3608_v3 = vshrl.u32 %v10525_v40, 16 }
 0x1a0   :  { %7741 = vmatmul.mubr.msk.bf16.gmra.mxu0 %vm3778_vm8, %v7091_v37  ;;  %v3595_v56 = vsel %vm9979_vm9, %v3586_v20, %v3594_v21  ;;  %v7073_v45 = vcombine.low %v3730_v44, %v3733_v12  ;;  %v3736_v24 = vsel %vm9808_vm14, %v3734_v38, %v3735_v9  ;;  %v3739_v33 = vsel %vm9808_vm14, %v3737_v0, %v3738_v60  ;;  %v10585_v12 = vld [vmem:[#allocation2 + $0x5c] sm:$0xf] }
 0x1a1   :  { %v7092_v49 = vcombine.low %v3585_v61, %v3595_v56  ;;  %v7074_v2 = vcombine.low %v3736_v24, %v3739_v33  ;;  %v3596_v5 = vrot.slane %v3594_v21, 4  ;;  %v3600_v52 = vrot.slane %v3598_v18, 6  ;;  %v3436_v56 = vld [vmem:[#allocation2 + $0x60] sm:$0x7] }
 0x1a2   :  { %7723 = vmatmul.mubr.msk.bf16.gmra.mxu1 %vm3778_vm8, %v7073_v45  ;;  %v3603_v43 = vrot.slane %v11903_v14, 7  ;;  %v3610_v39 = vrot.slane %v3608_v3, 6  ;;  %v11901_v37 = vshll.u32 %v10525_v40, 16  ;;  %v10583_v20 = vrot.slane %v3598_v18, 7 }
 0x1a3   :  { %7744 = vmatprep.mubr.msk.bf16.mxu0 %vm3778_vm8, %v7092_v49  ;;  %7726 = vmatprep.mubr.msk.bf16.mxu1 %vm3778_vm8, %v7074_v2  ;;  %v10589_v0 = vrot.slane %v3608_v3, 7  ;;  %v11902_v38 = vshrl.u32 %v10533_v57, 16  ;;  %v11904_v9 = vshll.u32 %v10533_v57, 16  ;;  %v11905_v44 = vshrl.u32 %v10541_v8, 16 }
 0x1a4   :  { %v3604_v61 = vor.u32 %v3603_v43, %v3600_v52  ;;  %v3613_v21 = vrot.slane %v11901_v37, 7  ;;  %v11909_v18 = vshll.u32 %v10541_v8, 16  ;;  %v3740_v45 = vrot.slane %v3738_v60, 4 }
 0x1a5   :  { %v3620_v24 = vrot.slane %v11902_v38, 6  ;;  %v3623_v3 = vrot.slane %v11904_v9, 7  ;;  %v3630_v33 = vrot.slane %v11905_v44, 6  ;;  %v3741_v49 = vrot.slane %v10585_v12, 7 }
 0x1a6   :  { %v3605_v2 = vsel %vm9979_vm9, %v3596_v5, %v3604_v61  ;;  %v3606_v52 = vrot.slane %v3604_v61, 4  ;;  %v3614_v43 = vor.u32 %v3613_v21, %v3610_v39  ;;  %v3633_v37 = vrot.slane %v11909_v18, 7 }
 0x1a7   :  { %v3624_v60 = vor.u32 %v3623_v3, %v3620_v24  ;;  %v3742_v38 = vsel %vm9808_vm14, %v3740_v45, %v3741_v49  ;;  %v3743_v14 = vrot.slane %v3741_v49, 4  ;;  %v3744_v41 = vrot.slane %v3436_v56, 7 }
 0x1a8   :  { %v3615_v9 = vsel %vm9979_vm9, %v3606_v52, %v3614_v43  ;;  %v3616_v44 = vrot.slane %v3614_v43, 4  ;;  %v3634_v32 = vor.u32 %v3633_v37, %v3630_v33  ;;  %v10614_v46 = vrot.slane %v3460_v62, 7  ;;  %v10625_v33 = vld [vmem:[#allocation2 + $0x8] sm:$0xf]  ;;  %v12123_v52 = vld [vmem:[#allocation53_spill] sm:$0xff] }
 0x1a9   :  { %v7093_v5 = vcombine.low %v3605_v2, %v3615_v9  ;;  %v3626_v39 = vrot.slane %v3624_v60, 4  ;;  %v3745_v61 = vsel %vm9808_vm14, %v3743_v14, %v3744_v41  ;;  %v3638_v21 = vshrl.u32 %v10585_v12, 16  ;;  %v10631_v9 = vld [vmem:[#allocation2 + $0xc] sm:$0xf]  ;;  %v10638_v2 = vld [vmem:[#allocation2 + $0x10] sm:$0xf] }
 0x1aa   :  { %v3625_v45 = vsel %vm9979_vm9, %v3616_v44, %v3624_v60  ;;  %v7075_v24 = vcombine.low %v3742_v38, %v3745_v61  ;;  %v4117_v3 = vor.u32 %v10614_v46, %v3463_v28  ;;  %v4119_v37 = vrot.slane %v10614_v46, 4  ;;  %v10649_v61 = vld [vmem:[#allocation2 + $0x14] sm:$0xf] }
 0x1ab   :  { %7745 = vmatmul.mubr.msk.bf16.gmra.mxu0 %vm3778_vm8, %v7093_v5  ;;  %v3635_v19 = vsel %vm9979_vm9, %v3626_v39, %v3634_v32  ;;  %v3636_v41 = vrot.slane %v3634_v32, 4  ;;  %v3640_v62 = vrot.slane %v3638_v21, 6  ;;  %v11908_v14 = vshll.u32 %v10585_v12, 16  ;;  %v12122_v32 = vld [vmem:[#allocation52_spill] sm:$0xff] }
 0x1ac   :  { %v7094_v38 = vcombine.low %v3625_v45, %v3635_v19  ;;  %7727 = vmatmul.mubr.msk.bf16.gmra.mxu1 %vm3778_vm8, %v7075_v24  ;;  %v12121_v28 = vrot.slane %v12120_v15, 4  ;;  %v3648_v44 = vshrl.u32 %v3436_v56, 16  ;;  %v3651_v49 = vshll.u32 %v3436_v56, 16 }
 0x1ad   :  { %v12124_v43 = vsel %vm10158_vm6, %v12122_v32, %v12123_v52  ;;  %v3643_v5 = vrot.slane %v11908_v14, 7  ;;  %v10647_v39 = vrot.slane %v3638_v21, 7  ;;  %v4431_v45 = vshrl.u32 %v10625_v33, 16 }
 0x1ae   :  { %v4118_v46 = vsel %vm10158_vm6, %v12121_v28, %v4117_v3  ;;  %7748 = vmatprep.mubr.msk.bf16.mxu0 %vm3778_vm8, %v7094_v38  ;;  %v3650_v56 = vrot.slane %v3648_v44, 6  ;;  %v3653_v24 = vrot.slane %v3651_v49, 7  ;;  %v4434_v3 = vshll.u32 %v10625_v33, 16 }
 0x1af   :  { %v7109_v60 = vcombine.low %v12124_v43, %v4118_v46  ;;  %v4440_v19 = vshrl.u32 %v10631_v9, 16  ;;  %v3644_v15 = vor.u32 %v3643_v5, %v3640_v62  ;;  %v4433_v28 = vrot.slane %v4431_v45, 7 }
 0x1b0   :  { %v4443_v46 = vshll.u32 %v10631_v9, 16  ;;  %v4449_v21 = vshrl.u32 %v10638_v2, 16  ;;  %v3654_v32 = vor.u32 %v3653_v24, %v3650_v56  ;;  %v4452_v43 = vshll.u32 %v10638_v2, 16 }
 0x1b1   :  { %7754 = vmatprep.mubr.msk.bf16.mxu1 %vm3778_vm8, %v7109_v60  ;;  %v4442_v52 = vrot.slane %v4440_v19, 7  ;;  %v4458_v38 = vshrl.u32 %v10649_v61, 16  ;;  %v3645_v44 = vsel %vm9979_vm9, %v3636_v41, %v3644_v15  ;;  %v3646_v49 = vrot.slane %v3644_v15, 4 }
 0x1b2   :  { %v4436_v14 = vor.u32 %v4434_v3, %v4433_v28  ;;  %v4438_v18 = vrot.slane %v4433_v28, 4  ;;  %v4451_v62 = vrot.slane %v4449_v21, 7  ;;  %v4461_v24 = vshll.u32 %v10649_v61, 16 }
 0x1b3   :  { %v4445_v42 = vor.u32 %v4443_v46, %v4442_v52  ;;  %v4447_v60 = vrot.slane %v4442_v52, 4  ;;  %v4460_v5 = vrot.slane %v4458_v38, 7  ;;  %v3655_v45 = vsel %vm9979_vm9, %v3646_v49, %v3654_v32  ;;  %v10672_v46 = vld [vmem:[#allocation2 + $0x18] sm:$0xf] }
 0x1b4   :  { %v4437_v56 = vsel %vm10158_vm6, %v12125_v16, %v4436_v14  ;;  %v4120_v19 = vrot.slane %v3470_v1, 7  ;;  %v7095_v41 = vcombine.low %v3645_v44, %v3655_v45  ;;  %v4454_v15 = vor.u32 %v4452_v43, %v4451_v62 }
 0x1b5   :  { %v4446_v3 = vsel %vm10158_vm6, %v4438_v18, %v4445_v42  ;;  %v4456_v28 = vrot.slane %v4451_v62, 4  ;;  %v4463_v21 = vor.u32 %v4461_v24, %v4460_v5  ;;  %v4124_v1 = vrot.slane %v3480_v17, 7 }
 0x1b6   :  { %v7132_v13 = vcombine.low %v4437_v56, %v4446_v3  ;;  %v4121_v32 = vor.u32 %v4120_v19, %v3473_v26  ;;  %v4123_v52 = vrot.slane %v4120_v19, 4  ;;  %7749 = vmatmul.mubr.msk.bf16.gmra.mxu0 %vm3778_vm8, %v7095_v41  ;;  %v4455_v16 = vsel %vm10158_vm6, %v4447_v60, %v4454_v15  ;;  %v10690_v26 = vld [vmem:[#allocation2 + $0x1c] sm:$0xf]  ;;  %v4102_v3 = vld [vmem:[#allocation2 + $0x28] sm:$0xf] }
 0x1b7   :  { %v4128_v42 = vrot.slane %v3490_v10, 7  ;;  %v4132_v18 = vrot.slane %v3500_v7, 7  ;;  %v4464_v14 = vsel %vm10158_vm6, %v4456_v28, %v4463_v21  ;;  %v4465_v43 = vrot.slane %v4460_v5, 4  ;;  %v10714_v15 = vld [vmem:[%s11869_s6 + $0x18] sm:$0xf] }
 0x1b8   :  { %7776 = vmatprep.mubr.msk.bf16.mxu0 %vm3778_vm8, %v7132_v13  ;;  %v4122_v25 = vsel %vm10158_vm6, %v4119_v37, %v4121_v32  ;;  %v4467_v38 = vshrl.u32 %v10672_v46, 16  ;;  %v7133_v17 = vcombine.low %v4455_v16, %v4464_v14  ;;  %v4125_v10 = vor.u32 %v4124_v1, %v3483_v29  ;;  %v12128_v16 = vld [vmem:[#allocation10_spill] sm:$0xff] }
 0x1b9   :  { %v4127_v44 = vrot.slane %v4124_v1, 4  ;;  %v4129_v7 = vor.u32 %v4128_v42, %v3493_v6  ;;  %v4131_v49 = vrot.slane %v4128_v42, 4  ;;  %v4133_v60 = vor.u32 %v4132_v18, %v3503_v53 }
 0x1ba   :  { %v4135_v62 = vrot.slane %v4132_v18, 4  ;;  %v4469_v45 = vrot.slane %v4467_v38, 7  ;;  %v4126_v37 = vsel %vm10158_vm6, %v4123_v52, %v4125_v10  ;;  %v4470_v56 = vshll.u32 %v10672_v46, 16  ;;  %v10742_v10 = vld [vmem:[#allocation2 + $0x24] sm:$0xf] }
 0x1bb   :  { %v4130_v5 = vsel %vm10158_vm6, %v4127_v44, %v4129_v7  ;;  %v4476_v36 = vshrl.u32 %v10690_v26, 16  ;;  %v7110_v29 = vcombine.low %v4122_v25, %v4126_v37  ;;  %v4134_v31 = vsel %vm10158_vm6, %v4131_v49, %v4133_v60  ;;  %v10744_v44 = vld [vmem:[#allocation2 + $0x28] sm:$0xf]  ;;  %v12130_v49 = vld [vmem:[#allocation29_spill] sm:$0xff] }
 0x1bc   :  { %v4474_v6 = vrot.slane %v4469_v45, 4  ;;  %v4479_v11 = vshll.u32 %v10690_v26, 16  ;;  %v7111_v53 = vcombine.low %v4130_v5, %v4134_v31  ;;  %v4472_v24 = vor.u32 %v4470_v56, %v4469_v45 }
 0x1bd   :  { %v4478_v19 = vrot.slane %v4476_v36, 7  ;;  %v4137_v41 = vor.u32 %v10486_v50, %v3513_v59  ;;  %7755 = vmatmul.mubr.msk.bf16.vlgmr.msra.gmra.mxu1 %vm3778_vm8, %v7110_v29  ;;  %v4139_v28 = vrot.slane %v10486_v50, 4  ;;  %v12126_v21 = vshll.u32 %v10439_v47, 16  ;;  %v10724_v59 = vld [vmem:[#allocation2 + $0x20] sm:$0xf] }
 0x1be   :  { %v4143_v32 = vrot.slane %v10488_v22, 4  ;;  %v12127_v30 = vshrl.u32 %v10445_v34, 16  ;;  %7758 = vmatprep.mubr.msk.bf16.mxu1 %vm3778_vm8, %v7111_v53  ;;  %7797 = vmatpush3.bf16.msra.mxu1 %v12128_v16  ;;  %v4473_v1 = vsel %vm10158_vm6, %v4465_v43, %v4472_v24  ;;  %v12129_v14 = vshll.u32 %v10445_v34, 16  ;;  %v10752_v34 = vld [vmem:[#allocation2 + $0x2c] sm:$0xf] }
 0x1bf   :  { %v4141_v13 = vor.u32 %v10488_v22, %v12126_v21  ;;  %v4481_v42 = vor.u32 %v4479_v11, %v4478_v19  ;;  %v4483_v50 = vrot.slane %v4478_v19, 4  ;;  %v4138_v47 = vsel %vm10158_vm6, %v4135_v62, %v4137_v41  ;;  %v10735_v22 = vld [vmem:[%s11869_s6 + $0x1c] sm:$0xf]  ;;  %7777 = vmatmul.mubr.msk.bf16.vlgmr.msra.gmra.mxu0 %vm3778_vm8, %v7133_v17  ;;  %7946 = vmatprep.subr.msk.bf16.mxu1 %vm3809_vm11, %v10714_v15 }
 0x1c0   :  { %v4144_v52 = vrot.slane %v12127_v30, 7  ;;  %v4149_v43 = vshrl.u32 %v4102_v3, 16  ;;  %7819 = vmatpush3.bf16.msra.mxu0 %v12130_v49  ;;  %v4152_v60 = vshll.u32 %v4102_v3, 16  ;;  %v4485_v62 = vshrl.u32 %v10724_v59, 16 }
 0x1c1   :  { %v4142_v18 = vsel %vm10158_vm6, %v4139_v28, %v4141_v13  ;;  %v4482_v7 = vsel %vm10158_vm6, %v4474_v6, %v4481_v42  ;;  %v4488_v56 = vshll.u32 %v10724_v59, 16  ;;  %7947 = vmatprep.subr.msk.bf16.mxu0 %vm3809_vm11, %v10735_v22  ;;  %v4494_v29 = vshrl.u32 %v10742_v10, 16 }
 0x1c2   :  { %v4145_v25 = vor.u32 %v4144_v52, %v12129_v14  ;;  %v4147_v38 = vrot.slane %v4144_v52, 4  ;;  %v7112_v17 = vcombine.low %v4138_v47, %v4142_v18  ;;  %v7134_v45 = vcombine.low %v4473_v1, %v4482_v7  ;;  %v10775_v14 = vld [vmem:[#allocation2 + $0x40] sm:$0xf] }
 0x1c3   :  { %v4151_v5 = vrot.slane %v4149_v43, 7  ;;  %v4487_v36 = vrot.slane %v4485_v62, 7  ;;  %v4497_v31 = vshll.u32 %v10742_v10, 16  ;;  %v4503_v6 = vshrl.u32 %v10744_v44, 16 }
 0x1c4   :  { %v4146_v37 = vsel %vm10158_vm6, %v4143_v32, %v4145_v25  ;;  %7780 = vmatprep.mubr.msk.bf16.mxu0 %vm3778_vm8, %v7134_v45  ;;  %v4506_v53 = vshll.u32 %v10744_v44, 16  ;;  %v4512_v24 = vshrl.u32 %v10752_v34, 16  ;;  %v4515_v19 = vshll.u32 %v10752_v34, 16  ;;  %v10793_v45 = vld [vmem:[#allocation2 + $0x44] sm:$0xf] }
 0x1c5   :  { %v4154_v11 = vor.u32 %v4152_v60, %v4151_v5  ;;  %v4490_v41 = vor.u32 %v4488_v56, %v4487_v36  ;;  %v4492_v3 = vrot.slane %v4487_v36, 4  ;;  %v4496_v28 = vrot.slane %v4494_v29, 7  ;;  %7759 = vmatmul.mubr.msk.bf16.gmra.mxu1 %vm3778_vm8, %v7112_v17  ;;  %v10800_v29 = vld [vmem:[#allocation2 + $0x48] sm:$0xf] }
 0x1c6   :  { %v4505_v21 = vrot.slane %v4503_v6, 7  ;;  %v4514_v32 = vrot.slane %v4512_v24, 7  ;;  %v12131_v30 = vshll.u32 %v10477_v51, 16  ;;  %v4168_v16 = vrot.slane %v10535_v27, 4 }
 0x1c7   :  { %v4155_v13 = vsel %vm10158_vm6, %v4147_v38, %v4154_v11  ;;  %v4491_v42 = vsel %vm10158_vm6, %v4483_v50, %v4490_v41  ;;  %v4499_v47 = vor.u32 %v4497_v31, %v4496_v28  ;;  %v4501_v18 = vrot.slane %v4496_v28, 4  ;;  %v10809_v28 = vld [vmem:[#allocation2 + $0x4c] sm:$0xf] }
 0x1c8   :  { %v4166_v52 = vor.u32 %v10535_v27, %v12131_v30  ;;  %v7113_v1 = vcombine.low %v4146_v37, %v4155_v13  ;;  %v4508_v25 = vor.u32 %v4506_v53, %v4505_v21  ;;  %v4510_v43 = vrot.slane %v4505_v21, 4 }
 0x1c9   :  { %v4517_v7 = vor.u32 %v4515_v19, %v4514_v32  ;;  %v12132_v38 = vrot.slane %v10154_v48, 4  ;;  %v4500_v27 = vsel %vm10158_vm6, %v4492_v3, %v4499_v47  ;;  %v12133_v50 = vsel %vm10158_vm6, %v10087_v23, %v10265_v58 }
 0x1ca   :  { %7762 = vmatprep.mubr.msk.bf16.mxu1 %vm3778_vm8, %v7113_v1  ;;  %v12134_v17 = vshrl.u32 %v10482_v54, 16  ;;  %v12135_v62 = vshrl.u32 %v10506_v4, 16  ;;  %v7135_v37 = vcombine.low %v4491_v42, %v4500_v27  ;;  %v4509_v5 = vsel %vm10158_vm6, %v4501_v18, %v4508_v25 }
 0x1cb   :  { %v4167_v51 = vsel %vm10158_vm6, %v12132_v38, %v4166_v52  ;;  %v4518_v56 = vsel %vm10158_vm6, %v4510_v43, %v4517_v7  ;;  %v4525_v36 = vshrl.u32 %v10775_v14, 16  ;;  %v12136_v58 = vshll.u32 %v10482_v54, 16 }
 0x1cc   :  { %v7114_v49 = vcombine.low %v12133_v50, %v4167_v51  ;;  %v4169_v60 = vrot.slane %v12134_v17, 7  ;;  %v4173_v48 = vrot.slane %v12135_v62, 7  ;;  %v7136_v23 = vcombine.low %v4509_v5, %v4518_v56  ;;  %7781 = vmatmul.mubr.msk.bf16.gmra.mxu0 %vm3778_vm8, %v7135_v37  ;;  %v10840_v5 = vld [vmem:[#allocation2 + $0x54] sm:$0xf] }
 0x1cd   :  { %v12137_v11 = vshll.u32 %v10506_v4, 16  ;;  %v4527_v19 = vrot.slane %v4525_v36, 7  ;;  %v4528_v41 = vshll.u32 %v10775_v14, 16  ;;  %v4534_v3 = vshrl.u32 %v10793_v45, 16 }
 0x1ce   :  { %v4170_v31 = vor.u32 %v4169_v60, %v12136_v58  ;;  %v4172_v6 = vrot.slane %v4169_v60, 4  ;;  %v4176_v24 = vrot.slane %v4173_v48, 4  ;;  %7784 = vmatprep.mubr.msk.bf16.mxu0 %vm3778_vm8, %v7136_v23  ;;  %v4537_v4 = vshll.u32 %v10793_v45, 16  ;;  %7763 = vmatmul.mubr.msk.bf16.gmra.mxu1 %vm3778_vm8, %v7114_v49  ;;  %v10830_v60 = vld [vmem:[#allocation2 + $0x50] sm:$0xf] }
 0x1cf   :  { %v4174_v53 = vor.u32 %v4173_v48, %v12137_v11  ;;  %v4543_v13 = vshrl.u32 %v10800_v29, 16  ;;  %v4530_v30 = vor.u32 %v4528_v41, %v4527_v19  ;;  %v4532_v52 = vrot.slane %v4527_v19, 4 }
 0x1d0   :  { %v4171_v54 = vsel %vm10158_vm6, %v4168_v16, %v4170_v31  ;;  %v4536_v1 = vrot.slane %v4534_v3, 7  ;;  %v4546_v47 = vshll.u32 %v10800_v29, 16  ;;  %v4552_v18 = vshrl.u32 %v10809_v28, 16  ;;  %v10856_v3 = vld [vmem:[#allocation2 + $0x58] sm:$0xf] }
 0x1d1   :  { %v4175_v21 = vsel %vm10158_vm6, %v4172_v6, %v4174_v53  ;;  %v4545_v42 = vrot.slane %v4543_v13, 7  ;;  %v4555_v16 = vshll.u32 %v10809_v28, 16  ;;  %v4531_v25 = vsel %vm10158_vm6, %v10268_v35, %v4530_v30 }
 0x1d2   :  { %v7115_v32 = vcombine.low %v4171_v54, %v4175_v21  ;;  %v4539_v43 = vor.u32 %v4537_v4, %v4536_v1  ;;  %v4541_v7 = vrot.slane %v4536_v1, 4  ;;  %v12138_v38 = vshll.u32 %v10531_v63, 16 }
 0x1d3   :  { %v4548_v27 = vor.u32 %v4546_v47, %v4545_v42  ;;  %v4550_v50 = vrot.slane %v4545_v42, 4  ;;  %v4554_v49 = vrot.slane %v4552_v18, 7  ;;  %v4180_v17 = vrot.slane %v10583_v20, 4  ;;  %v10864_v18 = vld [vmem:[#allocation2 + $0x5c] sm:$0xf] }
 0x1d4   :  { %7766 = vmatprep.mubr.msk.bf16.mxu1 %vm3778_vm8, %v7115_v32  ;;  %v4178_v51 = vor.u32 %v10583_v20, %v12138_v38  ;;  %v4540_v62 = vsel %vm10158_vm6, %v4532_v52, %v4539_v43  ;;  %v12139_v35 = vshll.u32 %v10525_v40, 16  ;;  %v4184_v63 = vrot.slane %v10589_v0, 4 }
 0x1d5   :  { %v7137_v56 = vcombine.low %v4531_v25, %v4540_v62  ;;  %v4549_v20 = vsel %vm10158_vm6, %v4541_v7, %v4548_v27  ;;  %v4557_v36 = vor.u32 %v4555_v16, %v4554_v49  ;;  %v4559_v23 = vrot.slane %v4554_v49, 4  ;;  %v4103_v62 = vld [vmem:[#allocation2 + $0x60] sm:$0xf] }
 0x1d6   :  { %v4179_v48 = vsel %vm10158_vm6, %v4176_v24, %v4178_v51  ;;  %v4182_v37 = vor.u32 %v10589_v0, %v12139_v35  ;;  %v12140_v31 = vshrl.u32 %v10533_v57, 16  ;;  %v12141_v40 = vshrl.u32 %v10541_v8, 16 }
 0x1d7   :  { %v4561_v53 = vshrl.u32 %v10830_v60, 16  ;;  %7785 = vmatmul.mubr.msk.bf16.gmra.mxu0 %vm3778_vm8, %v7137_v56  ;;  %v4558_v0 = vsel %vm10158_vm6, %v4550_v50, %v4557_v36  ;;  %v4564_v19 = vshll.u32 %v10830_v60, 16  ;;  %v4570_v41 = vshrl.u32 %v10840_v5, 16 }
 0x1d8   :  { %v4183_v58 = vsel %vm10158_vm6, %v4180_v17, %v4182_v37  ;;  %v4185_v6 = vrot.slane %v12140_v31, 7  ;;  %v4189_v11 = vrot.slane %v12141_v40, 7  ;;  %v7138_v54 = vcombine.low %v4549_v20, %v4558_v0  ;;  %v10884_v20 = vld [vmem:[#allocation2 + $0x60] sm:$0xf]  ;;  %v10886_v40 = vld [vmem:[#allocation2 + $0x64] sm:$0xf] }
 0x1d9   :  { %v7116_v24 = vcombine.low %v4179_v48, %v4183_v58  ;;  %v12142_v21 = vshll.u32 %v10533_v57, 16  ;;  %v12143_v32 = vshll.u32 %v10541_v8, 16  ;;  %v4563_v1 = vrot.slane %v4561_v53, 7  ;;  %v5029_v0 = vld [vmem:[#allocation2 + $0x8] sm:$0xf] }
 0x1da   :  { %v4188_v13 = vrot.slane %v4185_v6, 4  ;;  %v4192_v52 = vrot.slane %v4189_v11, 4  ;;  %v4572_v42 = vrot.slane %v4570_v41, 7  ;;  %v4573_v47 = vshll.u32 %v10840_v5, 16  ;;  %7788 = vmatprep.mubr.msk.bf16.mxu0 %vm3778_vm8, %v7138_v54  ;;  %v5030_v54 = vld [vmem:[#allocation2 + $0xc] sm:$0xf] }
 0x1db   :  { %v4186_v4 = vor.u32 %v4185_v6, %v12142_v21  ;;  %v4190_v30 = vor.u32 %v4189_v11, %v12143_v32  ;;  %7767 = vmatmul.mubr.msk.bf16.gmra.mxu1 %vm3778_vm8, %v7116_v24  ;;  %v4579_v8 = vshrl.u32 %v10856_v3, 16  ;;  %v4582_v25 = vshll.u32 %v10856_v3, 16 }
 0x1dc   :  { %v4566_v7 = vor.u32 %v4564_v19, %v4563_v1  ;;  %v4568_v38 = vrot.slane %v4563_v1, 4  ;;  %v4575_v51 = vor.u32 %v4573_v47, %v4572_v42  ;;  %v4577_v27 = vrot.slane %v4572_v42, 4 }
 0x1dd   :  { %v4187_v16 = vsel %vm10158_vm6, %v4184_v63, %v4186_v4  ;;  %v4191_v57 = vsel %vm10158_vm6, %v4188_v13, %v4190_v30  ;;  %v4581_v50 = vrot.slane %v4579_v8, 7  ;;  %v4588_v49 = vshrl.u32 %v10864_v18, 16 }
 0x1de   :  { %v7117_v43 = vcombine.low %v4187_v16, %v4191_v57  ;;  %v4591_v17 = vshll.u32 %v10864_v18, 16  ;;  %v4567_v48 = vsel %vm10158_vm6, %v4559_v23, %v4566_v7  ;;  %v4576_v35 = vsel %vm10158_vm6, %v4568_v38, %v4575_v51  ;;  %v5031_v16 = vld [vmem:[#allocation2 + $0x10] sm:$0xf] }
 0x1df   :  { %v12144_v37 = vshll.u32 %v10585_v12, 16  ;;  %v4196_v56 = vrot.slane %v10647_v39, 4  ;;  %v7139_v36 = vcombine.low %v4567_v48, %v4576_v35  ;;  %v4584_v58 = vor.u32 %v4582_v25, %v4581_v50  ;;  %v5033_v48 = vld [vmem:[#allocation2 + $0x18] sm:$0xf] }
 0x1e0   :  { %7770 = vmatprep.mubr.msk.bf16.mxu1 %vm3778_vm8, %v7117_v43  ;;  %v4586_v31 = vrot.slane %v4581_v50, 4  ;;  %v4590_v6 = vrot.slane %v4588_v49, 7  ;;  %v4198_v11 = vshrl.u32 %v4103_v62, 16  ;;  %v4201_v53 = vshll.u32 %v4103_v62, 16  ;;  %v5032_v43 = vld [vmem:[#allocation2 + $0x14] sm:$0xf] }
 0x1e1   :  { %v4194_v63 = vor.u32 %v10647_v39, %v12144_v37  ;;  %v7153_v12 = vcombine.low %v10625_v33, %v10631_v9  ;;  %7789 = vmatmul.mubr.msk.bf16.gmra.mxu0 %vm3778_vm8, %v7139_v36  ;;  %v4585_v39 = vsel %vm10158_vm6, %v4577_v27, %v4584_v58  ;;  %v4597_v41 = vshrl.u32 %v10884_v20, 16 }
 0x1e2   :  { %v4593_v24 = vor.u32 %v4591_v17, %v4590_v6  ;;  %v4595_v19 = vrot.slane %v4590_v6, 4  ;;  %v4200_v21 = vrot.slane %v4198_v11, 7  ;;  %v4600_v4 = vshll.u32 %v10884_v20, 16 }
 0x1e3   :  { %v4195_v23 = vsel %vm10158_vm6, %v4192_v52, %v4194_v63  ;;  %v4606_v13 = vshrl.u32 %v10886_v40, 16  ;;  %v4609_v32 = vshll.u32 %v10886_v40, 16  ;;  %v4599_v9 = vrot.slane %v4597_v41, 7 }
 0x1e4   :  { %v4594_v33 = vsel %vm10158_vm6, %v4586_v31, %v4593_v24  ;;  %v5052_v30 = vshrl.u32 %v5029_v0, 16  ;;  %v5055_v52 = vshll.u32 %v5029_v0, 16  ;;  %v4203_v42 = vor.u32 %v4201_v53, %v4200_v21 }
 0x1e5   :  { %v7140_v1 = vcombine.low %v4585_v39, %v4594_v33  ;;  %v4608_v47 = vrot.slane %v4606_v13, 7  ;;  %v5061_v57 = vshll.u32 %v5030_v54, 16  ;;  %v4602_v8 = vor.u32 %v4600_v4, %v4599_v9  ;;  %v5035_v13 = vld [vmem:[#allocation2 + $0x20] sm:$0xf] }
 0x1e6   :  { %v4604_v25 = vrot.slane %v4599_v9, 4  ;;  %v5054_v7 = vrot.slane %v5052_v30, 4  ;;  %v5057_v38 = vrot.slane %v5055_v52, 5  ;;  %v4204_v51 = vsel %vm10158_vm6, %v4196_v56, %v4203_v42 }
 0x1e7   :  { %7792 = vmatprep.mubr.msk.bf16.mxu0 %vm3778_vm8, %v7140_v1  ;;  %v4611_v27 = vor.u32 %v4609_v32, %v4608_v47  ;;  %v5063_v50 = vrot.slane %v5061_v57, 5  ;;  %v5065_v49 = vshrl.u32 %v5030_v54, 16  ;;  %v7118_v17 = vcombine.low %v4195_v23, %v4204_v51 }
 0x1e8   :  { %v4603_v62 = vsel %vm10158_vm6, %v4595_v19, %v4602_v8  ;;  %v5058_v35 = vor.u32 %v5057_v38, %v5054_v7  ;;  %v5071_v37 = vshll.u32 %v5031_v16, 16  ;;  %v5075_v58 = vshrl.u32 %v5031_v16, 16  ;;  %v5034_v19 = vld [vmem:[#allocation2 + $0x1c] sm:$0xf] }
 0x1e9   :  { %v4612_v63 = vsel %vm10158_vm6, %v4604_v25, %v4611_v27  ;;  %v5067_v36 = vrot.slane %v5065_v49, 4  ;;  %v5081_v31 = vshll.u32 %v5032_v43, 16  ;;  %7771 = vmatmul.mubr.msk.bf16.gmra.mxu1 %vm3778_vm8, %v7118_v17  ;;  %v5085_v53 = vshrl.u32 %v5032_v43, 16  ;;  %v5037_v43 = vld [vmem:[#allocation2 + $0x28] sm:$0xf] }
 0x1ea   :  { %v7141_v6 = vcombine.low %v4603_v62, %v4612_v63  ;;  %v5059_v56 = vrot.slane %v5058_v35, 4  ;;  %v5073_v11 = vrot.slane %v5071_v37, 5  ;;  %7798 = vmatprep.mubr.msk.bf16.mxu1 %vm3778_vm8, %v7153_v12  ;;  %v5077_v0 = vrot.slane %v5075_v58, 4  ;;  %v10926_v27 = vld [vmem:[%s11869_s6 + $0x20] sm:$0xf] }
 0x1eb   :  { %v5068_v23 = vor.u32 %v5067_v36, %v5063_v50  ;;  %v5083_v39 = vrot.slane %v5081_v31, 5  ;;  %v5091_v24 = vshll.u32 %v5033_v48, 16  ;;  %v5087_v54 = vrot.slane %v5085_v53, 4  ;;  %v5038_v36 = vld [vmem:[#allocation2 + $0x2c] sm:$0xf] }
 0x1ec   :  { %7793 = vmatmul.mubr.msk.bf16.gmra.mxu0 %vm3778_vm8, %v7141_v6  ;;  %v5064_v41 = vsel %vm8199_vm4, %v5059_v56, %v5063_v50  ;;  %v7154_v21 = vcombine.low %v10638_v2, %v10649_v61  ;;  %v7155_v4 = vcombine.low %v10672_v46, %v10690_v26  ;;  %v5078_v12 = vor.u32 %v5077_v0, %v5073_v11  ;;  %v5036_v61 = vld [vmem:[#allocation2 + $0x24] sm:$0xf]  ;;  %v5039_v53 = vld [vmem:[#allocation2 + $0x30] sm:$0x1] }
 0x1ed   :  { %v5069_v32 = vrot.slane %v5068_v23, 4  ;;  %v5093_v33 = vrot.slane %v5091_v24, 5  ;;  %v5750_v9 = vsel %vm3809_vm11, %v10714_v15, 0  ;;  %v5088_v30 = vor.u32 %v5087_v54, %v5083_v39 }
 0x1ee   :  { %v5095_v52 = vshrl.u32 %v5033_v48, 16  ;;  %v5101_v1 = vshll.u32 %v5034_v19, 16  ;;  %v5105_v42 = vshrl.u32 %v5034_v19, 16  ;;  %v5079_v16 = vrot.slane %v5078_v12, 4 }
 0x1ef   :  { %v5074_v47 = vsel %vm8199_vm4, %v5069_v32, %v5073_v11  ;;  %v5111_v57 = vshll.u32 %v5035_v13, 16  ;;  %v5115_v2 = vshrl.u32 %v5035_v13, 16  ;;  %v5089_v8 = vrot.slane %v5088_v30, 4 }
 0x1f0   :  { %v7174_v46 = vcombine.low %v5064_v41, %v5074_v47  ;;  %v5097_v26 = vrot.slane %v5095_v52, 4  ;;  %v5103_v25 = vrot.slane %v5101_v1, 5  ;;  %v5084_v7 = vsel %vm8199_vm4, %v5079_v16, %v5083_v39 }
 0x1f1   :  { %v5107_v15 = vrot.slane %v5105_v42, 4  ;;  %v5113_v38 = vrot.slane %v5111_v57, 5  ;;  %v5117_v51 = vrot.slane %v5115_v2, 4  ;;  %v5094_v50 = vsel %vm8199_vm4, %v5089_v8, %v5093_v33  ;;  %7799 = vmatmul.mubr.msk.bf16.vlgmr.msra.gmra.mxu1 %vm3778_vm8, %v7154_v21  ;;  %v5040_v21 = vld [vmem:[#allocation2 + $0x40] sm:$0xf] }
 0x1f2   :  { %7820 = vmatprep.mubr.msk.bf16.mxu0 %vm3778_vm8, %v7174_v46  ;;  %v5098_v49 = vor.u32 %v5097_v26, %v5093_v33  ;;  %v6034_v17 = vsel %vm3809_vm11, %v10735_v22, 0  ;;  %v7156_v62 = vcombine.low %v10724_v59, %v10742_v10  ;;  %v7175_v48 = vcombine.low %v5084_v7, %v5094_v50  ;;  %7802 = vmatprep.mubr.msk.bf16.mxu1 %vm3778_vm8, %v7155_v4  ;;  %v10944_v59 = vld [vmem:[%s11871_s8] sm:$0x3]  ;;  %v5041_v33 = vld [vmem:[#allocation2 + $0x44] sm:$0xf] }
 0x1f3   :  { %7841 = vmatpush3.bf16.msra.mxu1 %v5750_v9  ;;  %v5108_v35 = vor.u32 %v5107_v15, %v5103_v25  ;;  %v5118_v37 = vor.u32 %v5117_v51, %v5113_v38  ;;  %v5121_v63 = vshll.u32 %v5036_v61, 16  ;;  %v7157_v31 = vcombine.low %v10744_v44, %v10752_v34  ;;  %v5042_v42 = vld [vmem:[#allocation2 + $0x48] sm:$0xf] }
 0x1f4   :  { %v5099_v58 = vrot.slane %v5098_v49, 4  ;;  %v5125_v6 = vshrl.u32 %v5036_v61, 16  ;;  %v5131_v56 = vshll.u32 %v5037_v43, 16  ;;  %7948 = vmatprep.subr.msk.bf16.mxu1 %vm3809_vm11, %v10926_v27  ;;  %7821 = vmatmul.mubr.msk.bf16.vlgmr.msra.gmra.mxu0 %vm3778_vm8, %v7175_v48  ;;  %v5135_v23 = vshrl.u32 %v5037_v43, 16  ;;  %v5043_v43 = vld [vmem:[#allocation2 + $0x4c] sm:$0xf] }
 0x1f5   :  { %v5109_v22 = vrot.slane %v5108_v35, 4  ;;  %v5119_v10 = vrot.slane %v5118_v37, 4  ;;  %v5123_v11 = vrot.slane %v5121_v63, 5  ;;  %7863 = vmatpush3.bf16.msra.mxu0 %v6034_v17  ;;  %v5141_v39 = vshll.u32 %v5038_v36, 16 }
 0x1f6   :  { %v5104_v44 = vsel %vm8199_vm4, %v5099_v58, %v5103_v25  ;;  %v5127_v34 = vrot.slane %v5125_v6, 4  ;;  %v5133_v0 = vrot.slane %v5131_v56, 5  ;;  %v5137_v41 = vrot.slane %v5135_v23, 4  ;;  %v5044_v25 = vld [vmem:[#allocation2 + $0x50] sm:$0xf] }
 0x1f7   :  { %v5114_v24 = vsel %vm8199_vm4, %v5109_v22, %v5113_v38  ;;  %v5124_v19 = vsel %vm8199_vm4, %v5119_v10, %v5123_v11  ;;  %v5145_v54 = vshrl.u32 %v5038_v36, 16  ;;  %vm12146_vm12 = vcmask 1041408   ;;  %v5045_v56 = vld [vmem:[#allocation2 + $0x54] sm:$0xf]  ;;  %v5046_v23 = vld [vmem:[#allocation2 + $0x58] sm:$0xf] }
 0x1f8   :  { %7949 = vmatprep.subr.msk.bf16.mxu0 %vm12146_vm12, %v10944_v59  ;;  %v7176_v4 = vcombine.low %v5104_v44, %v5114_v24  ;;  %v5128_v13 = vor.u32 %v5127_v34, %v5123_v11  ;;  %v5143_v32 = vrot.slane %v5141_v39, 5  ;;  %v5151_v12 = vshll.u32 %v5039_v53, 16 }
 0x1f9   :  { %v5138_v9 = vor.u32 %v5137_v41, %v5133_v0  ;;  %v5147_v30 = vrot.slane %v5145_v54, 4  ;;  %v7158_v52 = vcombine.low %v10775_v14, %v10793_v45  ;;  %v7159_v1 = vcombine.low %v10800_v29, %v10809_v28  ;;  %7803 = vmatmul.mubr.msk.bf16.gmra.mxu1 %vm3778_vm8, %v7156_v62 }
 0x1fa   :  { %7824 = vmatprep.mubr.msk.bf16.mxu0 %vm3778_vm8, %v7176_v4  ;;  %v5129_v47 = vrot.slane %v5128_v13, 4  ;;  %v5153_v16 = vrot.slane %v5151_v12, 5  ;;  %v5156_v57 = vshrl.u32 %v5040_v21, 16  ;;  %v5159_v2 = vshll.u32 %v5040_v21, 16  ;;  %7806 = vmatprep.mubr.msk.bf16.mxu1 %vm3778_vm8, %v7157_v31  ;;  %v5047_v12 = vld [vmem:[#allocation2 + $0x5c] sm:$0xf] }
 0x1fb   :  { %v5139_v61 = vrot.slane %v5138_v9, 4  ;;  %v5148_v8 = vor.u32 %v5147_v30, %v5143_v32  ;;  %v5165_v46 = vshll.u32 %v5041_v33, 16  ;;  %v5169_v26 = vshrl.u32 %v5041_v33, 16 }
 0x1fc   :  { %v5134_v14 = vsel %vm8199_vm4, %v5129_v47, %v5133_v0  ;;  %v5158_v45 = vrot.slane %v5156_v57, 4  ;;  %v5161_v29 = vrot.slane %v5159_v2, 5  ;;  %v5175_v28 = vshll.u32 %v5042_v42, 16 }
 0x1fd   :  { %v7177_v7 = vcombine.low %v5124_v19, %v5134_v14  ;;  %v5144_v15 = vsel %vm8199_vm4, %v5139_v61, %v5143_v32  ;;  %v5149_v38 = vrot.slane %v5148_v8, 4  ;;  %v5167_v51 = vrot.slane %v5165_v46, 5 }
 0x1fe   :  { %v5162_v50 = vor.u32 %v5161_v29, %v5158_v45  ;;  %v5171_v49 = vrot.slane %v5169_v26, 4  ;;  %v5177_v17 = vrot.slane %v5175_v28, 5  ;;  %v5179_v62 = vshrl.u32 %v5042_v42, 16  ;;  %v5457_v26 = vld [vmem:[#allocation2 + $0xc] sm:$0xf] }
 0x1ff   :  { %7825 = vmatmul.mubr.msk.bf16.gmra.mxu0 %vm3778_vm8, %v7177_v7  ;;  %v5154_v48 = vsel %vm8199_vm4, %v5149_v38, %v5153_v16  ;;  %v5185_v35 = vshll.u32 %v5043_v43, 16  ;;  %v5189_v37 = vshrl.u32 %v5043_v43, 16  ;;  %v5195_v63 = vshll.u32 %v5044_v25, 16  ;;  %v10987_v28 = vld [vmem:[#allocation2 + $0x10] sm:$0xf] }
 0x200   :  { %v7178_v36 = vcombine.low %v5144_v15, %v5154_v48  ;;  %v5163_v58 = vrot.slane %v5162_v50, 4  ;;  %v5172_v31 = vor.u32 %v5171_v49, %v5167_v51  ;;  %v5181_v6 = vrot.slane %v5179_v62, 4 }
 0x201   :  { %v5187_v22 = vrot.slane %v5185_v35, 5  ;;  %v5191_v10 = vrot.slane %v5189_v37, 4  ;;  %v5197_v11 = vrot.slane %v5195_v63, 5  ;;  %v5199_v53 = vshrl.u32 %v5044_v25, 16  ;;  %7807 = vmatmul.mubr.msk.bf16.gmra.mxu1 %vm3778_vm8, %v7158_v52  ;;  %v10996_v35 = vld [vmem:[#allocation2 + $0x14] sm:$0xf] }
 0x202   :  { %7828 = vmatprep.mubr.msk.bf16.mxu0 %vm3778_vm8, %v7178_v36  ;;  %v5168_v44 = vsel %vm8199_vm4, %v5163_v58, %v5167_v51  ;;  %v5173_v34 = vrot.slane %v5172_v31, 4  ;;  %v5182_v0 = vor.u32 %v5181_v6, %v5177_v17  ;;  %v7160_v39 = vcombine.low %v10830_v60, %v10840_v5  ;;  %7810 = vmatprep.mubr.msk.bf16.mxu1 %vm3778_vm8, %v7159_v1  ;;  %v5048_v60 = vld [vmem:[#allocation2 + $0x60] sm:$0xf] }
 0x203   :  { %v5192_v24 = vor.u32 %v5191_v10, %v5187_v22  ;;  %v5201_v19 = vrot.slane %v5199_v53, 4  ;;  %v7161_v41 = vcombine.low %v10856_v3, %v10864_v18  ;;  %v5205_v54 = vshll.u32 %v5045_v56, 16 }
 0x204   :  { %v5178_v21 = vsel %vm8199_vm4, %v5173_v34, %v5177_v17  ;;  %v5183_v4 = vrot.slane %v5182_v0, 4  ;;  %v5209_v13 = vshrl.u32 %v5045_v56, 16  ;;  %v5215_v32 = vshll.u32 %v5046_v23, 16  ;;  %v11004_v56 = vld [vmem:[#allocation2 + $0x1c] sm:$0xf] }
 0x205   :  { %v7179_v33 = vcombine.low %v5168_v44, %v5178_v21  ;;  %v5193_v9 = vrot.slane %v5192_v24, 4  ;;  %v5202_v30 = vor.u32 %v5201_v19, %v5197_v11  ;;  %v5207_v52 = vrot.slane %v5205_v54, 5  ;;  %v5049_v0 = vld [vmem:[#allocation2 + $0x64] sm:$0xf] }
 0x206   :  { %v5188_v5 = vsel %vm8199_vm4, %v5183_v4, %v5187_v22  ;;  %v5211_v1 = vrot.slane %v5209_v13, 4  ;;  %v5217_v42 = vrot.slane %v5215_v32, 5  ;;  %v5219_v47 = vshrl.u32 %v5046_v23, 16  ;;  %v5050_v32 = vld [vmem:[#allocation2 + $0x68] sm:$0x1] }
 0x207   :  { %7829 = vmatmul.mubr.msk.bf16.gmra.mxu0 %vm3778_vm8, %v7179_v33  ;;  %v5198_v3 = vsel %vm8199_vm4, %v5193_v9, %v5197_v11  ;;  %v5203_v18 = vrot.slane %v5202_v30, 4  ;;  %v5225_v16 = vshll.u32 %v5047_v12, 16  ;;  %v5229_v57 = vshrl.u32 %v5047_v12, 16 }
 0x208   :  { %v7180_v2 = vcombine.low %v5188_v5, %v5198_v3  ;;  %v5212_v61 = vor.u32 %v5211_v1, %v5207_v52  ;;  %v5221_v8 = vrot.slane %v5219_v47, 4  ;;  %v5235_v46 = vshll.u32 %v5048_v60, 16  ;;  %v11028_v1 = vld [vmem:[#allocation2 + $0xc] sm:$0xe] }
 0x209   :  { %v5208_v25 = vsel %vm8199_vm4, %v5203_v18, %v5207_v52  ;;  %v5227_v14 = vrot.slane %v5225_v16, 5  ;;  %v5231_v45 = vrot.slane %v5229_v57, 4  ;;  %v5239_v29 = vshrl.u32 %v5048_v60, 16  ;;  %7811 = vmatmul.mubr.msk.bf16.gmra.mxu1 %vm3778_vm8, %v7160_v39 }
 0x20a   :  { %7832 = vmatprep.mubr.msk.bf16.mxu0 %vm3778_vm8, %v7180_v2  ;;  %v5213_v43 = vrot.slane %v5212_v61, 4  ;;  %v5222_v7 = vor.u32 %v5221_v8, %v5217_v42  ;;  %v5237_v15 = vrot.slane %v5235_v46, 5  ;;  %v7162_v38 = vcombine.low %v10884_v20, %v10886_v40  ;;  %7814 = vmatprep.mubr.msk.bf16.mxu1 %vm3778_vm8, %v7161_v41  ;;  %v11000_v20 = vld [vmem:[#allocation2 + $0x18] sm:$0xf] }
 0x20b   :  { %v5232_v51 = vor.u32 %v5231_v45, %v5227_v14  ;;  %v5241_v50 = vrot.slane %v5239_v29, 4  ;;  %v5480_v49 = vshrl.u32 %v5457_v26, 16  ;;  %v5483_v17 = vshll.u32 %v5457_v26, 16 }
 0x20c   :  { %v5218_v62 = vsel %vm8199_vm4, %v5213_v43, %v5217_v42  ;;  %v5223_v48 = vrot.slane %v5222_v7, 4  ;;  %v5489_v37 = vshll.u32 %v10987_v28, 16  ;;  %v5493_v63 = vshrl.u32 %v10987_v28, 16  ;;  %v11042_v7 = vld [vmem:[#allocation2 + $0x20] sm:$0xf] }
 0x20d   :  { %v7181_v36 = vcombine.low %v5208_v25, %v5218_v62  ;;  %v5233_v58 = vrot.slane %v5232_v51, 4  ;;  %v5242_v31 = vor.u32 %v5241_v50, %v5237_v15  ;;  %v5482_v40 = vrot.slane %v5480_v49, 4 }
 0x20e   :  { %v5228_v6 = vsel %vm8199_vm4, %v5223_v48, %v5227_v14  ;;  %v5485_v22 = vrot.slane %v5483_v17, 5  ;;  %v5491_v10 = vrot.slane %v5489_v37, 5  ;;  %v5495_v11 = vrot.slane %v5493_v63, 4 }
 0x20f   :  { %7833 = vmatmul.mubr.msk.bf16.gmra.mxu0 %vm3778_vm8, %v7181_v36  ;;  %v5238_v53 = vsel %vm8199_vm4, %v5233_v58, %v5237_v15  ;;  %v5243_v23 = vrot.slane %v5242_v31, 4  ;;  %v5499_v44 = vshll.u32 %v10996_v35, 16  ;;  %v5503_v34 = vshrl.u32 %v10996_v35, 16 }
 0x210   :  { %v7182_v39 = vcombine.low %v5228_v6, %v5238_v53  ;;  %v5486_v24 = vor.u32 %v5485_v22, %v5482_v40  ;;  %v5496_v19 = vor.u32 %v5495_v11, %v5491_v10  ;;  %v5509_v41 = vshll.u32 %v11000_v20, 16  ;;  %v11053_v6 = vld [vmem:[#allocation2 + $0x24] sm:$0xf] }
 0x211   :  { %v5501_v54 = vrot.slane %v5499_v44, 5  ;;  %v5505_v21 = vrot.slane %v5503_v34, 4  ;;  %v5513_v4 = vshrl.u32 %v11000_v20, 16  ;;  %v5519_v13 = vshll.u32 %v11004_v56, 16  ;;  %7815 = vmatmul.mubr.msk.bf16.gmra.mxu1 %vm3778_vm8, %v7162_v38 }
 0x212   :  { %7836 = vmatprep.mubr.msk.bf16.mxu0 %vm3778_vm8, %v7182_v39  ;;  %v5487_v12 = vrot.slane %v5486_v24, 4  ;;  %v5497_v33 = vrot.slane %v5496_v19, 4  ;;  %v5511_v9 = vrot.slane %v5509_v41, 5  ;;  %v5245_v30 = vshll.u32 %v5049_v0, 16 }
 0x213   :  { %v5506_v52 = vor.u32 %v5505_v21, %v5501_v54  ;;  %v5515_v60 = vrot.slane %v5513_v4, 4  ;;  %v5249_v5 = vshrl.u32 %v5049_v0, 16  ;;  %v5255_v18 = vshll.u32 %v5050_v32, 16 }
 0x214   :  { %v5492_v42 = vsel %vm8199_vm4, %v5487_v12, %v5491_v10  ;;  %v5502_v47 = vsel %vm8199_vm4, %v5497_v33, %v5501_v54  ;;  %v5247_v3 = vrot.slane %v5245_v30, 5  ;;  %v5521_v57 = vrot.slane %v5519_v13, 5 }
 0x215   :  { %v5516_v16 = vor.u32 %v5515_v60, %v5511_v9  ;;  %v7195_v2 = vcombine.low %v5492_v42, %v5502_v47  ;;  %v5251_v61 = vrot.slane %v5249_v5, 4  ;;  %v5507_v8 = vrot.slane %v5506_v52, 4  ;;  %v11077_v60 = vld [vmem:[#allocation2 + $0x28] sm:$0xf] }
 0x216   :  { %v5248_v46 = vsel %vm8199_vm4, %v5243_v23, %v5247_v3  ;;  %v7215_v26 = vrot.slane %v11028_v1, 9  ;;  %v5911_v25 = vrot.slane %v10987_v28, 5  ;;  %v5257_v29 = vrot.slane %v5255_v18, 5 }
 0x217   :  { %v5517_v14 = vrot.slane %v5516_v16, 4  ;;  %7842 = vmatprep.mubr.msk.bf16.mxu1 %vm3778_vm8, %v7195_v2  ;;  %v5252_v45 = vor.u32 %v5251_v61, %v5247_v3  ;;  %v5914_v43 = vrot.slane %v10996_v35, 5  ;;  %v5512_v15 = vsel %vm8199_vm4, %v5507_v8, %v5511_v9  ;;  %v11090_v2 = vld [vmem:[#allocation2 + $0x2c] sm:$0xf] }
 0x218   :  { %v5913_v38 = vrot.slane %v5911_v25, 4  ;;  %v5917_v51 = vrot.slane %v11000_v20, 5  ;;  %v5920_v50 = vrot.slane %v11004_v56, 5  ;;  %v5523_v48 = vshrl.u32 %v11004_v56, 16 }
 0x219   :  { %v5522_v49 = vsel %vm8199_vm4, %v5517_v14, %v5521_v57  ;;  %v5253_v17 = vrot.slane %v5252_v45, 4  ;;  %v5916_v62 = vrot.slane %v5914_v43, 4  ;;  %v5912_v31 = vsel %vm8445_vm7, %v7215_v26, %v5911_v25  ;;  %v11097_v25 = vld [vmem:[#allocation2 + $0x30] sm:$0xf] }
 0x21a   :  { %v7196_v36 = vcombine.low %v5512_v15, %v5522_v49  ;;  %v5919_v40 = vrot.slane %v5917_v51, 4  ;;  %v5529_v22 = vshll.u32 %v11042_v7, 16  ;;  %v5915_v11 = vsel %vm8445_vm7, %v5913_v38, %v5914_v43 }
 0x21b   :  { %v5258_v10 = vsel %vm8199_vm4, %v5253_v17, %v5257_v29  ;;  %v5918_v53 = vsel %vm8445_vm7, %v5916_v62, %v5917_v51  ;;  %v5525_v23 = vrot.slane %v5523_v48, 4  ;;  %v5533_v19 = vshrl.u32 %v11042_v7, 16 }
 0x21c   :  { %v7183_v0 = vcombine.low %v5248_v46, %v5258_v10  ;;  %v5921_v39 = vsel %vm8445_vm7, %v5919_v40, %v5920_v50  ;;  %7843 = vmatmul.mubr.msk.bf16.vlgmr.msra.gmra.mxu1 %vm3778_vm8, %v7196_v36  ;;  %v5531_v24 = vrot.slane %v5529_v22, 5  ;;  %v7218_v54 = vcombine.low %v5912_v31, %v5915_v11  ;;  %v5467_v31 = vld [vmem:[#allocation2 + $0x34] sm:$0x1] }
 0x21d   :  { %v5526_v21 = vor.u32 %v5525_v23, %v5521_v57  ;;  %v5539_v32 = vshll.u32 %v11053_v6, 16  ;;  %v5543_v12 = vshrl.u32 %v11053_v6, 16  ;;  %v7219_v33 = vcombine.low %v5918_v53, %v5921_v39 }
 0x21e   :  { %7837 = vmatmul.mubr.msk.bf16.gmra.mxu0 %vm3778_vm8, %v7183_v0  ;;  %v5535_v9 = vrot.slane %v5533_v19, 4  ;;  %v11073_v30 = vrot.slane %v5523_v48, 5  ;;  %v6360_v52 = vsel %vm3809_vm11, %v10926_v27, 0  ;;  %v5922_v3 = vrot.slane %v5920_v50, 4  ;;  %vm12148_vm11 = vmmov %vm12146_vm12 }
 0x21f   :  { %7864 = vmatprep.mubr.msk.bf16.mxu0 %vm3778_vm8, %v7218_v54  ;;  %v5527_v5 = vrot.slane %v5526_v21, 4  ;;  %v5541_v42 = vrot.slane %v5539_v32, 5  ;;  %v5545_v47 = vrot.slane %v5543_v12, 4  ;;  %7885 = vmatpush3.bf16.msra.mxu1 %v6360_v52  ;;  %v11086_v16 = vrot.slane %v5519_v13, 6  ;;  %v5468_v52 = vld [vmem:[#allocation2 + $0x44] sm:$0xf] }
 0x220   :  { %v5536_v18 = vor.u32 %v5535_v9, %v5531_v24  ;;  %v5923_v27 = vrot.slane %v11042_v7, 5  ;;  %v5926_v57 = vrot.slane %v11053_v6, 5  ;;  %v6651_v46 = vsel %vm12148_vm11, %v10944_v59, 0 }
 0x221   :  { %v5532_v61 = vsel %vm8199_vm4, %v5527_v5, %v5531_v24  ;;  %v5546_v8 = vor.u32 %v5545_v47, %v5541_v42  ;;  %v5549_v26 = vshll.u32 %v11077_v60, 16  ;;  %v5553_v15 = vshrl.u32 %v11077_v60, 16 }
 0x222   :  { %v5537_v56 = vrot.slane %v5536_v18, 4  ;;  %v5924_v13 = vsel %vm8445_vm7, %v5922_v3, %v5923_v27  ;;  %v5925_v14 = vrot.slane %v5923_v27, 4  ;;  %v5928_v45 = vrot.slane %v5926_v57, 4 }
 0x223   :  { %v5547_v29 = vrot.slane %v5546_v8, 4  ;;  %v5551_v43 = vrot.slane %v5549_v26, 5  ;;  %v5559_v38 = vshll.u32 %v11090_v2, 16  ;;  %v5563_v50 = vshrl.u32 %v11090_v2, 16 }
 0x224   :  { %v5542_v59 = vsel %vm8199_vm4, %v5537_v56, %v5541_v42  ;;  %v5927_v51 = vsel %vm8445_vm7, %v5925_v14, %v5926_v57  ;;  %v5569_v49 = vshll.u32 %v11097_v25, 16  ;;  %v5555_v36 = vrot.slane %v5553_v15, 4  ;;  %v11136_v56 = vld [vmem:[#allocation2 + $0x48] sm:$0xf] }
 0x225   :  { %v7197_v17 = vcombine.low %v5532_v61, %v5542_v59  ;;  %v7220_v62 = vcombine.low %v5924_v13, %v5927_v51  ;;  %v5552_v48 = vsel %vm8199_vm4, %v5547_v29, %v5551_v43  ;;  %v5561_v40 = vrot.slane %v5559_v38, 5  ;;  %v11140_v51 = vld [vmem:[#allocation2 + $0x4c] sm:$0xf] }
 0x226   :  { %7865 = vmatmul.mubr.msk.bf16.vlgmr.msra.gmra.mxu0 %vm3778_vm8, %v7219_v33  ;;  %v5565_v10 = vrot.slane %v5563_v50, 4  ;;  %v5571_v11 = vrot.slane %v5569_v49, 5  ;;  %v5573_v53 = vshrl.u32 %v11097_v25, 16  ;;  %v5556_v23 = vor.u32 %v5555_v36, %v5551_v43 }
 0x227   :  { %7846 = vmatprep.mubr.msk.bf16.mxu1 %vm3778_vm8, %v7197_v17  ;;  %7868 = vmatprep.mubr.msk.bf16.mxu0 %vm3778_vm8, %v7220_v62  ;;  %v5579_v0 = vshll.u32 %v5467_v31, 16  ;;  %v5929_v39 = vrot.slane %v11077_v60, 5  ;;  %v5932_v24 = vrot.slane %v11090_v2, 5  ;;  %v5935_v33 = vrot.slane %v11097_v25, 5 }
 0x228   :  { %7907 = vmatpush3.bf16.msra.mxu0 %v6651_v46  ;;  %v5566_v54 = vor.u32 %v5565_v10, %v5561_v40  ;;  %v5575_v21 = vrot.slane %v5573_v53, 4  ;;  %v5938_v9 = vrot.slane %v5467_v31, 5  ;;  %v5557_v5 = vrot.slane %v5556_v23, 4 }
 0x229   :  { %v5581_v42 = vrot.slane %v5579_v0, 5  ;;  %v5930_v47 = vsel %vm8445_vm7, %v5928_v45, %v5929_v39  ;;  %v5931_v3 = vrot.slane %v5929_v39, 4  ;;  %v5934_v57 = vrot.slane %v5932_v24, 4  ;;  %v11154_v0 = vld [vmem:[#allocation2 + $0x54] sm:$0xf] }
 0x22a   :  { %v5567_v18 = vrot.slane %v5566_v54, 4  ;;  %v5576_v27 = vor.u32 %v5575_v21, %v5571_v11  ;;  %v5937_v61 = vrot.slane %v5935_v33, 4  ;;  %v5562_v8 = vsel %vm8199_vm4, %v5557_v5, %v5561_v40  ;;  %v11146_v40 = vld [vmem:[#allocation2 + $0x50] sm:$0xf] }
 0x22b   :  { %v5933_v46 = vsel %vm8445_vm7, %v5931_v3, %v5932_v24  ;;  %v5584_v13 = vshrl.u32 %v5468_v52, 16  ;;  %v5587_v14 = vshll.u32 %v5468_v52, 16  ;;  %v7198_v29 = vcombine.low %v5552_v48, %v5562_v8 }
 0x22c   :  { %v5572_v43 = vsel %vm8199_vm4, %v5567_v18, %v5571_v11  ;;  %v5577_v45 = vrot.slane %v5576_v27, 4  ;;  %v7221_v59 = vcombine.low %v5930_v47, %v5933_v46  ;;  %v5936_v17 = vsel %vm8445_vm7, %v5934_v57, %v5935_v33 }
 0x22d   :  { %v5939_v62 = vsel %vm8445_vm7, %v5937_v61, %v5938_v9  ;;  %v5586_v36 = vrot.slane %v5584_v13, 4  ;;  %v5589_v31 = vrot.slane %v5587_v14, 5  ;;  %7847 = vmatmul.mubr.msk.bf16.gmra.mxu1 %vm3778_vm8, %v7198_v29  ;;  %v11926_v11 = vshll.u32 %v11136_v56, 16 }
 0x22e   :  { %v5582_v48 = vsel %vm8199_vm4, %v5577_v45, %v5581_v42  ;;  %7869 = vmatmul.mubr.msk.bf16.gmra.mxu0 %vm3778_vm8, %v7221_v59  ;;  %v7222_v10 = vcombine.low %v5936_v17, %v5939_v62  ;;  %v5597_v23 = vshrl.u32 %v11136_v56, 16  ;;  %v11923_v54 = vshll.u32 %v11140_v51, 16  ;;  %v11165_v42 = vld [vmem:[#allocation2 + $0x44] sm:$0xe] }
 0x22f   :  { %v7199_v39 = vcombine.low %v5572_v43, %v5582_v48  ;;  %v5590_v24 = vor.u32 %v5589_v31, %v5586_v36  ;;  %v11925_v21 = vshrl.u32 %v11140_v51, 16  ;;  %v5595_v33 = vrot.slane %v11926_v11, 5  ;;  %v11251_v11 = vld [vmem:[#allocation2 + $0x68] sm:$0xf] }
 0x230   :  { %7872 = vmatprep.mubr.msk.bf16.mxu0 %vm3778_vm8, %v7222_v10  ;;  %v5599_v9 = vrot.slane %v5597_v23, 4  ;;  %v11914_v52 = vshll.u32 %v11146_v40, 16  ;;  %v11921_v5 = vshrl.u32 %v11146_v40, 16  ;;  %v5605_v3 = vrot.slane %v11923_v54, 5 }
 0x231   :  { %7850 = vmatprep.mubr.msk.bf16.mxu1 %vm3778_vm8, %v7199_v39  ;;  %v5591_v47 = vrot.slane %v5590_v24, 4  ;;  %v5609_v18 = vrot.slane %v11925_v21, 4  ;;  %v11912_v27 = vshll.u32 %v11154_v0, 16  ;;  %v11913_v46 = vshrl.u32 %v11154_v0, 16 }
 0x232   :  { %v5600_v57 = vor.u32 %v5599_v9, %v5595_v33  ;;  %v5615_v61 = vrot.slane %v11914_v52, 5  ;;  %v5619_v8 = vrot.slane %v11921_v5, 4  ;;  %v7216_v43 = vrot.slane %v11165_v42, 9 }
 0x233   :  { %v5596_v13 = vsel %vm8199_vm4, %v5591_v47, %v5595_v33  ;;  %v5610_v14 = vor.u32 %v5609_v18, %v5605_v3  ;;  %v5625_v29 = vrot.slane %v11912_v27, 5  ;;  %v5629_v17 = vrot.slane %v11913_v46, 4  ;;  %v11193_v47 = vld [vmem:[#allocation2 + $0x58] sm:$0xf]  ;;  %v11197_v27 = vld [vmem:[#allocation2 + $0x5c] sm:$0xf] }
 0x234   :  { %v5601_v45 = vrot.slane %v5600_v57, 4  ;;  %v5620_v59 = vor.u32 %v5619_v8, %v5615_v61  ;;  %v5942_v62 = vrot.slane %v11136_v56, 5  ;;  %v5945_v31 = vrot.slane %v11140_v51, 5 }
 0x235   :  { %v5611_v36 = vrot.slane %v5610_v14, 4  ;;  %v5948_v48 = vrot.slane %v11146_v40, 5  ;;  %v5951_v10 = vrot.slane %v11154_v0, 5  ;;  %v5630_v33 = vor.u32 %v5629_v17, %v5625_v29 }
 0x236   :  { %v5606_v39 = vsel %vm8199_vm4, %v5601_v45, %v5605_v3  ;;  %v5621_v24 = vrot.slane %v5620_v59, 4  ;;  %v5943_v9 = vsel %vm8445_vm7, %v7216_v43, %v5942_v62  ;;  %v5944_v8 = vrot.slane %v5942_v62, 4  ;;  %v11201_v59 = vld [vmem:[#allocation2 + $0x60] sm:$0xf]  ;;  %v11209_v62 = vld [vmem:[#allocation2 + $0x64] sm:$0xf] }
 0x237   :  { %v7200_v18 = vcombine.low %v5596_v13, %v5606_v39  ;;  %v5616_v57 = vsel %vm8199_vm4, %v5611_v36, %v5615_v61  ;;  %v5947_v14 = vrot.slane %v5945_v31, 4  ;;  %v5631_v52 = vrot.slane %v5630_v33, 4 }
 0x238   :  { %v5626_v46 = vsel %vm8199_vm4, %v5621_v24, %v5625_v29  ;;  %v5950_v3 = vrot.slane %v5948_v48, 4  ;;  %v5953_v45 = vrot.slane %v5951_v10, 4  ;;  %v5946_v13 = vsel %vm8445_vm7, %v5944_v8, %v5945_v31 }
 0x239   :  { %7851 = vmatmul.mubr.msk.bf16.gmra.mxu1 %vm3778_vm8, %v7200_v18  ;;  %v7201_v43 = vcombine.low %v5616_v57, %v5626_v46  ;;  %v5949_v61 = vsel %vm8445_vm7, %v5947_v14, %v5948_v48  ;;  %v11918_v17 = vshll.u32 %v11193_v47, 16  ;;  %v7223_v36 = vcombine.low %v5943_v9, %v5946_v13 }
 0x23a   :  { %v5952_v29 = vsel %vm8445_vm7, %v5950_v3, %v5951_v10  ;;  %v11920_v39 = vshrl.u32 %v11193_v47, 16  ;;  %v11915_v24 = vshll.u32 %v11197_v27, 16  ;;  %v11916_v48 = vshrl.u32 %v11197_v27, 16 }
 0x23b   :  { %7854 = vmatprep.mubr.msk.bf16.mxu1 %vm3778_vm8, %v7201_v43  ;;  %v7224_v46 = vcombine.low %v5949_v61, %v5952_v29  ;;  %v5635_v31 = vrot.slane %v11918_v17, 5  ;;  %v11917_v33 = vshll.u32 %v11201_v59, 16  ;;  %7873 = vmatmul.mubr.msk.bf16.gmra.mxu0 %vm3778_vm8, %v7223_v36  ;;  %v11919_v18 = vshrl.u32 %v11201_v59, 16 }
 0x23c   :  { %v5639_v9 = vrot.slane %v11920_v39, 4  ;;  %v5645_v10 = vrot.slane %v11915_v24, 5  ;;  %v11922_v57 = vshll.u32 %v11209_v62, 16  ;;  %v5649_v14 = vrot.slane %v11916_v48, 4 }
 0x23d   :  { %7876 = vmatprep.mubr.msk.bf16.mxu0 %vm3778_vm8, %v7224_v46  ;;  %v5636_v8 = vsel %vm8199_vm4, %v5631_v52, %v5635_v31  ;;  %v5655_v3 = vrot.slane %v11917_v33, 5  ;;  %v11924_v43 = vshrl.u32 %v11209_v62, 16  ;;  %v5659_v61 = vrot.slane %v11919_v18, 4 }
 0x23e   :  { %v5640_v13 = vor.u32 %v5639_v9, %v5635_v31  ;;  %v5665_v36 = vrot.slane %v11922_v57, 5  ;;  %v5954_v29 = vrot.slane %v11193_v47, 5  ;;  %v5650_v46 = vor.u32 %v5649_v14, %v5645_v10 }
 0x23f   :  { %v5669_v52 = vrot.slane %v11924_v43, 4  ;;  %v5957_v24 = vrot.slane %v11197_v27, 5  ;;  %v5960_v48 = vrot.slane %v11201_v59, 5  ;;  %v5660_v17 = vor.u32 %v5659_v61, %v5655_v3 }
 0x240   :  { %v5641_v33 = vrot.slane %v5640_v13, 4  ;;  %v5955_v31 = vsel %vm8445_vm7, %v5953_v45, %v5954_v29  ;;  %v5956_v9 = vrot.slane %v5954_v29, 4  ;;  %v5651_v18 = vrot.slane %v5650_v46, 4  ;;  %v11265_v46 = vpop.f32.mrf.mxu1 }
 0x241   :  { %v5670_v39 = vor.u32 %v5669_v52, %v5665_v36  ;;  %v5959_v5 = vrot.slane %v5957_v24, 4  ;;  %v5962_v57 = vrot.slane %v5960_v48, 4  ;;  %v5661_v54 = vrot.slane %v5660_v17, 4 }
 0x242   :  { %v5646_v14 = vsel %vm8199_vm4, %v5641_v33, %v5645_v10  ;;  %v5958_v43 = vsel %vm8445_vm7, %v5956_v9, %v5957_v24  ;;  %v5963_v21 = vrot.slane %v11209_v62, 5  ;;  %v11255_v13 = vor.u32 %v11086_v16, %v11073_v30 }
 0x243   :  { %v7202_v45 = vcombine.low %v5636_v8, %v5646_v14  ;;  %v5656_v61 = vsel %vm8199_vm4, %v5651_v18, %v5655_v3  ;;  %v7225_v29 = vcombine.low %v5955_v31, %v5958_v43  ;;  %v5666_v33 = vsel %vm8199_vm4, %v5661_v54, %v5665_v36  ;;  %v5478_v18 = vld [vmem:[#allocation2 + $0x6c] sm:$0x1]  ;;  %v11287_v14 = vpop.f32.mrf.mxu1 }
 0x244   :  { %v5671_v17 = vrot.slane %v5670_v39, 4  ;;  %v5961_v24 = vsel %vm8445_vm7, %v5959_v5, %v5960_v48  ;;  %v5964_v10 = vsel %vm8445_vm7, %v5962_v57, %v5963_v21  ;;  %v7203_v30 = vcombine.low %v5656_v61, %v5666_v33 }
 0x245   :  { %7855 = vmatmul.mubr.msk.bf16.gmra.mxu1 %vm3778_vm8, %v7202_v45  ;;  %7877 = vmatmul.mubr.msk.bf16.gmra.mxu0 %vm3778_vm8, %v7225_v29  ;;  %v7226_v16 = vcombine.low %v5961_v24, %v5964_v10  ;;  %v5673_v8 = vshll.u32 %v11251_v11, 16  ;;  %v5677_v54 = vshrl.u32 %v11251_v11, 16  ;;  %v5683_v39 = vshll.u32 %v5478_v18, 16 }
 0x246   :  { %v6172_v3 = vshrl.u32 %v11028_v1, 16  ;;  %v6175_v5 = vshll.u32 %v11028_v1, 16  ;;  %v6180_v48 = vrot.slane %v5493_v63, 5  ;;  %7858 = vmatprep.mubr.msk.bf16.mxu1 %vm3778_vm8, %v7203_v30  ;;  %v6181_v36 = vrot.slane %v5489_v37, 6 }
 0x247   :  { %7880 = vmatprep.mubr.msk.bf16.mxu0 %vm3778_vm8, %v7226_v16  ;;  %v5675_v57 = vrot.slane %v5673_v8, 5  ;;  %v5679_v43 = vrot.slane %v5677_v54, 4  ;;  %v6185_v52 = vrot.slane %v5503_v34, 5  ;;  %v5965_v1 = vrot.slane %v5963_v21, 4 }
 0x248   :  { %v6174_v31 = vrot.slane %v6172_v3, 5  ;;  %v6177_v9 = vrot.slane %v6175_v5, 6  ;;  %v6186_v63 = vrot.slane %v5499_v44, 6  ;;  %v5685_v61 = vrot.slane %v5683_v39, 5  ;;  %v11296_v39 = vpop.f32.mrf.mxu1 }
 0x249   :  { %v5680_v45 = vor.u32 %v5679_v43, %v5675_v57  ;;  %v6182_v29 = vor.u32 %v6181_v36, %v6180_v48  ;;  %v6190_v33 = vrot.slane %v5513_v4, 5  ;;  %v6191_v37 = vrot.slane %v5509_v41, 6  ;;  %v11309_v43 = vpop.f32.mrf.mxu0 }
 0x24a   :  { %v6178_v24 = vor.u32 %v6177_v9, %v6174_v31  ;;  %v6187_v28 = vor.u32 %v6186_v63, %v6185_v52  ;;  %v5966_v34 = vrot.slane %v11251_v11, 5  ;;  %v5676_v21 = vsel %vm8199_vm4, %v5671_v17, %v5675_v57  ;;  %v11325_v7 = vpop.f32.mrf.mxu1 }
 0x24b   :  { %v5681_v35 = vrot.slane %v5680_v45, 4  ;;  %v5969_v44 = vrot.slane %v5478_v18, 5  ;;  %v6184_v30 = vrot.slane %v6182_v29, 4  ;;  %v6192_v16 = vor.u32 %v6191_v37, %v6190_v33  ;;  %v6169_v45 = vld [vmem:[#allocation2 + $0x34] sm:$0x3] }
 0x24c   :  { %v6179_v10 = vrot.slane %v6178_v24, 4  ;;  %v5967_v3 = vsel %vm8445_vm7, %v5965_v1, %v5966_v34  ;;  %v5968_v20 = vrot.slane %v5966_v34, 4  ;;  %v6200_v41 = vrot.slane %v5533_v19, 5  ;;  %v8042_v1 = vld [vmem:[%s11868_s3] sm:$0xff]  }
 0x24d   :  { %v5686_v4 = vsel %vm8199_vm4, %v5681_v35, %v5685_v61  ;;  %v6188_v18 = vsel %vm8910_vm10, %v6184_v30, %v6187_v28  ;;  %v6199_v57 = vrot.slane %v11255_v13, 4  ;;  %v6201_v52 = vrot.slane %v5529_v22, 6  ;;  %v11327_v22 = vpop.f32.mrf.mxu0 }
 0x24e   :  { %v7204_v5 = vcombine.low %v5676_v21, %v5686_v4  ;;  %v6183_v17 = vsel %vm8910_vm10, %v6179_v10, %v6182_v29  ;;  %v5970_v36 = vsel %vm8445_vm7, %v5968_v20, %v5969_v44  ;;  %v6205_v19 = vrot.slane %v5543_v12, 5  ;;  %v11347_v21 = vpop.f32.mrf.mxu1  ;;  %v8043_v10 = vld [vmem:[%s11868_s3 + $0x8] sm:$0xff]  }
 0x24f   :  { %v7239_v55 = vcombine.low %v6183_v17, %v6188_v18  ;;  %v6189_v31 = vrot.slane %v6187_v28, 4  ;;  %v7227_v9 = vcombine.low %v5967_v3, %v5970_v36  ;;  %v6206_v63 = vrot.slane %v5539_v32, 6 }
 0x250   :  { %7859 = vmatmul.mubr.msk.bf16.gmra.mxu1 %vm3778_vm8, %v7204_v5  ;;  %v6210_v58 = vrot.slane %v5553_v15, 5  ;;  %v6194_v12 = vrot.slane %v6192_v16, 4  ;;  %v6202_v61 = vor.u32 %v6201_v52, %v6200_v41  ;;  %v6211_v29 = vrot.slane %v5549_v26, 6  ;;  %v11359_v4 = vpop.f32.mrf.mxu1 }
 0x251   :  { %7886 = vmatprep.mubr.msk.bf16.mxu1 %vm3778_vm8, %v7239_v55  ;;  %v6215_v33 = vrot.slane %v5563_v50, 5  ;;  %7881 = vmatmul.mubr.msk.bf16.gmra.mxu0 %vm3778_vm8, %v7227_v9  ;;  %v6207_v6 = vor.u32 %v6206_v63, %v6205_v19  ;;  %v6216_v32 = vrot.slane %v5559_v38, 6  ;;  %v6220_v15 = vrot.slane %v5573_v53, 5  ;;  %v11349_v53 = vpop.f32.mrf.mxu0 }
 0x252   :  { %v6221_v24 = vrot.slane %v5569_v49, 6  ;;  %v6198_v60 = vsel %vm8910_vm10, %v6194_v12, %v11255_v13  ;;  %v6203_v26 = vsel %vm8910_vm10, %v6199_v57, %v6202_v61  ;;  %vm12150_vm4 = vcmask 31744   ;;  %v11372_v19 = vpop.f32.mrf.mxu1 }
 0x253   :  { %7908 = vmatprep.mubr.msk.bf16.mxu0 %vm12150_vm4, %v8042_v1  ;;  %v6212_v50 = vor.u32 %v6211_v29, %v6210_v58  ;;  %v6226_v28 = vshrl.u32 %v6169_v45, 16  ;;  %v6204_v37 = vrot.slane %v6202_v61, 4  ;;  %v6217_v2 = vor.u32 %v6216_v32, %v6215_v33  ;;  %v11370_v52 = vpop.f32.mrf.mxu0  ;;  %vm12154_vm7 = vmmov %vm12150_vm4 }
 0x254   :  { %v6222_v38 = vor.u32 %v6221_v24, %v6220_v15  ;;  %v6229_v34 = vshll.u32 %v6169_v45, 16  ;;  %v6193_v25 = vsel %vm8910_vm10, %v6189_v31, %v6192_v16  ;;  %v6235_v13 = vshrl.u32 %v11165_v42, 16  ;;  %v8044_v16 = vld [vmem:[%s11868_s3 + $0x10] sm:$0xff]   ;;  %v11384_v29 = vpop.f32.mrf.mxu1  ;;  %vm12157_vm14 = vmmov %vm12150_vm4 }
 0x255   :  { %v6228_v49 = vrot.slane %v6226_v28, 5  ;;  %v7240_v35 = vcombine.low %v6193_v25, %v6198_v60  ;;  %v6208_v44 = vsel %vm8910_vm10, %v6204_v37, %v6207_v6  ;;  %v6214_v30 = vrot.slane %v6212_v50, 4  ;;  %vm12164_vm9 = vmmov %vm12150_vm4 }
 0x256   :  { %v7241_v3 = vcombine.low %v6203_v26, %v6208_v44  ;;  %v6219_v20 = vrot.slane %v6217_v2, 4  ;;  %v6231_v41 = vrot.slane %v6229_v34, 6  ;;  %v6238_v5 = vshll.u32 %v11165_v42, 16  ;;  %v11397_v37 = vpop.f32.mrf.mxu1  ;;  %vm12165_vm1 = vmmov %vm12150_vm4 }
 0x257   :  { %v6224_v17 = vrot.slane %v6222_v38, 4  ;;  %v6237_v18 = vrot.slane %v6235_v13, 5  ;;  %v6243_v57 = vrot.slane %v5597_v23, 5  ;;  %v12151_v55 = vshll.u32 %v11136_v56, 16  ;;  %v7738_v28 = vpop.f32.mrf.mxu0  ;;  %vm12170_vm13 = vmmov %vm12165_vm1 }
 0x258   :  { %7887 = vmatmul.mubr.msk.bf16.vlgmr.msra.gmra.mxu1 %vm3778_vm8, %v7240_v35  ;;  %v6232_v1 = vor.u32 %v6231_v41, %v6228_v49  ;;  %v6240_v31 = vrot.slane %v6238_v5, 6  ;;  %v12152_v42 = vshrl.u32 %v11140_v51, 16  ;;  %v12153_v63 = vshll.u32 %v11140_v51, 16  ;;  %vm12171_vm0 = vmmov %vm12165_vm1 }
 0x259   :  { %v6244_v36 = vrot.slane %v12151_v55, 6  ;;  %7890 = vmatprep.mubr.msk.bf16.mxu1 %vm3778_vm8, %v7241_v3  ;;  %v6209_v45 = vrot.slane %v6207_v6, 4  ;;  %7909 = vmatmul.mubr.msk.bf16.vlgmr.msra.gmra.mxu0 %vm12154_vm7, %v8043_v10  ;;  %v12155_v56 = vshrl.u32 %v11146_v40, 16  ;;  %v12156_v12 = vshll.u32 %v11146_v40, 16  ;;  %v4039_v35 = vpop.f32.mrf.mxu0  ;;  %vm12172_vm15 = vmmov %vm12171_vm0 }
 0x25a   :  { %v6248_v9 = vrot.slane %v12152_v42, 5  ;;  %v6249_v58 = vrot.slane %v12153_v63, 6  ;;  %v6218_v33 = vsel %vm8910_vm10, %v6214_v30, %v6217_v2  ;;  %7912 = vmatprep.mubr.msk.bf16.mxu0 %vm12157_vm14, %v8044_v16  ;;  %v12158_v51 = vshrl.u32 %v11154_v0, 16  ;;  %v8046_v30 = vld [vmem:[%s11868_s3 + $0x20] sm:$0xff]   ;;  %vm12173_vm2 = vmmov %vm12171_vm0 }
 0x25b   :  { %v6253_v23 = vrot.slane %v12155_v56, 5  ;;  %v6254_v61 = vrot.slane %v12156_v12, 6  ;;  %v12159_v6 = vshll.u32 %v11154_v0, 16  ;;  %v6223_v60 = vsel %vm8910_vm10, %v6219_v20, %v6222_v38  ;;  %v8045_v0 = vld [vmem:[%s11868_s3 + $0x18] sm:$0xff]   ;;  %v3879_v38 = vpop.f32.mrf.mxu1  ;;  %v7739_v55 = vpop.f32.mrf.mxu0  ;;  %vm12174_vm3 = vmmov %vm12171_vm0 }
 0x25c   :  { %v6250_v32 = vor.u32 %v6249_v58, %v6248_v9  ;;  %v6258_v15 = vrot.slane %v12158_v51, 5  ;;  %v6233_v40 = vsel %vm8910_vm10, %v6224_v17, %v6232_v1  ;;  %v6245_v26 = vor.u32 %v6244_v36, %v6243_v57 }
 0x25d   :  { %v6259_v24 = vrot.slane %v12159_v6, 6  ;;  %v6213_v2 = vsel %vm8910_vm10, %v6209_v45, %v6212_v50  ;;  %v6241_v34 = vor.u32 %v6240_v31, %v6237_v18  ;;  %v6255_v25 = vor.u32 %v6254_v61, %v6253_v23  ;;  %v7721_v36 = vpop.f32.mrf.mxu1  ;;  %v4042_v9 = vpop.f32.mrf.mxu0 }
 0x25e   :  { %v7242_v49 = vcombine.low %v6213_v2, %v6218_v33  ;;  %v6252_v13 = vrot.slane %v6250_v32, 4  ;;  %v7243_v44 = vcombine.low %v6223_v60, %v6233_v40  ;;  %v12160_v3 = vshrl.u32 %v11193_v47, 16 }
 0x25f   :  { %v11404_v10 = vor.u32 %v6259_v24, %v6258_v15  ;;  %v12161_v20 = vshll.u32 %v11193_v47, 16  ;;  %v6247_v16 = vrot.slane %v6245_v26, 4  ;;  %v12162_v5 = vshrl.u32 %v11197_v27, 16  ;;  %v3882_v45 = vpop.f32.mrf.mxu1 }
 0x260   :  { %v6263_v50 = vrot.slane %v12160_v3, 5  ;;  %7891 = vmatmul.mubr.msk.bf16.gmra.mxu1 %vm3778_vm8, %v7242_v49  ;;  %v12163_v18 = vshll.u32 %v11197_v27, 16  ;;  %v6242_v1 = vrot.slane %v6241_v34, 4  ;;  %v6257_v31 = vrot.slane %v6255_v25, 4  ;;  %v7742_v15 = vpop.f32.mrf.mxu0  ;;  %v8047_v34 = vld [vmem:[%s11868_s3 + $0x34] sm:$0xff]   ;;  %v8048_v49 = vld [vmem:[%s11868_s3 + $0x3c] sm:$0xff]  }
 0x261   :  { %v6264_v41 = vrot.slane %v12161_v20, 6  ;;  %v6268_v17 = vrot.slane %v12162_v5, 5  ;;  %7894 = vmatprep.mubr.msk.bf16.mxu1 %vm3778_vm8, %v7243_v44  ;;  %7913 = vmatmul.mubr.msk.bf16.gmra.mxu0 %vm12164_vm9, %v8045_v0  ;;  %v6251_v47 = vsel %vm8910_vm10, %v6247_v16, %v6250_v32  ;;  %v6256_v42 = vsel %vm8910_vm10, %v6252_v13, %v6255_v25  ;;  %v6170_v32 = vld [vmem:[#allocation2 + $0x6c] sm:$0x3] }
 0x262   :  { %v6269_v57 = vrot.slane %v12163_v18, 6  ;;  %v6246_v63 = vsel %vm8910_vm10, %v6242_v1, %v6245_v26  ;;  %v6261_v27 = vsel %vm8910_vm10, %v6257_v31, %v11404_v10  ;;  %7916 = vmatprep.mubr.msk.bf16.mxu0 %vm12165_vm1, %v8046_v30  ;;  %v12166_v23 = vshrl.u32 %v11201_v59, 16 }
 0x263   :  { %v6265_v58 = vor.u32 %v6264_v41, %v6263_v50  ;;  %v12167_v61 = vshll.u32 %v11201_v59, 16  ;;  %v11436_v51 = vadd.f32 %v11309_v43, %v11265_v46  ;;  %v7244_v6 = vcombine.low %v6246_v63, %v6251_v47 }
 0x264   :  { %v6270_v56 = vor.u32 %v6269_v57, %v6268_v17  ;;  %v6273_v12 = vrot.slane %v12166_v23, 5  ;;  %v7245_v24 = vcombine.low %v6256_v42, %v6261_v27  ;;  %v12168_v60 = vshrl.u32 %v11209_v62, 16  ;;  %v8049_v57 = vld [vmem:[%s11868_s3 + $0x44] sm:$0xff]   ;;  %v8050_v42 = vld [vmem:[%s11868_s3 + $0x4c] sm:$0xff]  }
 0x265   :  { %v6274_v33 = vrot.slane %v12167_v61, 6  ;;  %v12169_v26 = vshll.u32 %v11209_v62, 16  ;;  %v6283_v59 = vrot.slane %v5677_v54, 5  ;;  %v6284_v46 = vrot.slane %v5673_v8, 6  ;;  %v4055_v62 = vpop.f32.mrf.mxu0  ;;  %v7724_v8 = vpop.f32.mrf.mxu1 }
 0x266   :  { %v6278_v40 = vrot.slane %v12168_v60, 5  ;;  %v11451_v43 = vadd.f32 %v11327_v22, %v11287_v14  ;;  %v11455_v25 = vadd.f32 %v11349_v53, %v11296_v39  ;;  %v6289_v0 = vshrl.u32 %v6170_v32, 16 }
 0x267   :  { %v6279_v2 = vrot.slane %v12169_v26, 6  ;;  %v6292_v13 = vshll.u32 %v6170_v32, 16  ;;  %v11462_v54 = vadd.f32 %v11370_v52, %v11325_v7  ;;  %v11465_v11 = vadd.f32 %v7738_v28, %v11347_v21  ;;  %v7743_v44 = vpop.f32.mrf.mxu0  ;;  %v3895_v28 = vpop.f32.mrf.mxu1  ;;  %v8051_v32 = vld [vmem:[%s11868_s3 + $0x54] sm:$0xff]  }
 0x268   :  { %7895 = vmatmul.mubr.msk.bf16.gmra.mxu1 %vm3778_vm8, %v7244_v6  ;;  %v6267_v14 = vrot.slane %v6265_v58, 4  ;;  %v6272_v39 = vrot.slane %v6270_v56, 4  ;;  %v6275_v22 = vor.u32 %v6274_v33, %v6273_v12  ;;  %v11469_v53 = vadd.f32 %v4039_v35, %v11359_v4 }
 0x269   :  { %7898 = vmatprep.mubr.msk.bf16.mxu1 %vm3778_vm8, %v7245_v24  ;;  %v11473_v30 = vadd.f32 %v7739_v55, %v11372_v19  ;;  %v11476_v7 = vadd.f32 %v4042_v9, %v11384_v29  ;;  %v11479_v21 = vadd.f32 %v7742_v15, %v11397_v37  ;;  %v11481_v52 = vadd.f32 %v4055_v62, %v3879_v38  ;;  %v4058_v19 = vpop.f32.mrf.mxu0  ;;  %v7725_v38 = vpop.f32.mrf.mxu1 }
 0x26a   :  { %v6262_v3 = vrot.slane %v11404_v10, 4  ;;  %7917 = vmatmul.mubr.msk.bf16.gmra.mxu0 %vm12170_vm13, %v8047_v34  ;;  %v6271_v4 = vsel %vm8910_vm10, %v6267_v14, %v6270_v56  ;;  %v6280_v35 = vor.u32 %v6279_v2, %v6278_v40  ;;  %v11487_v50 = vadd.f32 %v7743_v44, %v7721_v36 }
 0x26b   :  { %7920 = vmatprep.mubr.msk.bf16.mxu0 %vm12171_vm0, %v8048_v49  ;;  %v6285_v29 = vor.u32 %v6284_v46, %v6283_v59  ;;  %v6291_v20 = vrot.slane %v6289_v0, 5  ;;  %v6294_v37 = vrot.slane %v6292_v13, 6  ;;  %v11490_v41 = vadd.f32 %v4058_v19, %v3882_v45  ;;  %v3898_v55 = vpop.f32.mrf.mxu1  ;;  %v7746_v9 = vpop.f32.mrf.mxu0 }
 0x26c   :  { %v6276_v10 = vsel %vm8910_vm10, %v6272_v39, %v6275_v22  ;;  %v6277_v16 = vrot.slane %v6275_v22, 4  ;;  %v6266_v5 = vsel %vm8910_vm10, %v6262_v3, %v6265_v58  ;;  %v6282_v36 = vrot.slane %v6280_v35, 4 }
 0x26d   :  { %v7246_v17 = vcombine.low %v6266_v5, %v6271_v4  ;;  %v6287_v31 = vrot.slane %v6285_v29, 4  ;;  %v6295_v47 = vor.u32 %v6294_v37, %v6291_v20  ;;  %v11506_v63 = vadd.f32 %v7746_v9, %v7724_v8  ;;  %v4071_v27 = vpop.f32.mrf.mxu0  ;;  %v7728_v58 = vpop.f32.mrf.mxu1 }
 0x26e   :  { %v6281_v18 = vsel %vm8910_vm10, %v6277_v16, %v6280_v35  ;;  %v6286_v45 = vsel %vm8910_vm10, %v6282_v36, %v6285_v29  ;;  %v11514_v23 = vadd.f32 %v4071_v27, %v3895_v28 }
 0x26f   :  { %v7247_v1 = vcombine.low %v6276_v10, %v6281_v18  ;;  %v6296_v56 = vsel %vm8910_vm10, %v6287_v31, %v6295_v47  ;;  %v7747_v12 = vpop.f32.mrf.mxu0  ;;  %v3911_v15 = vpop.f32.mrf.mxu1 }
 0x270   :  { %7899 = vmatmul.mubr.msk.bf16.gmra.mxu1 %vm3778_vm8, %v7246_v17  ;;  %v11516_v61 = vadd.f32 %v7747_v12, %v7725_v38  ;;  %v7248_v33 = vcombine.low %v6286_v45, %v6296_v56 }
 0x271   :  { %7902 = vmatprep.mubr.msk.bf16.mxu1 %vm3778_vm8, %v7247_v1  ;;  %v4074_v6 = vpop.f32.mrf.mxu0  ;;  %v7729_v48 = vpop.f32.mrf.mxu1 }
 0x272   :  { %7921 = vmatmul.mubr.msk.bf16.gmra.mxu0 %vm12172_vm15, %v8049_v57  ;;  %v11521_v24 = vadd.f32 %v4074_v6, %v3898_v55 }
 0x273   :  { %7924 = vmatprep.mubr.msk.bf16.mxu0 %vm12173_vm2, %v8050_v42  ;;  %v3914_v2 = vpop.f32.mrf.mxu1 }
 0x276   :  { %v7750_v60 = vpop.f32.mrf.mxu0 }
 0x277   :  { %v11525_v40 = vadd.f32 %v7750_v60, %v7728_v58 }
 0x278   :  { %7903 = vmatmul.mubr.msk.bf16.gmra.mxu1 %vm3778_vm8, %v7248_v33  ;;  %v4087_v26 = vpop.f32.mrf.mxu0 }
 0x279   :  { %v11527_v34 = vadd.f32 %v4087_v26, %v3911_v15 }
 0x27a   :  { %7925 = vmatmul.mubr.msk.bf16.gmra.mxu0 %vm12174_vm3, %v8051_v32  ;;  %v7751_v59 = vpop.f32.mrf.mxu0 }
 0x27b   :  { %v11529_v46 = vadd.f32 %v7751_v59, %v7729_v48 }
 0x27c   :  { %v4090_v62 = vpop.f32.mrf.mxu0 }
 0x27d   :  { %v7756_v49 = vpop.f32.mrf.mxu1  ;;  %v11531_v0 = vadd.f32 %v4090_v62, %v3914_v2 }
 0x27e   :  { %v4385_v13 = vadd.f32 %v7756_v49, %v11436_v51 }
 0x27f   :  { %v4304_v8 = vpop.f32.mrf.mxu1  ;;  %v7778_v14 = vpop.f32.mrf.mxu0 }
 0x280   :  { %v4383_v39 = vadd.f32 %v4304_v8, %v11451_v43  ;;  %v11535_v22 = vadd.f32 %v7778_v14, %v4385_v13 }
 0x281   :  { %v7757_v44 = vpop.f32.mrf.mxu1  ;;  %v4712_v28 = vpop.f32.mrf.mxu0 }
 0x282   :  { %v4386_v3 = vadd.f32 %v7757_v44, %v11455_v25  ;;  %v11538_v4 = vadd.f32 %v4712_v28, %v4383_v39 }
 0x283   :  { %v4307_v35 = vpop.f32.mrf.mxu1  ;;  %v7779_v19 = vpop.f32.mrf.mxu0 }
 0x284   :  { %v4384_v29 = vadd.f32 %v4307_v35, %v11462_v54  ;;  %v11541_v20 = vadd.f32 %v7779_v19, %v4386_v3 }
 0x285   :  { %v7760_v37 = vpop.f32.mrf.mxu1  ;;  %v4715_v51 = vpop.f32.mrf.mxu0 }
 0x286   :  { %v4389_v38 = vadd.f32 %v7760_v37, %v11465_v11  ;;  %v11544_v10 = vadd.f32 %v4715_v51, %v4384_v29 }
 0x287   :  { %v4320_v43 = vpop.f32.mrf.mxu1 }
 0x288   :  { %v4387_v16 = vadd.f32 %v4320_v43, %v11469_v53 }
 0x289   :  { %v7761_v5 = vpop.f32.mrf.mxu1 }
 0x28a   :  { %v4390_v25 = vadd.f32 %v7761_v5, %v11473_v30 }
 0x28b   :  { %v4323_v18 = vpop.f32.mrf.mxu1 }
 0x28c   :  { %v7782_v17 = vpop.f32.mrf.mxu0  ;;  %v4388_v54 = vadd.f32 %v4323_v18, %v11476_v7 }
 0x28d   :  { %v11548_v57 = vadd.f32 %v7782_v17, %v4389_v38 }
 0x28e   :  { %v4728_v55 = vpop.f32.mrf.mxu0  ;;  %v7764_v36 = vpop.f32.mrf.mxu1 }
 0x28f   :  { %v11551_v1 = vadd.f32 %v4728_v55, %v4387_v16  ;;  %v4393_v11 = vadd.f32 %v7764_v36, %v11479_v21 }
 0x290   :  { %v7783_v31 = vpop.f32.mrf.mxu0  ;;  %v4336_v47 = vpop.f32.mrf.mxu1 }
 0x291   :  { %v11554_v42 = vadd.f32 %v7783_v31, %v4390_v25  ;;  %v4391_v53 = vadd.f32 %v4336_v47, %v11481_v52 }
 0x292   :  { %v4731_v9 = vpop.f32.mrf.mxu0  ;;  %v7765_v30 = vpop.f32.mrf.mxu1 }
 0x293   :  { %v11557_v27 = vadd.f32 %v4731_v9, %v4388_v54  ;;  %v4394_v58 = vadd.f32 %v7765_v30, %v11487_v50 }
 0x294   :  { %v4339_v45 = vpop.f32.mrf.mxu1 }
 0x295   :  { %v4392_v56 = vadd.f32 %v4339_v45, %v11490_v41 }
 0x297   :  { %v7786_v7 = vpop.f32.mrf.mxu0 }
 0x298   :  { %v11561_v12 = vadd.f32 %v7786_v7, %v4393_v11 }
 0x299   :  { %v4744_v33 = vpop.f32.mrf.mxu0 }
 0x29a   :  { %v11563_v32 = vadd.f32 %v4744_v33, %v4391_v53 }
 0x29b   :  { %v7768_v21 = vpop.f32.mrf.mxu1  ;;  %v7787_v6 = vpop.f32.mrf.mxu0 }
 0x29c   :  { %v4397_v15 = vadd.f32 %v7768_v21, %v11506_v63  ;;  %v11566_v48 = vadd.f32 %v7787_v6, %v4394_v58 }
 0x29d   :  { %v4352_v52 = vpop.f32.mrf.mxu1  ;;  %v4747_v26 = vpop.f32.mrf.mxu0 }
 0x29e   :  { %v4395_v60 = vadd.f32 %v4352_v52, %v11514_v23  ;;  %v11569_v2 = vadd.f32 %v4747_v26, %v4392_v56 }
 0x29f   :  { %v7769_v50 = vpop.f32.mrf.mxu1 }
 0x2a0   :  { %v4398_v41 = vadd.f32 %v7769_v50, %v11516_v61 }
 0x2a1   :  { %v4355_v59 = vpop.f32.mrf.mxu1  ;;  %v7790_v62 = vpop.f32.mrf.mxu0 }
 0x2a2   :  { %v4396_v49 = vadd.f32 %v4355_v59, %v11521_v24  ;;  %v11573_v13 = vadd.f32 %v7790_v62, %v4397_v15 }
 0x2a3   :  { %v4760_v8 = vpop.f32.mrf.mxu0 }
 0x2a4   :  { %v11575_v63 = vadd.f32 %v4760_v8, %v4395_v60 }
 0x2a5   :  { %v7791_v14 = vpop.f32.mrf.mxu0 }
 0x2a6   :  { %v11577_v39 = vadd.f32 %v7791_v14, %v4398_v41 }
 0x2a7   :  { %v4763_v44 = vpop.f32.mrf.mxu0 }
 0x2a8   :  { %v11579_v23 = vadd.f32 %v4763_v44, %v4396_v49 }
 0x2a9   :  { %v7772_v28 = vpop.f32.mrf.mxu1 }
 0x2aa   :  { %v4401_v3 = vadd.f32 %v7772_v28, %v11525_v40 }
 0x2ab   :  { %v4368_v35 = vpop.f32.mrf.mxu1 }
 0x2ac   :  { %v7794_v61 = vpop.f32.mrf.mxu0  ;;  %v4399_v19 = vadd.f32 %v4368_v35, %v11527_v34 }
 0x2ad   :  { %v11583_v29 = vadd.f32 %v7794_v61, %v4401_v3  ;;  %v7773_v24 = vpop.f32.mrf.mxu1 }
 0x2ae   :  { %v4776_v37 = vpop.f32.mrf.mxu0  ;;  %v4402_v51 = vadd.f32 %v7773_v24, %v11529_v46 }
 0x2af   :  { %v11586_v38 = vadd.f32 %v4776_v37, %v4399_v19  ;;  %v4371_v43 = vpop.f32.mrf.mxu1 }
 0x2b0   :  { %v7795_v16 = vpop.f32.mrf.mxu0  ;;  %v4400_v5 = vadd.f32 %v4371_v43, %v11531_v0 }
 0x2b1   :  { %v11589_v25 = vadd.f32 %v7795_v16, %v4402_v51  ;;  %v7800_v17 = vpop.f32.mrf.mxu1 }
 0x2b2   :  { %v4779_v40 = vpop.f32.mrf.mxu0  ;;  %v5011_v18 = vadd.f32 %v7800_v17, %v11535_v22 }
 0x2b3   :  { %v11592_v54 = vadd.f32 %v4779_v40, %v4400_v5  ;;  %v4930_v34 = vpop.f32.mrf.mxu1 }
 0x2b4   :  { %v5009_v55 = vadd.f32 %v4930_v34, %v11538_v4  ;;  %v7822_v36 = vpop.f32.mrf.mxu0 }
 0x2b5   :  { %v7801_v11 = vpop.f32.mrf.mxu1  ;;  %v11595_v46 = vadd.f32 %v7822_v36, %v5011_v18 }
 0x2b6   :  { %v5012_v31 = vadd.f32 %v7801_v11, %v11541_v20  ;;  %v5358_v47 = vpop.f32.mrf.mxu0 }
 0x2b7   :  { %v4933_v53 = vpop.f32.mrf.mxu1  ;;  %v11598_v0 = vadd.f32 %v5358_v47, %v5009_v55 }
 0x2b8   :  { %v5010_v9 = vadd.f32 %v4933_v53, %v11544_v10  ;;  %v7823_v30 = vpop.f32.mrf.mxu0 }
 0x2b9   :  { %v7804_v58 = vpop.f32.mrf.mxu1  ;;  %v11601_v22 = vadd.f32 %v7823_v30, %v5012_v31 }
 0x2ba   :  { %v5015_v45 = vadd.f32 %v7804_v58, %v11548_v57  ;;  %v5361_v7 = vpop.f32.mrf.mxu0 }
 0x2bb   :  { %v4946_v4 = vpop.f32.mrf.mxu1  ;;  %v11604_v56 = vadd.f32 %v5361_v7, %v5010_v9 }
 0x2bc   :  { %v5013_v33 = vadd.f32 %v4946_v4, %v11551_v1 }
 0x2bd   :  { %v7805_v21 = vpop.f32.mrf.mxu1 }
 0x2be   :  { %v5016_v20 = vadd.f32 %v7805_v21, %v11554_v42 }
 0x2bf   :  { %v7826_v15 = vpop.f32.mrf.mxu0  ;;  %v4949_v52 = vpop.f32.mrf.mxu1 }
 0x2c0   :  { %v11608_v6 = vadd.f32 %v7826_v15, %v5015_v45  ;;  %v5014_v10 = vadd.f32 %v4949_v52, %v11557_v27 }
 0x2c1   :  { %v5374_v60 = vpop.f32.mrf.mxu0  ;;  %v7808_v50 = vpop.f32.mrf.mxu1 }
 0x2c2   :  { %v11611_v26 = vadd.f32 %v5374_v60, %v5013_v33  ;;  %v5019_v57 = vadd.f32 %v7808_v50, %v11561_v12 }
 0x2c3   :  { %v7827_v41 = vpop.f32.mrf.mxu0  ;;  %v4962_v62 = vpop.f32.mrf.mxu1 }
 0x2c4   :  { %v11614_v59 = vadd.f32 %v7827_v41, %v5016_v20  ;;  %v5017_v1 = vadd.f32 %v4962_v62, %v11563_v32 }
 0x2c5   :  { %v5377_v49 = vpop.f32.mrf.mxu0  ;;  %v7809_v8 = vpop.f32.mrf.mxu1 }
 0x2c6   :  { %v11617_v42 = vadd.f32 %v5377_v49, %v5014_v10  ;;  %v5020_v14 = vadd.f32 %v7809_v8, %v11566_v48 }
 0x2c7   :  { %v7830_v44 = vpop.f32.mrf.mxu0  ;;  %v4965_v28 = vpop.f32.mrf.mxu1 }
 0x2c8   :  { %v11620_v27 = vadd.f32 %v7830_v44, %v5019_v57  ;;  %v5018_v3 = vadd.f32 %v4965_v28, %v11569_v2 }
 0x2c9   :  { %v5390_v35 = vpop.f32.mrf.mxu0  ;;  %v7812_v61 = vpop.f32.mrf.mxu1 }
 0x2ca   :  { %v11623_v12 = vadd.f32 %v5390_v35, %v5017_v1  ;;  %v5023_v19 = vadd.f32 %v7812_v61, %v11573_v13 }
 0x2cb   :  { %v7831_v24 = vpop.f32.mrf.mxu0  ;;  %v4978_v37 = vpop.f32.mrf.mxu1 }
 0x2cc   :  { %v11626_v32 = vadd.f32 %v7831_v24, %v5020_v14  ;;  %v5021_v51 = vadd.f32 %v4978_v37, %v11575_v63 }
 0x2cd   :  { %v5393_v43 = vpop.f32.mrf.mxu0  ;;  %v7813_v16 = vpop.f32.mrf.mxu1 }
 0x2ce   :  { %v11629_v48 = vadd.f32 %v5393_v43, %v5018_v3  ;;  %v5024_v5 = vadd.f32 %v7813_v16, %v11577_v39 }
 0x2cf   :  { %v7834_v17 = vpop.f32.mrf.mxu0  ;;  %v4981_v40 = vpop.f32.mrf.mxu1 }
 0x2d0   :  { %v11632_v2 = vadd.f32 %v7834_v17, %v5023_v19  ;;  %v5022_v18 = vadd.f32 %v4981_v40, %v11579_v23 }
 0x2d1   :  { %v5406_v34 = vpop.f32.mrf.mxu0  ;;  %v7816_v55 = vpop.f32.mrf.mxu1 }
 0x2d2   :  { %v11635_v13 = vadd.f32 %v5406_v34, %v5021_v51  ;;  %v5027_v36 = vadd.f32 %v7816_v55, %v11583_v29 }
 0x2d3   :  { %v7835_v11 = vpop.f32.mrf.mxu0  ;;  %v4994_v31 = vpop.f32.mrf.mxu1 }
 0x2d4   :  { %v11638_v63 = vadd.f32 %v7835_v11, %v5024_v5  ;;  %v5025_v47 = vadd.f32 %v4994_v31, %v11586_v38 }
 0x2d5   :  { %v5409_v53 = vpop.f32.mrf.mxu0  ;;  %v7817_v9 = vpop.f32.mrf.mxu1 }
 0x2d6   :  { %v11641_v39 = vadd.f32 %v5409_v53, %v5022_v18  ;;  %v5028_v30 = vadd.f32 %v7817_v9, %v11589_v25 }
 0x2d7   :  { %v4997_v58 = vpop.f32.mrf.mxu1 }
 0x2d8   :  { %v5026_v23 = vadd.f32 %v4997_v58, %v11592_v54 }
 0x2dc   :  { %v7844_v7 = vpop.f32.mrf.mxu1 }
 0x2de   :  { %v7838_v45 = vpop.f32.mrf.mxu0  ;;  %v5786_v20 = vpop.f32.mrf.mxu1 }
 0x2df   :  { %v11645_v4 = vadd.f32 %v7838_v45, %v5027_v36  ;;  %v5865_v45 = vadd.f32 %v5786_v20, %v11598_v0 }
 0x2e0   :  { %v5422_v29 = vpop.f32.mrf.mxu0  ;;  %v7845_v10 = vpop.f32.mrf.mxu1 }
 0x2e1   :  { %v11647_v33 = vadd.f32 %v5422_v29, %v5025_v47 }
 0x2e2   :  { %v7839_v21 = vpop.f32.mrf.mxu0  ;;  %v5789_v50 = vpop.f32.mrf.mxu1 }
 0x2e3   :  { %12175 = vst [vmem:[#allocation11_spill] sm:$0xff] %v11647_v33  ;;  %v11649_v15 = vadd.f32 %v7839_v21, %v5028_v30  ;;  %v5867_v30 = vadd.f32 %v7844_v7, %v11595_v46  ;;  %v5868_v46 = vadd.f32 %v7845_v10, %v11601_v22  ;;  %v5866_v0 = vadd.f32 %v5789_v50, %v11604_v56 }
 0x2e4   :  { %v5425_v38 = vpop.f32.mrf.mxu0 }
 0x2e5   :  { %12176 = vst [vmem:[#allocation32_spill] sm:$0xff] %v11649_v15  ;;  %v11651_v52 = vadd.f32 %v5425_v38, %v5026_v23  ;;  %v11710_v38 = vld [vmem:[%s11872_s7] ss:$0 sm:$0xff] }
 0x2e6   :  { %v7866_v60 = vpop.f32.mrf.mxu0 }
 0x2e7   :  { %12177 = vst [vmem:[#allocation33_spill] sm:$0xff] %v11651_v52  ;;  %v6151_v29 = vadd.f32 %v7866_v60, %v5867_v30 }
 0x2e8   :  { %v6070_v25 = vpop.f32.mrf.mxu0 }
 0x2e9   :  { %v6149_v7 = vadd.f32 %v6070_v25, %v5865_v45 }
 0x2ea   :  { %v7867_v57 = vpop.f32.mrf.mxu0 }
 0x2eb   :  { %v6152_v30 = vadd.f32 %v7867_v57, %v5868_v46 }
 0x2ec   :  { %v6073_v54 = vpop.f32.mrf.mxu0 }
 0x2ed   :  { %v7848_v41 = vpop.f32.mrf.mxu1 }
 0x2ee   :  { %v7870_v62 = vpop.f32.mrf.mxu0 }
 0x2ef   :  { %v5802_v1 = vpop.f32.mrf.mxu1 }
 0x2f0   :  { %v6086_v49 = vpop.f32.mrf.mxu0 }
 0x2f1   :  { %v7849_v8 = vpop.f32.mrf.mxu1 }
 0x2f2   :  { %v11653_v14 = vpop.f32.mrf.mxu0  ;;  %v5872_v50 = vadd.f32 %v7849_v8, %v11614_v59 }
 0x2f3   :  { %v11655_v44 = vpop.f32.mrf.mxu1 }
 0x2f4   :  { %v11657_v28 = vpop.f32.mrf.mxu0  ;;  %v6156_v59 = vadd.f32 %v11653_v14, %v5872_v50 }
 0x2f9   :  { %v11659_v3 = vpop.f32.mrf.mxu1 }
 0x2fb   :  { %v11661_v35 = vpop.f32.mrf.mxu1  ;;  %v11663_v61 = vpop.f32.mrf.mxu0 }
 0x2fd   :  { %v11665_v19 = vpop.f32.mrf.mxu1  ;;  %v11667_v24 = vpop.f32.mrf.mxu0 }
 0x2ff   :  { %v11669_v37 = vpop.f32.mrf.mxu0  ;;  %v11671_v51 = vpop.f32.mrf.mxu1 }
 0x301   :  { %v11673_v43 = vpop.f32.mrf.mxu0 }
 0x305   :  { %v11675_v16 = vpop.f32.mrf.mxu1  ;;  %v11677_v5 = vpop.f32.mrf.mxu0 }
 0x307   :  { %v11679_v17 = vpop.f32.mrf.mxu1  ;;  %v11681_v40 = vpop.f32.mrf.mxu0 }
 0x309   :  { %v11683_v18 = vpop.f32.mrf.mxu1  ;;  %v11685_v34 = vpop.f32.mrf.mxu0 }
 0x30b   :  { %v11687_v55 = vpop.f32.mrf.mxu1  ;;  %v11689_v36 = vpop.f32.mrf.mxu0 }
 0x310   :  { %v11691_v11 = vpop.f32.mrf.mxu1 }
 0x311   :  { %12178 = vst [vmem:[#allocation13_spill] sm:$0xff] %v11691_v11  ;;  %v11695_v47 = vpop.f32.mrf.mxu0 }
 0x312   :  { %v11693_v31 = vpop.f32.mrf.mxu1  ;;  %12180 = vst [vmem:[#allocation17_spill] sm:$0xff] %v11695_v47  ;;  %v5869_v47 = vadd.f32 %v5802_v1, %v11611_v26 }
 0x313   :  { %12179 = vst [vmem:[#allocation16_spill] sm:$0xff] %v11693_v31  ;;  %v11699_v9 = vpop.f32.mrf.mxu0  ;;  %v6150_v31 = vadd.f32 %v6073_v54, %v5866_v0  ;;  %v5870_v54 = vadd.f32 %v11655_v44, %v11617_v42  ;;  %v5875_v42 = vadd.f32 %v11659_v3, %v11620_v27 }
 0x314   :  { %v11697_v53 = vpop.f32.mrf.mxu1  ;;  %12182 = vst [vmem:[#allocation18_spill] sm:$0xff] %v11699_v9  ;;  %v11717_v9 = vld [vmem:[%s11873_s9] ss:$0 sm:$0xff] }
 0x315   :  { %12181 = vst [vmem:[#allocation37_spill] sm:$0xff] %v11697_v53  ;;  %v11704_v23 = vpop.f32.mrf.mxu0 }
 0x316   :  { %v11702_v58 = vpop.f32.mrf.mxu1  ;;  %12184 = vst [vmem:[#allocation41_spill] sm:$0xff] %v11704_v23 }
 0x317   :  { %12183 = vst [vmem:[#allocation40_spill] sm:$0xff] %v11702_v58  ;;  %v11712_v52 = vpop.f32.mrf.mxu0 }
 0x318   :  { %v7888_v21 = vpop.f32.mrf.mxu1  ;;  %12185 = vst [vmem:[#allocation44_spill] sm:$0xff] %v11712_v52  ;;  %v5871_v52 = vadd.f32 %v7848_v41, %v11608_v6 }
 0x319   :  { %v6477_v23 = vadd.f32 %v7888_v21, %v6151_v29  ;;  %v7910_v60 = vpop.f32.mrf.mxu0  ;;  %v6153_v21 = vadd.f32 %v6086_v49, %v5869_v47 }
 0x31a   :  { %v6396_v20 = vpop.f32.mrf.mxu1  ;;  %v6696_v15 = vadd.f32 %v7910_v60, %v11717_v9  ;;  %v6155_v57 = vadd.f32 %v7870_v62, %v5871_v52  ;;  %v6154_v60 = vadd.f32 %v11657_v28, %v5870_v54 }
 0x31b   :  { %v6504_v58 = vadd.f32 %v11710_v38, %v6477_v23  ;;  %v6475_v53 = vadd.f32 %v6396_v20, %v6149_v7  ;;  %v6687_v11 = vpop.f32.mrf.mxu0  ;;  %v5873_v20 = vadd.f32 %v11661_v35, %v11623_v12  ;;  %v5876_v12 = vadd.f32 %v11665_v19, %v11626_v32 }
 0x31c   :  { %v7889_v33 = vpop.f32.mrf.mxu1  ;;  %v6768_v56 = vmax.f32 %v6696_v15, 0.0  ;;  %v6688_v23 = vadd.f32 %v11717_v9, %v6687_v11  ;;  %v5874_v19 = vadd.f32 %v11671_v51, %v11629_v48 }
 0x31d   :  { %v6524_v22 = vmax.f32 %v6504_v58, 0.0  ;;  %v6502_v10 = vadd.f32 %v11710_v38, %v6475_v53  ;;  %v6478_v25 = vadd.f32 %v7889_v33, %v6152_v30  ;;  %v7911_v29 = vpop.f32.mrf.mxu0 }
 0x31e   :  { %v6399_v45 = vpop.f32.mrf.mxu1  ;;  %v6766_v58 = vmax.f32 %v6688_v23, 0.0  ;;  %v6699_v33 = vadd.f32 %v7911_v29, %v11717_v9  ;;  %v6157_v29 = vadd.f32 %v11667_v24, %v5873_v20 }
 0x31f   :  { %v6505_v6 = vadd.f32 %v11710_v38, %v6478_v25  ;;  %v6788_v41 = vadd.f32 %v6768_v56, %v6524_v22  ;;  %v6476_v26 = vadd.f32 %v6399_v45, %v6150_v31  ;;  %v6522_v1 = vmax.f32 %v6502_v10, 0.0  ;;  %v6690_v15 = vpop.f32.mrf.mxu0 }
 0x320   :  { %v7892_v53 = vpop.f32.mrf.mxu1  ;;  %v6691_v49 = vadd.f32 %v11717_v9, %v6690_v15  ;;  %v6769_v11 = vmax.f32 %v6699_v33, 0.0  ;;  %v6159_v10 = vadd.f32 %v11663_v61, %v5875_v42  ;;  %v6160_v15 = vadd.f32 %v11669_v37, %v5876_v12 }
 0x321   :  { %6808 = vst [vmem:[%s11874_s10 + $0x10] sm:$0xff] %v6788_v41  ;;  %v6503_v52 = vadd.f32 %v11710_v38, %v6476_v26  ;;  %v6481_v62 = vadd.f32 %v7892_v53, %v6155_v57  ;;  %v6525_v8 = vmax.f32 %v6505_v6, 0.0  ;;  %v6786_v44 = vadd.f32 %v6766_v58, %v6522_v1  ;;  %v7914_v47 = vpop.f32.mrf.mxu0 }
 0x322   :  { %v6412_v31 = vpop.f32.mrf.mxu1  ;;  %v6767_v0 = vmax.f32 %v6691_v49, 0.0  ;;  %v6712_v30 = vadd.f32 %v7914_v47, %v11717_v9 }
 0x323   :  { %v6523_v46 = vmax.f32 %v6503_v52, 0.0  ;;  %v6508_v14 = vadd.f32 %v11710_v38, %v6481_v62  ;;  %v6479_v7 = vadd.f32 %v6412_v31, %v6153_v21  ;;  %6806 = vst [vmem:[%s11874_s10] sm:$0xff] %v6786_v44  ;;  %v6789_v27 = vadd.f32 %v6769_v11, %v6525_v8  ;;  %v6703_v22 = vpop.f32.mrf.mxu0 }
 0x324   :  { %v7893_v3 = vpop.f32.mrf.mxu1  ;;  %v6772_v28 = vmax.f32 %v6712_v30, 0.0  ;;  %v6704_v45 = vadd.f32 %v11717_v9, %v6703_v22  ;;  %v6158_v62 = vadd.f32 %v11673_v43, %v5874_v19  ;;  %v5879_v44 = vadd.f32 %v11675_v16, %v11632_v2 }
 0x325   :  { %v6506_v25 = vadd.f32 %v11710_v38, %v6479_v7  ;;  %v6787_v56 = vadd.f32 %v6767_v0, %v6523_v46  ;;  %v6482_v50 = vadd.f32 %v7893_v3, %v6156_v59  ;;  %v6528_v35 = vmax.f32 %v6508_v14, 0.0  ;;  %6809 = vst [vmem:[%s11874_s10 + $0x18] sm:$0xff] %v6789_v27  ;;  %v7915_v23 = vpop.f32.mrf.mxu0 }
 0x326   :  { %v6415_v57 = vpop.f32.mrf.mxu1  ;;  %v6715_v32 = vadd.f32 %v7915_v23, %v11717_v9  ;;  %v6770_v26 = vmax.f32 %v6704_v45, 0.0  ;;  %v5877_v43 = vadd.f32 %v11679_v17, %v11635_v13  ;;  %v6163_v7 = vadd.f32 %v11677_v5, %v5879_v44 }
 0x327   :  { %6807 = vst [vmem:[%s11874_s10 + $0x8] sm:$0xff] %v6787_v56  ;;  %v6509_v61 = vadd.f32 %v11710_v38, %v6482_v50  ;;  %v6480_v21 = vadd.f32 %v6415_v57, %v6154_v60  ;;  %v6526_v6 = vmax.f32 %v6506_v25, 0.0  ;;  %v6792_v41 = vadd.f32 %v6772_v28, %v6528_v35  ;;  %v6706_v1 = vpop.f32.mrf.mxu0 }
 0x328   :  { %v7896_v54 = vpop.f32.mrf.mxu1  ;;  %v6773_v33 = vmax.f32 %v6715_v32, 0.0  ;;  %v6707_v48 = vadd.f32 %v11717_v9, %v6706_v1  ;;  %v6161_v25 = vadd.f32 %v11681_v40, %v5877_v43  ;;  %v5878_v35 = vadd.f32 %v11687_v55, %v11641_v39  ;;  %v12186_v32 = vld [vmem:[#allocation13_spill] sm:$0xff] }
 0x329   :  { %v6529_v58 = vmax.f32 %v6509_v61, 0.0  ;;  %v6507_v24 = vadd.f32 %v11710_v38, %v6480_v21  ;;  %v6485_v53 = vadd.f32 %v7896_v54, %v6159_v10  ;;  %6812 = vst [vmem:[%s11874_s10 + $0x30] sm:$0xff] %v6792_v41  ;;  %v6790_v59 = vadd.f32 %v6770_v26, %v6526_v6 }
 0x32a   :  { %v6428_v52 = vpop.f32.mrf.mxu1  ;;  %v7918_v51 = vpop.f32.mrf.mxu0  ;;  %v6771_v37 = vmax.f32 %v6707_v48, 0.0  ;;  %v5880_v10 = vadd.f32 %v11683_v18, %v11638_v63  ;;  %v6162_v21 = vadd.f32 %v11689_v36, %v5878_v35  ;;  %v5883_v19 = vadd.f32 %v12186_v32, %v11645_v4 }
 0x32b   :  { %v6512_v49 = vadd.f32 %v11710_v38, %v6485_v53  ;;  %v6793_v42 = vadd.f32 %v6773_v33, %v6529_v58  ;;  %v6483_v8 = vadd.f32 %v6428_v52, %v6157_v29  ;;  %v6527_v11 = vmax.f32 %v6507_v24, 0.0  ;;  %6810 = vst [vmem:[%s11874_s10 + $0x20] sm:$0xff] %v6790_v59  ;;  %v12187_v33 = vld [vmem:[#allocation11_spill] sm:$0xff]  ;;  %v12189_v52 = vld [vmem:[#allocation17_spill] sm:$0xff] }
 0x32c   :  { %v7897_v31 = vpop.f32.mrf.mxu1  ;;  %v6728_v47 = vadd.f32 %v7918_v51, %v11717_v9  ;;  %v6719_v46 = vpop.f32.mrf.mxu0  ;;  %v6164_v63 = vadd.f32 %v11685_v34, %v5880_v10  ;;  %v6167_v48 = vadd.f32 %v12189_v52, %v5883_v19 }
 0x32d   :  { %6813 = vst [vmem:[%s11874_s10 + $0x38] sm:$0xff] %v6793_v42  ;;  %v6510_v14 = vadd.f32 %v11710_v38, %v6483_v8  ;;  %v6486_v2 = vadd.f32 %v7897_v31, %v6160_v15  ;;  %v6720_v16 = vadd.f32 %v11717_v9, %v6719_v46  ;;  %v6532_v0 = vmax.f32 %v6512_v49, 0.0  ;;  %v12188_v15 = vld [vmem:[#allocation16_spill] sm:$0xff]  ;;  %v12191_v8 = vld [vmem:[#allocation37_spill] sm:$0xff] }
 0x32e   :  { %v6791_v20 = vadd.f32 %v6771_v37, %v6527_v11  ;;  %v6776_v60 = vmax.f32 %v6728_v47, 0.0  ;;  %v6431_v27 = vpop.f32.mrf.mxu1  ;;  %v7919_v3 = vpop.f32.mrf.mxu0  ;;  %v5881_v59 = vadd.f32 %v12188_v15, %v12187_v33  ;;  %v12190_v42 = vld [vmem:[#allocation32_spill] sm:$0xff]  ;;  %v12192_v47 = vld [vmem:[#allocation18_spill] sm:$0xff] }
 0x32f   :  { %v6530_v30 = vmax.f32 %v6510_v14, 0.0  ;;  %v6513_v22 = vadd.f32 %v11710_v38, %v6486_v2  ;;  %v6484_v13 = vadd.f32 %v6431_v27, %v6158_v62  ;;  %v6774_v17 = vmax.f32 %v6720_v16, 0.0 }
 0x330   :  { %6811 = vst [vmem:[%s11874_s10 + $0x28] sm:$0xff] %v6791_v20  ;;  %v6796_v5 = vadd.f32 %v6776_v60, %v6532_v0  ;;  %v7900_v56 = vpop.f32.mrf.mxu1  ;;  %v6731_v50 = vadd.f32 %v7919_v3, %v11717_v9  ;;  %v6722_v12 = vpop.f32.mrf.mxu0  ;;  %v5884_v44 = vadd.f32 %v12191_v8, %v12190_v42  ;;  %v6165_v46 = vadd.f32 %v12192_v47, %v5881_v59  ;;  %v12193_v0 = vld [vmem:[#allocation33_spill] sm:$0xff]  ;;  %v12194_v20 = vld [vmem:[#allocation40_spill] sm:$0xff] }
 0x331   :  { %v6511_v28 = vadd.f32 %v11710_v38, %v6484_v13  ;;  %v6794_v57 = vadd.f32 %v6774_v17, %v6530_v30  ;;  %v6489_v45 = vadd.f32 %v7900_v56, %v6163_v7  ;;  %v6533_v18 = vmax.f32 %v6513_v22, 0.0  ;;  %v12195_v22 = vld [vmem:[#allocation41_spill] sm:$0xff] }
 0x332   :  { %6816 = vst [vmem:[%s11874_s10 + $0x50] sm:$0xff] %v6796_v5  ;;  %v6777_v40 = vmax.f32 %v6731_v50, 0.0  ;;  %v6444_v23 = vpop.f32.mrf.mxu1  ;;  %v6723_v29 = vadd.f32 %v11717_v9, %v6722_v12  ;;  %v7922_v61 = vpop.f32.mrf.mxu0  ;;  %v5882_v60 = vadd.f32 %v12194_v20, %v12193_v0  ;;  %v6168_v13 = vadd.f32 %v12195_v22, %v5884_v44 }
 0x333   :  { %6814 = vst [vmem:[%s11874_s10 + $0x40] sm:$0xff] %v6794_v57  ;;  %v6516_v39 = vadd.f32 %v11710_v38, %v6489_v45  ;;  %v6487_v55 = vadd.f32 %v6444_v23, %v6161_v25  ;;  %v6744_v34 = vadd.f32 %v7922_v61, %v11717_v9  ;;  %v6531_v6 = vmax.f32 %v6511_v28, 0.0 }
 0x334   :  { %v6797_v41 = vadd.f32 %v6777_v40, %v6533_v18  ;;  %v6775_v26 = vmax.f32 %v6723_v29, 0.0  ;;  %v7901_v54 = vpop.f32.mrf.mxu1  ;;  %v6735_v1 = vpop.f32.mrf.mxu0  ;;  %v12196_v40 = vld [vmem:[#allocation44_spill] sm:$0xff] }
 0x335   :  { %v6536_v58 = vmax.f32 %v6516_v39, 0.0  ;;  %v6514_v36 = vadd.f32 %v11710_v38, %v6487_v55  ;;  %v6490_v24 = vadd.f32 %v7901_v54, %v6164_v63  ;;  %v6780_v53 = vmax.f32 %v6744_v34, 0.0 }
 0x336   :  { %6817 = vst [vmem:[%s11874_s10 + $0x58] sm:$0xff] %v6797_v41  ;;  %v6795_v4 = vadd.f32 %v6775_v26, %v6531_v6  ;;  %v6447_v51 = vpop.f32.mrf.mxu1  ;;  %v6736_v62 = vadd.f32 %v11717_v9, %v6735_v1  ;;  %v7923_v49 = vpop.f32.mrf.mxu0  ;;  %v6166_v23 = vadd.f32 %v12196_v40, %v5882_v60 }
 0x337   :  { %v6517_v11 = vadd.f32 %v11710_v38, %v6490_v24  ;;  %v6800_v37 = vadd.f32 %v6780_v53, %v6536_v58  ;;  %v6488_v31 = vadd.f32 %v6447_v51, %v6162_v21  ;;  %v6534_v43 = vmax.f32 %v6514_v36, 0.0 }
 0x338   :  { %6815 = vst [vmem:[%s11874_s10 + $0x48] sm:$0xff] %v6795_v4  ;;  %v6778_v14 = vmax.f32 %v6736_v62, 0.0  ;;  %v7904_v2 = vpop.f32.mrf.mxu1  ;;  %v6747_v16 = vadd.f32 %v7923_v49, %v11717_v9  ;;  %v6738_v7 = vpop.f32.mrf.mxu0 }
 0x339   :  { %6820 = vst [vmem:[%s11874_s10 + $0x70] sm:$0xff] %v6800_v37  ;;  %v6515_v27 = vadd.f32 %v11710_v38, %v6488_v31  ;;  %v6493_v3 = vadd.f32 %v7904_v2, %v6167_v48  ;;  %v6739_v30 = vadd.f32 %v11717_v9, %v6738_v7  ;;  %v6537_v17 = vmax.f32 %v6517_v11, 0.0 }
 0x33a   :  { %v6798_v10 = vadd.f32 %v6778_v14, %v6534_v43  ;;  %v6781_v25 = vmax.f32 %v6747_v16, 0.0  ;;  %v6460_v5 = vpop.f32.mrf.mxu1  ;;  %v7926_v56 = vpop.f32.mrf.mxu0 }
 0x33b   :  { %v6535_v50 = vmax.f32 %v6515_v27, 0.0  ;;  %v6520_v12 = vadd.f32 %v11710_v38, %v6493_v3  ;;  %v6491_v35 = vadd.f32 %v6460_v5, %v6165_v46  ;;  %v6779_v28 = vmax.f32 %v6739_v30, 0.0 }
 0x33c   :  { %6818 = vst [vmem:[%s11874_s10 + $0x60] sm:$0xff] %v6798_v10  ;;  %v6801_v57 = vadd.f32 %v6781_v25, %v6537_v17  ;;  %v7905_v45 = vpop.f32.mrf.mxu1  ;;  %v6760_v63 = vadd.f32 %v7926_v56, %v11717_v9  ;;  %v6751_v18 = vpop.f32.mrf.mxu0 }
 0x33d   :  { %v6518_v29 = vadd.f32 %v11710_v38, %v6491_v35  ;;  %v6799_v61 = vadd.f32 %v6779_v28, %v6535_v50  ;;  %v6494_v21 = vadd.f32 %v7905_v45, %v6168_v13  ;;  %v6540_v39 = vmax.f32 %v6520_v12, 0.0 }
 0x33e   :  { %6821 = vst [vmem:[%s11874_s10 + $0x78] sm:$0xff] %v6801_v57  ;;  %v6784_v55 = vmax.f32 %v6760_v63, 0.0  ;;  %v6463_v34 = vpop.f32.mrf.mxu1  ;;  %v6752_v32 = vadd.f32 %v11717_v9, %v6751_v18  ;;  %v7927_v19 = vpop.f32.mrf.mxu0 }
 0x33f   :  { %6819 = vst [vmem:[%s11874_s10 + $0x68] sm:$0xff] %v6799_v61  ;;  %v6521_v6 = vadd.f32 %v11710_v38, %v6494_v21  ;;  %v6492_v41 = vadd.f32 %v6463_v34, %v6166_v23  ;;  %v6763_v26 = vadd.f32 %v7927_v19, %v11717_v9  ;;  %v6538_v54 = vmax.f32 %v6518_v29, 0.0 }
 0x340   :  { %v6804_v1 = vadd.f32 %v6784_v55, %v6540_v39  ;;  %v6782_v58 = vmax.f32 %v6752_v32, 0.0  ;;  %v6754_v36 = vpop.f32.mrf.mxu0 }
 0x341   :  { %v6541_v24 = vmax.f32 %v6521_v6, 0.0  ;;  %v6519_v53 = vadd.f32 %v11710_v38, %v6492_v41  ;;  %v6785_v33 = vmax.f32 %v6763_v26, 0.0  ;;  %v6755_v15 = vadd.f32 %v11717_v9, %v6754_v36 }
 0x342   :  { %6824 = vst [vmem:[%s11874_s10 + $0x90] sm:$0xff] %v6804_v1  ;;  %v6802_v59 = vadd.f32 %v6782_v58, %v6538_v54 }
 0x343   :  { %v6539_v52 = vmax.f32 %v6519_v53, 0.0  ;;  %v6805_v48 = vadd.f32 %v6785_v33, %v6541_v24  ;;  %v6783_v4 = vmax.f32 %v6755_v15, 0.0 }
 0x344   :  { %6822 = vst [vmem:[%s11874_s10 + $0x80] sm:$0xff] %v6802_v59 }
 0x345   :  { %6825 = vst [vmem:[%s11874_s10 + $0x98] sm:$0xff] %v6805_v48  ;;  %v6803_v38 = vadd.f32 %v6783_v4, %v6539_v52 }
 0x347   :  { %6823 = vst [vmem:[%s11874_s10 + $0x88] sm:$0xff] %v6803_v38 }

</bundles_post_ra>
